<compile_context>
chip_gen: v6e
topology: v6e:2x2x1
jax: 0.10.0
libtpu: 0.0.40
codegen_flags: <defaults>
</compile_context>

<pallas_src>
import functools
import math

import jax
import jax.numpy as jnp
from jax.experimental import pallas as pl
from jax.experimental.pallas import tpu as pltpu

# ----------------------------- small, shape-consistent config -----------------------------
VOCAB = 100
MAX_POS = 16
HIDDEN = 128          # distilbert hidden_size (scaled down from 768)
N_LAYERS = 2
N_HEADS = 4
HEAD_DIM = HIDDEN // N_HEADS
FFN = 4 * HIDDEN
CONV_OUT = 32
CONV_PAD = 128        # conv channels padded to a full lane tile
FC_TEXT = 64
FC_NUM = 64
FEAT_PAD = 128        # combined feature slab: text in lanes [0,64), numeric in [64,128)
N_CLASSES = 2
OUT_PAD = 128         # logits padded to a full lane tile; sliced to 2 in the wrapper
LN_EPS = 1e-12

BATCH = 2
SEQ = 8

_VMEM = pl.BlockSpec(memory_space=pltpu.MemorySpace.VMEM)


# ----------------------------------- fused Pallas kernel ----------------------------------
def _layer_norm(x, g, b):
    mean = jnp.mean(x, axis=-1, keepdims=True)
    c = x - mean
    var = jnp.mean(c * c, axis=-1, keepdims=True)
    return c * jax.lax.rsqrt(var + LN_EPS) * g + b


def _fused_forward_kernel(
    emb_ref, bias_ref, num_ref,
    emb_g_ref, emb_b_ref,
    wqkv_ref, bqkv_ref, wo_ref, bo_ref,
    ln1_g_ref, ln1_b_ref,
    w1_ref, b1_ref, w2_ref, b2_ref,
    ln2_g_ref, ln2_b_ref,
    conv_w_ref, conv_b_ref,
    fc_text_w_ref, fc_text_b_ref,
    fc_num_w_ref, fc_num_b_ref,
    fc_comb_w_ref, fc_comb_b_ref,
    out_ref,
    *, batch, seq, n_layers, n_heads, head_dim):
    f32 = jnp.float32
    bf16 = jnp.bfloat16
    h_dim = n_heads * head_dim
    scale = 1.0 / math.sqrt(head_dim)

    # ---- DistilBERT embeddings LayerNorm (no zeros residual) ----
    hs = _layer_norm(emb_ref[...], emb_g_ref[...], emb_b_ref[...])      # (M, H) f32
    bias = bias_ref[...]                                                # (M, M) additive mask

    # ---- transformer encoder layers (statically unrolled, weights resident in VMEM) ----
    for layer in range(n_layers):
        # fused QKV projection: (M, H) @ (H, 3H)
        qkv = jnp.dot(hs.astype(bf16), wqkv_ref[layer],
                      preferred_element_type=f32) + bqkv_ref[layer]

        # attention over all batches at once; cross-batch / padded keys are masked by `bias`
        ctx_heads = []
        for hd in range(n_heads):
            q = qkv[:, hd * head_dim:(hd + 1) * head_dim]
            k = qkv[:, h_dim + hd * head_dim:h_dim + (hd + 1) * head_dim]
            v = qkv[:, 2 * h_dim + hd * head_dim:2 * h_dim + (hd + 1) * head_dim]
            s = jnp.dot(q, k.T, preferred_element_type=f32) * scale + bias
            s = s - jnp.max(s, axis=-1, keepdims=True)
            p = jnp.exp(s)
            p = p * pl.reciprocal(jnp.sum(p, axis=-1, keepdims=True), approx=True)
            ctx_heads.append(jnp.dot(p, v, preferred_element_type=f32))
        ctx = jnp.concatenate(ctx_heads, axis=-1)                        # (M, H)

        attn_out = jnp.dot(ctx.astype(bf16), wo_ref[layer],
                           preferred_element_type=f32) + bo_ref[layer]
        hs = _layer_norm(attn_out + hs, ln1_g_ref[layer], ln1_b_ref[layer])

        ff = jnp.dot(hs.astype(bf16), w1_ref[layer],
                     preferred_element_type=f32) + b1_ref[layer]
        # TODO(synk): HF DistilBERT uses erf-GELU; tanh approximation keeps it on the EUP.
        ff = jax.nn.gelu(ff, approximate=True)
        ff = jnp.dot(ff.astype(bf16), w2_ref[layer],
                     preferred_element_type=f32) + b2_ref[layer]
        hs = _layer_norm(ff + hs, ln2_g_ref[layer], ln2_b_ref[layer])

    # ---- head: Conv1d(k=3, pad=1) + ReLU + global max-pool over seq, per batch,
    #      computed as 3 shifted, lane-dense (CONV_OUT padded to 128) matmuls ----
    conv_b = conv_b_ref[...]
    rows = jax.lax.broadcasted_iota(jnp.int32, (seq, CONV_PAD), 0)
    pooled_rows = []
    for b in range(batch):
        xb = hs[b * seq:(b + 1) * seq].astype(bf16)                      # (L, H)
        y0 = jnp.dot(xb, conv_w_ref[0], preferred_element_type=f32)      # tap at l-1
        y1 = jnp.dot(xb, conv_w_ref[1], preferred_element_type=f32)      # tap at l
        y2 = jnp.dot(xb, conv_w_ref[2], preferred_element_type=f32)      # tap at l+1
        ym1 = jnp.where(rows >= 1, pltpu.roll(y0, shift=1, axis=0), 0.0)
        yp1 = jnp.where(rows <= seq - 2, pltpu.roll(y2, shift=seq - 1, axis=0), 0.0)
        conv = jnp.maximum(ym1 + y1 + yp1 + conv_b, 0.0)                 # (L, CONV_PAD)
        pooled_rows.append(jnp.max(conv, axis=0, keepdims=True))         # (1, CONV_PAD)
    pooled = jnp.concatenate(pooled_rows, axis=0)                        # (B, CONV_PAD)

    # ---- fc_text -> lanes [0,64); fc_numeric -> lanes [64,128); then fc_combined ----
    text = jnp.dot(pooled.astype(bf16), fc_text_w_ref[...],
                   preferred_element_type=f32) + fc_text_b_ref[...]      # (B, 128)
    numf = num_ref[...] * fc_num_w_ref[...] + fc_num_b_ref[...]          # (B, 128)
    combined = text + numf                                               # dropout = identity
    logits = jnp.dot(combined.astype(bf16), fc_comb_w_ref[...],
                     preferred_element_type=f32) + fc_comb_b_ref[...]
    out_ref[...] = logits                                                # (B, OUT_PAD), lane-dense


# ------------------------------------- params / glue ---------------------------------------
def init_params(key):
    def nrm(k, shape, std=0.02):
        return std * jax.random.normal(k, shape, dtype=jnp.float32)

    keys = iter(jax.random.split(key, 64))
    p = {
        "word_emb": nrm(next(keys), (VOCAB, HIDDEN)),
        "pos_emb": nrm(next(keys), (MAX_POS, HIDDEN)),
        "emb_ln_g": jnp.ones((1, HIDDEN), jnp.float32),
        "emb_ln_b": jnp.zeros((1, HIDDEN), jnp.float32),
    }

    wqkv, wo, w1, w2 = [], [], [], []
    for _ in range(N_LAYERS):
        wq = nrm(next(keys), (HIDDEN, HIDDEN))
        wk = nrm(next(keys), (HIDDEN, HIDDEN))
        wv = nrm(next(keys), (HIDDEN, HIDDEN))
        wqkv.append(jnp.concatenate([wq, wk, wv], axis=1))               # fused QKV (H, 3H)
        wo.append(nrm(next(keys), (HIDDEN, HIDDEN)))
        w1.append(nrm(next(keys), (HIDDEN, FFN)))
        w2.append(nrm(next(keys), (FFN, HIDDEN)))
    p["wqkv"] = jnp.stack(wqkv).astype(jnp.bfloat16)
    p["bqkv"] = jnp.zeros((N_LAYERS, 1, 3 * HIDDEN), jnp.float32)
    p["wo"] = jnp.stack(wo).astype(jnp.bfloat16)
    p["bo"] = jnp.zeros((N_LAYERS, 1, HIDDEN), jnp.float32)
    p["ln1_g"] = jnp.ones((N_LAYERS, 1, HIDDEN), jnp.float32)
    p["ln1_b"] = jnp.zeros((N_LAYERS, 1, HIDDEN), jnp.float32)
    p["w1"] = jnp.stack(w1).astype(jnp.bfloat16)
    p["b1"] = jnp.zeros((N_LAYERS, 1, FFN), jnp.float32)
    p["w2"] = jnp.stack(w2).astype(jnp.bfloat16)
    p["b2"] = jnp.zeros((N_LAYERS, 1, HIDDEN), jnp.float32)
    p["ln2_g"] = jnp.ones((N_LAYERS, 1, HIDDEN), jnp.float32)
    p["ln2_b"] = jnp.zeros((N_LAYERS, 1, HIDDEN), jnp.float32)

    # Conv1d weight (Cout, Cin, 3) -> 3 tap matrices (Cin, CONV_PAD), channels zero-padded
    conv_w = nrm(next(keys), (CONV_OUT, HIDDEN, 3))
    taps = jnp.transpose(conv_w, (2, 1, 0))                              # (3, Cin, Cout)
    taps = jnp.pad(taps, ((0, 0), (0, 0), (0, CONV_PAD - CONV_OUT)))
    p["conv_w"] = taps.astype(jnp.bfloat16)
    p["conv_b"] = jnp.zeros((1, CONV_PAD), jnp.float32)

    # fc_text (32 -> 64) placed in lanes [0,64) of the 128-wide feature slab
    fct = nrm(next(keys), (CONV_OUT, FC_TEXT))
    fct_pad = jnp.zeros((CONV_PAD, FEAT_PAD), jnp.float32).at[:CONV_OUT, :FC_TEXT].set(fct)
    p["fc_text_w"] = fct_pad.astype(jnp.bfloat16)
    p["fc_text_b"] = jnp.zeros((1, FEAT_PAD), jnp.float32)

    # fc_numeric (1 -> 64) placed in lanes [64,128)
    fcn = nrm(next(keys), (1, FC_NUM))
    p["fc_num_w"] = jnp.zeros((1, FEAT_PAD), jnp.float32).at[:, FC_TEXT:FC_TEXT + FC_NUM].set(fcn)
    p["fc_num_b"] = jnp.zeros((1, FEAT_PAD), jnp.float32)

    # fc_combined (128 -> 2), columns zero-padded to 128; matches nn.init.normal_(w, std=.02),
    # nn.init.normal_(b, 0) (std=1.0)
    fcc = nrm(next(keys), (FC_TEXT + FC_NUM, N_CLASSES), std=0.02)
    fcc_pad = jnp.zeros((FEAT_PAD, OUT_PAD), jnp.float32).at[:, :N_CLASSES].set(fcc)
    p["fc_comb_w"] = fcc_pad.astype(jnp.bfloat16)
    fcb = jax.random.normal(next(keys), (N_CLASSES,), dtype=jnp.float32)
    p["fc_comb_b"] = jnp.zeros((1, OUT_PAD), jnp.float32).at[0, :N_CLASSES].set(fcb)
    return p


def distilbert_news_forward(params, input_ids, attention_mask, numeric):
    b, l = input_ids.shape

    # embeddings: token gather done in the wrapper (no clean Pallas gather), LN in-kernel
    tok = jnp.take(params["word_emb"], input_ids, axis=0)                # (B, L, H)
    pos = params["pos_emb"][:l][None, :, :]
    emb = (tok + pos).reshape(b * l, HIDDEN)

    # additive attention bias over the flattened (B*L) key axis:
    # 0 for same-batch non-padded keys, -1e9 for padded or cross-batch keys
    batch_id = jnp.repeat(jnp.arange(b), l)
    same_batch = (batch_id[:, None] == batch_id[None, :]).astype(jnp.float32)
    key_keep = attention_mask.astype(jnp.float32).reshape(1, b * l)
    attn_bias = (same_batch * key_keep - 1.0) * 1e9                      # (B*L, B*L)

    numeric_col = numeric.reshape(b, 1).astype(jnp.float32)

    kernel = functools.partial(
        _fused_forward_kernel, batch=b, seq=l, n_layers=N_LAYERS,
        n_heads=N_HEADS, head_dim=HEAD_DIM)

    logits_pad = pl.pallas_call(
        kernel,
        out_shape=jax.ShapeDtypeStruct((b, OUT_PAD), jnp.float32),
        in_specs=[_VMEM] * 25,
        out_specs=_VMEM,
    )(emb, attn_bias, numeric_col,
      params["emb_ln_g"], params["emb_ln_b"],
      params["wqkv"], params["bqkv"], params["wo"], params["bo"],
      params["ln1_g"], params["ln1_b"],
      params["w1"], params["b1"], params["w2"], params["b2"],
      params["ln2_g"], params["ln2_b"],
      params["conv_w"], params["conv_b"],
      params["fc_text_w"], params["fc_text_b"],
      params["fc_num_w"], params["fc_num_b"],
      params["fc_comb_w"], params["fc_comb_b"])

    return logits_pad[:, :N_CLASSES]                                     # (B, 2)


# ---------------------------------------- main ---------------------------------------------
if __name__ == "__main__":
    key = jax.random.PRNGKey(0)
    k_param, k_ids, k_num = jax.random.split(key, 3)

    params = init_params(k_param)
    input_ids = jax.random.randint(k_ids, (BATCH, SEQ), 0, VOCAB, dtype=jnp.int32)
    attention_mask = jnp.ones((BATCH, SEQ), dtype=jnp.float32)
    attention_mask = attention_mask.at[1, SEQ - 2:].set(0.0)             # some padding in batch 1
    numeric = jax.random.normal(k_num, (BATCH,), dtype=jnp.float32)

    fwd = jax.jit(distilbert_news_forward)
    logits = fwd(params, input_ids, attention_mask, numeric)
    logits = jax.block_until_ready(logits)

    assert logits.shape == (BATCH, N_CLASSES) and logits.dtype == jnp.float32
    assert bool(jnp.all(jnp.isfinite(logits)))
    print("KERNEL_OK")
</pallas_src>

<mosaic_0001>
module attributes {stable_mosaic.version = 11 : i64} {
  func.func @_fused_forward_kernel(%arg0: memref<16x128xf32, #tpu.memory_space<vmem>>, %arg1: memref<16x16xf32, #tpu.memory_space<vmem>>, %arg2: memref<2x1xf32, #tpu.memory_space<vmem>>, %arg3: memref<1x128xf32, #tpu.memory_space<vmem>>, %arg4: memref<1x128xf32, #tpu.memory_space<vmem>>, %arg5: memref<2x128x384xbf16, #tpu.memory_space<vmem>>, %arg6: memref<2x1x384xf32, #tpu.memory_space<vmem>>, %arg7: memref<2x128x128xbf16, #tpu.memory_space<vmem>>, %arg8: memref<2x1x128xf32, #tpu.memory_space<vmem>>, %arg9: memref<2x1x128xf32, #tpu.memory_space<vmem>>, %arg10: memref<2x1x128xf32, #tpu.memory_space<vmem>>, %arg11: memref<2x128x512xbf16, #tpu.memory_space<vmem>>, %arg12: memref<2x1x512xf32, #tpu.memory_space<vmem>>, %arg13: memref<2x512x128xbf16, #tpu.memory_space<vmem>>, %arg14: memref<2x1x128xf32, #tpu.memory_space<vmem>>, %arg15: memref<2x1x128xf32, #tpu.memory_space<vmem>>, %arg16: memref<2x1x128xf32, #tpu.memory_space<vmem>>, %arg17: memref<3x128x128xbf16, #tpu.memory_space<vmem>>, %arg18: memref<1x128xf32, #tpu.memory_space<vmem>>, %arg19: memref<128x128xbf16, #tpu.memory_space<vmem>>, %arg20: memref<1x128xf32, #tpu.memory_space<vmem>>, %arg21: memref<1x128xf32, #tpu.memory_space<vmem>>, %arg22: memref<1x128xf32, #tpu.memory_space<vmem>>, %arg23: memref<128x128xbf16, #tpu.memory_space<vmem>>, %arg24: memref<1x128xf32, #tpu.memory_space<vmem>>, %arg25: memref<2x128xf32, #tpu.memory_space<vmem>>) attributes {dimension_semantics = [], scalar_prefetch = 0 : i64, scratch_operands = 0 : i64, tpu.core_type = #tpu.core_type<tc>} {
    %c0 = arith.constant 0 : index
    %c0_0 = arith.constant 0 : index
    %0 = vector.load %arg0[%c0, %c0_0] : memref<16x128xf32, #tpu.memory_space<vmem>>, vector<16x128xf32>
    %c0_1 = arith.constant 0 : index
    %c0_2 = arith.constant 0 : index
    %1 = vector.load %arg3[%c0_1, %c0_2] : memref<1x128xf32, #tpu.memory_space<vmem>>, vector<1x128xf32>
    %c0_3 = arith.constant 0 : index
    %c0_4 = arith.constant 0 : index
    %2 = vector.load %arg4[%c0_3, %c0_4] : memref<1x128xf32, #tpu.memory_space<vmem>>, vector<1x128xf32>
    %cst = arith.constant dense<0.000000e+00> : vector<16xf32>
    %3 = vector.multi_reduction <add>, %0, %cst [1] : vector<16x128xf32> to vector<16xf32>
    %4 = vector.shape_cast %3 : vector<16xf32> to vector<16x1xf32>
    %cst_5 = arith.constant 1.280000e+02 : f32
    %5 = vector.broadcast %cst_5 : f32 to vector<16x1xf32>
    %6 = arith.divf %4, %5 : vector<16x1xf32>
    %7 = vector.broadcast %6 : vector<16x1xf32> to vector<16x128xf32>
    %8 = arith.subf %0, %7 : vector<16x128xf32>
    %9 = arith.mulf %8, %8 : vector<16x128xf32>
    %cst_6 = arith.constant dense<0.000000e+00> : vector<16xf32>
    %10 = vector.multi_reduction <add>, %9, %cst_6 [1] : vector<16x128xf32> to vector<16xf32>
    %11 = vector.shape_cast %10 : vector<16xf32> to vector<16x1xf32>
    %cst_7 = arith.constant 1.280000e+02 : f32
    %12 = vector.broadcast %cst_7 : f32 to vector<16x1xf32>
    %13 = arith.divf %11, %12 : vector<16x1xf32>
    %cst_8 = arith.constant 9.99999996E-13 : f32
    %14 = vector.broadcast %cst_8 : f32 to vector<16x1xf32>
    %15 = arith.addf %13, %14 : vector<16x1xf32>
    %16 = math.rsqrt %15 : vector<16x1xf32>
    %17 = vector.broadcast %16 : vector<16x1xf32> to vector<16x128xf32>
    %18 = arith.mulf %8, %17 : vector<16x128xf32>
    %19 = vector.broadcast %1 : vector<1x128xf32> to vector<16x128xf32>
    %20 = arith.mulf %18, %19 : vector<16x128xf32>
    %21 = vector.broadcast %2 : vector<1x128xf32> to vector<16x128xf32>
    %22 = arith.addf %20, %21 : vector<16x128xf32>
    %c0_9 = arith.constant 0 : index
    %c0_10 = arith.constant 0 : index
    %23 = vector.load %arg1[%c0_9, %c0_10] : memref<16x16xf32, #tpu.memory_space<vmem>>, vector<16x16xf32>
    %24 = arith.truncf %22 : vector<16x128xf32> to vector<16x128xbf16>
    %c0_11 = arith.constant 0 : index
    %c0_12 = arith.constant 0 : index
    %c0_13 = arith.constant 0 : index
    %25 = vector.load %arg5[%c0_11, %c0_12, %c0_13] : memref<2x128x384xbf16, #tpu.memory_space<vmem>>, vector<1x128x384xbf16>
    %26 = vector.shape_cast %25 : vector<1x128x384xbf16> to vector<128x384xbf16>
    %cst_14 = arith.constant dense<0.000000e+00> : vector<16x384xf32>
    %27 = tpu.matmul %24, %26, %cst_14 {dimension_numbers = #tpu.dot_dimension_numbers<[1], [0], [0], [1], [0, 0, 1, 1], [], []>} : vector<16x128xbf16>, vector<128x384xbf16>, vector<16x384xf32> -> vector<16x384xf32>
    %c0_15 = arith.constant 0 : index
    %c0_16 = arith.constant 0 : index
    %c0_17 = arith.constant 0 : index
    %28 = vector.load %arg6[%c0_15, %c0_16, %c0_17] : memref<2x1x384xf32, #tpu.memory_space<vmem>>, vector<1x1x384xf32>
    %29 = vector.shape_cast %28 : vector<1x1x384xf32> to vector<1x384xf32>
    %30 = vector.broadcast %29 : vector<1x384xf32> to vector<16x384xf32>
    %31 = arith.addf %27, %30 : vector<16x384xf32>
    %32 = vector.extract_strided_slice %31 {offsets = [0, 0], sizes = [16, 32], strides = [1, 1]} : vector<16x384xf32> to vector<16x32xf32>
    %33 = vector.extract_strided_slice %31 {offsets = [0, 128], sizes = [16, 32], strides = [1, 1]} : vector<16x384xf32> to vector<16x32xf32>
    %34 = vector.extract_strided_slice %31 {offsets = [0, 256], sizes = [16, 32], strides = [1, 1]} : vector<16x384xf32> to vector<16x32xf32>
    %35 = tpu.transpose %33, [1, 0] : vector<16x32xf32> -> vector<32x16xf32>
    %cst_18 = arith.constant dense<0.000000e+00> : vector<16x16xf32>
    %36 = tpu.matmul %32, %35, %cst_18 {dimension_numbers = #tpu.dot_dimension_numbers<[1], [0], [0], [1], [0, 0, 1, 1], [], []>} : vector<16x32xf32>, vector<32x16xf32>, vector<16x16xf32> -> vector<16x16xf32>
    %cst_19 = arith.constant 0.176776692 : f32
    %37 = vector.broadcast %cst_19 : f32 to vector<16x16xf32>
    %38 = arith.mulf %36, %37 : vector<16x16xf32>
    %39 = arith.addf %38, %23 : vector<16x16xf32>
    %cst_20 = arith.constant dense<0xFF800000> : vector<16xf32>
    %40 = vector.multi_reduction <maximumf>, %39, %cst_20 [1] : vector<16x16xf32> to vector<16xf32>
    %41 = vector.shape_cast %40 : vector<16xf32> to vector<16x1xf32>
    %42 = vector.broadcast %41 : vector<16x1xf32> to vector<16x16xf32>
    %43 = arith.subf %39, %42 : vector<16x16xf32>
    %44 = math.exp %43 : vector<16x16xf32>
    %cst_21 = arith.constant dense<0.000000e+00> : vector<16xf32>
    %45 = vector.multi_reduction <add>, %44, %cst_21 [1] : vector<16x16xf32> to vector<16xf32>
    %46 = vector.shape_cast %45 : vector<16xf32> to vector<16x1xf32>
    %47 = tpu.reciprocal %46 {approx = true} : vector<16x1xf32> -> vector<16x1xf32>
    %48 = vector.broadcast %47 : vector<16x1xf32> to vector<16x16xf32>
    %49 = arith.mulf %44, %48 : vector<16x16xf32>
    %cst_22 = arith.constant dense<0.000000e+00> : vector<16x32xf32>
    %50 = tpu.matmul %49, %34, %cst_22 {dimension_numbers = #tpu.dot_dimension_numbers<[1], [0], [0], [1], [0, 0, 1, 1], [], []>} : vector<16x16xf32>, vector<16x32xf32>, vector<16x32xf32> -> vector<16x32xf32>
    %51 = vector.extract_strided_slice %31 {offsets = [0, 32], sizes = [16, 32], strides = [1, 1]} : vector<16x384xf32> to vector<16x32xf32>
    %52 = vector.extract_strided_slice %31 {offsets = [0, 160], sizes = [16, 32], strides = [1, 1]} : vector<16x384xf32> to vector<16x32xf32>
    %53 = vector.extract_strided_slice %31 {offsets = [0, 288], sizes = [16, 32], strides = [1, 1]} : vector<16x384xf32> to vector<16x32xf32>
    %54 = tpu.transpose %52, [1, 0] : vector<16x32xf32> -> vector<32x16xf32>
    %cst_23 = arith.constant dense<0.000000e+00> : vector<16x16xf32>
    %55 = tpu.matmul %51, %54, %cst_23 {dimension_numbers = #tpu.dot_dimension_numbers<[1], [0], [0], [1], [0, 0, 1, 1], [], []>} : vector<16x32xf32>, vector<32x16xf32>, vector<16x16xf32> -> vector<16x16xf32>
    %cst_24 = arith.constant 0.176776692 : f32
    %56 = vector.broadcast %cst_24 : f32 to vector<16x16xf32>
    %57 = arith.mulf %55, %56 : vector<16x16xf32>
    %58 = arith.addf %57, %23 : vector<16x16xf32>
    %cst_25 = arith.constant dense<0xFF800000> : vector<16xf32>
    %59 = vector.multi_reduction <maximumf>, %58, %cst_25 [1] : vector<16x16xf32> to vector<16xf32>
    %60 = vector.shape_cast %59 : vector<16xf32> to vector<16x1xf32>
    %61 = vector.broadcast %60 : vector<16x1xf32> to vector<16x16xf32>
    %62 = arith.subf %58, %61 : vector<16x16xf32>
    %63 = math.exp %62 : vector<16x16xf32>
    %cst_26 = arith.constant dense<0.000000e+00> : vector<16xf32>
    %64 = vector.multi_reduction <add>, %63, %cst_26 [1] : vector<16x16xf32> to vector<16xf32>
    %65 = vector.shape_cast %64 : vector<16xf32> to vector<16x1xf32>
    %66 = tpu.reciprocal %65 {approx = true} : vector<16x1xf32> -> vector<16x1xf32>
    %67 = vector.broadcast %66 : vector<16x1xf32> to vector<16x16xf32>
    %68 = arith.mulf %63, %67 : vector<16x16xf32>
    %cst_27 = arith.constant dense<0.000000e+00> : vector<16x32xf32>
    %69 = tpu.matmul %68, %53, %cst_27 {dimension_numbers = #tpu.dot_dimension_numbers<[1], [0], [0], [1], [0, 0, 1, 1], [], []>} : vector<16x16xf32>, vector<16x32xf32>, vector<16x32xf32> -> vector<16x32xf32>
    %70 = vector.extract_strided_slice %31 {offsets = [0, 64], sizes = [16, 32], strides = [1, 1]} : vector<16x384xf32> to vector<16x32xf32>
    %71 = vector.extract_strided_slice %31 {offsets = [0, 192], sizes = [16, 32], strides = [1, 1]} : vector<16x384xf32> to vector<16x32xf32>
    %72 = vector.extract_strided_slice %31 {offsets = [0, 320], sizes = [16, 32], strides = [1, 1]} : vector<16x384xf32> to vector<16x32xf32>
    %73 = tpu.transpose %71, [1, 0] : vector<16x32xf32> -> vector<32x16xf32>
    %cst_28 = arith.constant dense<0.000000e+00> : vector<16x16xf32>
    %74 = tpu.matmul %70, %73, %cst_28 {dimension_numbers = #tpu.dot_dimension_numbers<[1], [0], [0], [1], [0, 0, 1, 1], [], []>} : vector<16x32xf32>, vector<32x16xf32>, vector<16x16xf32> -> vector<16x16xf32>
    %cst_29 = arith.constant 0.176776692 : f32
    %75 = vector.broadcast %cst_29 : f32 to vector<16x16xf32>
    %76 = arith.mulf %74, %75 : vector<16x16xf32>
    %77 = arith.addf %76, %23 : vector<16x16xf32>
    %cst_30 = arith.constant dense<0xFF800000> : vector<16xf32>
    %78 = vector.multi_reduction <maximumf>, %77, %cst_30 [1] : vector<16x16xf32> to vector<16xf32>
    %79 = vector.shape_cast %78 : vector<16xf32> to vector<16x1xf32>
    %80 = vector.broadcast %79 : vector<16x1xf32> to vector<16x16xf32>
    %81 = arith.subf %77, %80 : vector<16x16xf32>
    %82 = math.exp %81 : vector<16x16xf32>
    %cst_31 = arith.constant dense<0.000000e+00> : vector<16xf32>
    %83 = vector.multi_reduction <add>, %82, %cst_31 [1] : vector<16x16xf32> to vector<16xf32>
    %84 = vector.shape_cast %83 : vector<16xf32> to vector<16x1xf32>
    %85 = tpu.reciprocal %84 {approx = true} : vector<16x1xf32> -> vector<16x1xf32>
    %86 = vector.broadcast %85 : vector<16x1xf32> to vector<16x16xf32>
    %87 = arith.mulf %82, %86 : vector<16x16xf32>
    %cst_32 = arith.constant dense<0.000000e+00> : vector<16x32xf32>
    %88 = tpu.matmul %87, %72, %cst_32 {dimension_numbers = #tpu.dot_dimension_numbers<[1], [0], [0], [1], [0, 0, 1, 1], [], []>} : vector<16x16xf32>, vector<16x32xf32>, vector<16x32xf32> -> vector<16x32xf32>
    %89 = vector.extract_strided_slice %31 {offsets = [0, 96], sizes = [16, 32], strides = [1, 1]} : vector<16x384xf32> to vector<16x32xf32>
    %90 = vector.extract_strided_slice %31 {offsets = [0, 224], sizes = [16, 32], strides = [1, 1]} : vector<16x384xf32> to vector<16x32xf32>
    %91 = vector.extract_strided_slice %31 {offsets = [0, 352], sizes = [16, 32], strides = [1, 1]} : vector<16x384xf32> to vector<16x32xf32>
    %92 = tpu.transpose %90, [1, 0] : vector<16x32xf32> -> vector<32x16xf32>
    %cst_33 = arith.constant dense<0.000000e+00> : vector<16x16xf32>
    %93 = tpu.matmul %89, %92, %cst_33 {dimension_numbers = #tpu.dot_dimension_numbers<[1], [0], [0], [1], [0, 0, 1, 1], [], []>} : vector<16x32xf32>, vector<32x16xf32>, vector<16x16xf32> -> vector<16x16xf32>
    %cst_34 = arith.constant 0.176776692 : f32
    %94 = vector.broadcast %cst_34 : f32 to vector<16x16xf32>
    %95 = arith.mulf %93, %94 : vector<16x16xf32>
    %96 = arith.addf %95, %23 : vector<16x16xf32>
    %cst_35 = arith.constant dense<0xFF800000> : vector<16xf32>
    %97 = vector.multi_reduction <maximumf>, %96, %cst_35 [1] : vector<16x16xf32> to vector<16xf32>
    %98 = vector.shape_cast %97 : vector<16xf32> to vector<16x1xf32>
    %99 = vector.broadcast %98 : vector<16x1xf32> to vector<16x16xf32>
    %100 = arith.subf %96, %99 : vector<16x16xf32>
    %101 = math.exp %100 : vector<16x16xf32>
    %cst_36 = arith.constant dense<0.000000e+00> : vector<16xf32>
    %102 = vector.multi_reduction <add>, %101, %cst_36 [1] : vector<16x16xf32> to vector<16xf32>
    %103 = vector.shape_cast %102 : vector<16xf32> to vector<16x1xf32>
    %104 = tpu.reciprocal %103 {approx = true} : vector<16x1xf32> -> vector<16x1xf32>
    %105 = vector.broadcast %104 : vector<16x1xf32> to vector<16x16xf32>
    %106 = arith.mulf %101, %105 : vector<16x16xf32>
    %cst_37 = arith.constant dense<0.000000e+00> : vector<16x32xf32>
    %107 = tpu.matmul %106, %91, %cst_37 {dimension_numbers = #tpu.dot_dimension_numbers<[1], [0], [0], [1], [0, 0, 1, 1], [], []>} : vector<16x16xf32>, vector<16x32xf32>, vector<16x32xf32> -> vector<16x32xf32>
    %108 = tpu.concatenate %50, %69, %88, %107 in 1 : vector<16x32xf32>, vector<16x32xf32>, vector<16x32xf32>, vector<16x32xf32> -> vector<16x128xf32>
    %109 = arith.truncf %108 : vector<16x128xf32> to vector<16x128xbf16>
    %c0_38 = arith.constant 0 : index
    %c0_39 = arith.constant 0 : index
    %c0_40 = arith.constant 0 : index
    %110 = vector.load %arg7[%c0_38, %c0_39, %c0_40] : memref<2x128x128xbf16, #tpu.memory_space<vmem>>, vector<1x128x128xbf16>
    %111 = vector.shape_cast %110 : vector<1x128x128xbf16> to vector<128x128xbf16>
    %cst_41 = arith.constant dense<0.000000e+00> : vector<16x128xf32>
    %112 = tpu.matmul %109, %111, %cst_41 {dimension_numbers = #tpu.dot_dimension_numbers<[1], [0], [0], [1], [0, 0, 1, 1], [], []>} : vector<16x128xbf16>, vector<128x128xbf16>, vector<16x128xf32> -> vector<16x128xf32>
    %c0_42 = arith.constant 0 : index
    %c0_43 = arith.constant 0 : index
    %c0_44 = arith.constant 0 : index
    %113 = vector.load %arg8[%c0_42, %c0_43, %c0_44] : memref<2x1x128xf32, #tpu.memory_space<vmem>>, vector<1x1x128xf32>
    %114 = vector.shape_cast %113 : vector<1x1x128xf32> to vector<1x128xf32>
    %115 = vector.broadcast %114 : vector<1x128xf32> to vector<16x128xf32>
    %116 = arith.addf %112, %115 : vector<16x128xf32>
    %117 = arith.addf %116, %22 : vector<16x128xf32>
    %c0_45 = arith.constant 0 : index
    %c0_46 = arith.constant 0 : index
    %c0_47 = arith.constant 0 : index
    %118 = vector.load %arg9[%c0_45, %c0_46, %c0_47] : memref<2x1x128xf32, #tpu.memory_space<vmem>>, vector<1x1x128xf32>
    %119 = vector.shape_cast %118 : vector<1x1x128xf32> to vector<1x128xf32>
    %c0_48 = arith.constant 0 : index
    %c0_49 = arith.constant 0 : index
    %c0_50 = arith.constant 0 : index
    %120 = vector.load %arg10[%c0_48, %c0_49, %c0_50] : memref<2x1x128xf32, #tpu.memory_space<vmem>>, vector<1x1x128xf32>
    %121 = vector.shape_cast %120 : vector<1x1x128xf32> to vector<1x128xf32>
    %cst_51 = arith.constant dense<0.000000e+00> : vector<16xf32>
    %122 = vector.multi_reduction <add>, %117, %cst_51 [1] : vector<16x128xf32> to vector<16xf32>
    %123 = vector.shape_cast %122 : vector<16xf32> to vector<16x1xf32>
    %cst_52 = arith.constant 1.280000e+02 : f32
    %124 = vector.broadcast %cst_52 : f32 to vector<16x1xf32>
    %125 = arith.divf %123, %124 : vector<16x1xf32>
    %126 = vector.broadcast %125 : vector<16x1xf32> to vector<16x128xf32>
    %127 = arith.subf %117, %126 : vector<16x128xf32>
    %128 = arith.mulf %127, %127 : vector<16x128xf32>
    %cst_53 = arith.constant dense<0.000000e+00> : vector<16xf32>
    %129 = vector.multi_reduction <add>, %128, %cst_53 [1] : vector<16x128xf32> to vector<16xf32>
    %130 = vector.shape_cast %129 : vector<16xf32> to vector<16x1xf32>
    %cst_54 = arith.constant 1.280000e+02 : f32
    %131 = vector.broadcast %cst_54 : f32 to vector<16x1xf32>
    %132 = arith.divf %130, %131 : vector<16x1xf32>
    %cst_55 = arith.constant 9.99999996E-13 : f32
    %133 = vector.broadcast %cst_55 : f32 to vector<16x1xf32>
    %134 = arith.addf %132, %133 : vector<16x1xf32>
    %135 = math.rsqrt %134 : vector<16x1xf32>
    %136 = vector.broadcast %135 : vector<16x1xf32> to vector<16x128xf32>
    %137 = arith.mulf %127, %136 : vector<16x128xf32>
    %138 = vector.broadcast %119 : vector<1x128xf32> to vector<16x128xf32>
    %139 = arith.mulf %137, %138 : vector<16x128xf32>
    %140 = vector.broadcast %121 : vector<1x128xf32> to vector<16x128xf32>
    %141 = arith.addf %139, %140 : vector<16x128xf32>
    %142 = arith.truncf %141 : vector<16x128xf32> to vector<16x128xbf16>
    %c0_56 = arith.constant 0 : index
    %c0_57 = arith.constant 0 : index
    %c0_58 = arith.constant 0 : index
    %143 = vector.load %arg11[%c0_56, %c0_57, %c0_58] : memref<2x128x512xbf16, #tpu.memory_space<vmem>>, vector<1x128x512xbf16>
    %144 = vector.shape_cast %143 : vector<1x128x512xbf16> to vector<128x512xbf16>
    %cst_59 = arith.constant dense<0.000000e+00> : vector<16x512xf32>
    %145 = tpu.matmul %142, %144, %cst_59 {dimension_numbers = #tpu.dot_dimension_numbers<[1], [0], [0], [1], [0, 0, 1, 1], [], []>} : vector<16x128xbf16>, vector<128x512xbf16>, vector<16x512xf32> -> vector<16x512xf32>
    %c0_60 = arith.constant 0 : index
    %c0_61 = arith.constant 0 : index
    %c0_62 = arith.constant 0 : index
    %146 = vector.load %arg12[%c0_60, %c0_61, %c0_62] : memref<2x1x512xf32, #tpu.memory_space<vmem>>, vector<1x1x512xf32>
    %147 = vector.shape_cast %146 : vector<1x1x512xf32> to vector<1x512xf32>
    %148 = vector.broadcast %147 : vector<1x512xf32> to vector<16x512xf32>
    %149 = arith.addf %145, %148 : vector<16x512xf32>
    %150 = arith.mulf %149, %149 : vector<16x512xf32>
    %151 = arith.mulf %149, %150 : vector<16x512xf32>
    %cst_63 = arith.constant 4.471500e-02 : f32
    %152 = vector.broadcast %cst_63 : f32 to vector<16x512xf32>
    %153 = arith.mulf %152, %151 : vector<16x512xf32>
    %154 = arith.addf %149, %153 : vector<16x512xf32>
    %cst_64 = arith.constant 0.797884583 : f32
    %155 = vector.broadcast %cst_64 : f32 to vector<16x512xf32>
    %156 = arith.mulf %155, %154 : vector<16x512xf32>
    %157 = math.tanh %156 : vector<16x512xf32>
    %cst_65 = arith.constant 1.000000e+00 : f32
    %158 = vector.broadcast %cst_65 : f32 to vector<16x512xf32>
    %159 = arith.addf %158, %157 : vector<16x512xf32>
    %cst_66 = arith.constant 5.000000e-01 : f32
    %160 = vector.broadcast %cst_66 : f32 to vector<16x512xf32>
    %161 = arith.mulf %160, %159 : vector<16x512xf32>
    %162 = arith.mulf %149, %161 : vector<16x512xf32>
    %163 = arith.truncf %162 : vector<16x512xf32> to vector<16x512xbf16>
    %c0_67 = arith.constant 0 : index
    %c0_68 = arith.constant 0 : index
    %c0_69 = arith.constant 0 : index
    %164 = vector.load %arg13[%c0_67, %c0_68, %c0_69] : memref<2x512x128xbf16, #tpu.memory_space<vmem>>, vector<1x512x128xbf16>
    %165 = vector.shape_cast %164 : vector<1x512x128xbf16> to vector<512x128xbf16>
    %cst_70 = arith.constant dense<0.000000e+00> : vector<16x128xf32>
    %166 = tpu.matmul %163, %165, %cst_70 {dimension_numbers = #tpu.dot_dimension_numbers<[1], [0], [0], [1], [0, 0, 1, 1], [], []>} : vector<16x512xbf16>, vector<512x128xbf16>, vector<16x128xf32> -> vector<16x128xf32>
    %c0_71 = arith.constant 0 : index
    %c0_72 = arith.constant 0 : index
    %c0_73 = arith.constant 0 : index
    %167 = vector.load %arg14[%c0_71, %c0_72, %c0_73] : memref<2x1x128xf32, #tpu.memory_space<vmem>>, vector<1x1x128xf32>
    %168 = vector.shape_cast %167 : vector<1x1x128xf32> to vector<1x128xf32>
    %169 = vector.broadcast %168 : vector<1x128xf32> to vector<16x128xf32>
    %170 = arith.addf %166, %169 : vector<16x128xf32>
    %171 = arith.addf %170, %141 : vector<16x128xf32>
    %c0_74 = arith.constant 0 : index
    %c0_75 = arith.constant 0 : index
    %c0_76 = arith.constant 0 : index
    %172 = vector.load %arg15[%c0_74, %c0_75, %c0_76] : memref<2x1x128xf32, #tpu.memory_space<vmem>>, vector<1x1x128xf32>
    %173 = vector.shape_cast %172 : vector<1x1x128xf32> to vector<1x128xf32>
    %c0_77 = arith.constant 0 : index
    %c0_78 = arith.constant 0 : index
    %c0_79 = arith.constant 0 : index
    %174 = vector.load %arg16[%c0_77, %c0_78, %c0_79] : memref<2x1x128xf32, #tpu.memory_space<vmem>>, vector<1x1x128xf32>
    %175 = vector.shape_cast %174 : vector<1x1x128xf32> to vector<1x128xf32>
    %cst_80 = arith.constant dense<0.000000e+00> : vector<16xf32>
    %176 = vector.multi_reduction <add>, %171, %cst_80 [1] : vector<16x128xf32> to vector<16xf32>
    %177 = vector.shape_cast %176 : vector<16xf32> to vector<16x1xf32>
    %cst_81 = arith.constant 1.280000e+02 : f32
    %178 = vector.broadcast %cst_81 : f32 to vector<16x1xf32>
    %179 = arith.divf %177, %178 : vector<16x1xf32>
    %180 = vector.broadcast %179 : vector<16x1xf32> to vector<16x128xf32>
    %181 = arith.subf %171, %180 : vector<16x128xf32>
    %182 = arith.mulf %181, %181 : vector<16x128xf32>
    %cst_82 = arith.constant dense<0.000000e+00> : vector<16xf32>
    %183 = vector.multi_reduction <add>, %182, %cst_82 [1] : vector<16x128xf32> to vector<16xf32>
    %184 = vector.shape_cast %183 : vector<16xf32> to vector<16x1xf32>
    %cst_83 = arith.constant 1.280000e+02 : f32
    %185 = vector.broadcast %cst_83 : f32 to vector<16x1xf32>
    %186 = arith.divf %184, %185 : vector<16x1xf32>
    %cst_84 = arith.constant 9.99999996E-13 : f32
    %187 = vector.broadcast %cst_84 : f32 to vector<16x1xf32>
    %188 = arith.addf %186, %187 : vector<16x1xf32>
    %189 = math.rsqrt %188 : vector<16x1xf32>
    %190 = vector.broadcast %189 : vector<16x1xf32> to vector<16x128xf32>
    %191 = arith.mulf %181, %190 : vector<16x128xf32>
    %192 = vector.broadcast %173 : vector<1x128xf32> to vector<16x128xf32>
    %193 = arith.mulf %191, %192 : vector<16x128xf32>
    %194 = vector.broadcast %175 : vector<1x128xf32> to vector<16x128xf32>
    %195 = arith.addf %193, %194 : vector<16x128xf32>
    %196 = arith.truncf %195 : vector<16x128xf32> to vector<16x128xbf16>
    %c1 = arith.constant 1 : index
    %c0_85 = arith.constant 0 : index
    %c0_86 = arith.constant 0 : index
    %197 = vector.load %arg5[%c1, %c0_85, %c0_86] : memref<2x128x384xbf16, #tpu.memory_space<vmem>>, vector<1x128x384xbf16>
    %198 = vector.shape_cast %197 : vector<1x128x384xbf16> to vector<128x384xbf16>
    %cst_87 = arith.constant dense<0.000000e+00> : vector<16x384xf32>
    %199 = tpu.matmul %196, %198, %cst_87 {dimension_numbers = #tpu.dot_dimension_numbers<[1], [0], [0], [1], [0, 0, 1, 1], [], []>} : vector<16x128xbf16>, vector<128x384xbf16>, vector<16x384xf32> -> vector<16x384xf32>
    %c1_88 = arith.constant 1 : index
    %c0_89 = arith.constant 0 : index
    %c0_90 = arith.constant 0 : index
    %200 = vector.load %arg6[%c1_88, %c0_89, %c0_90] : memref<2x1x384xf32, #tpu.memory_space<vmem>>, vector<1x1x384xf32>
    %201 = vector.shape_cast %200 : vector<1x1x384xf32> to vector<1x384xf32>
    %202 = vector.broadcast %201 : vector<1x384xf32> to vector<16x384xf32>
    %203 = arith.addf %199, %202 : vector<16x384xf32>
    %204 = vector.extract_strided_slice %203 {offsets = [0, 0], sizes = [16, 32], strides = [1, 1]} : vector<16x384xf32> to vector<16x32xf32>
    %205 = vector.extract_strided_slice %203 {offsets = [0, 128], sizes = [16, 32], strides = [1, 1]} : vector<16x384xf32> to vector<16x32xf32>
    %206 = vector.extract_strided_slice %203 {offsets = [0, 256], sizes = [16, 32], strides = [1, 1]} : vector<16x384xf32> to vector<16x32xf32>
    %207 = tpu.transpose %205, [1, 0] : vector<16x32xf32> -> vector<32x16xf32>
    %cst_91 = arith.constant dense<0.000000e+00> : vector<16x16xf32>
    %208 = tpu.matmul %204, %207, %cst_91 {dimension_numbers = #tpu.dot_dimension_numbers<[1], [0], [0], [1], [0, 0, 1, 1], [], []>} : vector<16x32xf32>, vector<32x16xf32>, vector<16x16xf32> -> vector<16x16xf32>
    %cst_92 = arith.constant 0.176776692 : f32
    %209 = vector.broadcast %cst_92 : f32 to vector<16x16xf32>
    %210 = arith.mulf %208, %209 : vector<16x16xf32>
    %211 = arith.addf %210, %23 : vector<16x16xf32>
    %cst_93 = arith.constant dense<0xFF800000> : vector<16xf32>
    %212 = vector.multi_reduction <maximumf>, %211, %cst_93 [1] : vector<16x16xf32> to vector<16xf32>
    %213 = vector.shape_cast %212 : vector<16xf32> to vector<16x1xf32>
    %214 = vector.broadcast %213 : vector<16x1xf32> to vector<16x16xf32>
    %215 = arith.subf %211, %214 : vector<16x16xf32>
    %216 = math.exp %215 : vector<16x16xf32>
    %cst_94 = arith.constant dense<0.000000e+00> : vector<16xf32>
    %217 = vector.multi_reduction <add>, %216, %cst_94 [1] : vector<16x16xf32> to vector<16xf32>
    %218 = vector.shape_cast %217 : vector<16xf32> to vector<16x1xf32>
    %219 = tpu.reciprocal %218 {approx = true} : vector<16x1xf32> -> vector<16x1xf32>
    %220 = vector.broadcast %219 : vector<16x1xf32> to vector<16x16xf32>
    %221 = arith.mulf %216, %220 : vector<16x16xf32>
    %cst_95 = arith.constant dense<0.000000e+00> : vector<16x32xf32>
    %222 = tpu.matmul %221, %206, %cst_95 {dimension_numbers = #tpu.dot_dimension_numbers<[1], [0], [0], [1], [0, 0, 1, 1], [], []>} : vector<16x16xf32>, vector<16x32xf32>, vector<16x32xf32> -> vector<16x32xf32>
    %223 = vector.extract_strided_slice %203 {offsets = [0, 32], sizes = [16, 32], strides = [1, 1]} : vector<16x384xf32> to vector<16x32xf32>
    %224 = vector.extract_strided_slice %203 {offsets = [0, 160], sizes = [16, 32], strides = [1, 1]} : vector<16x384xf32> to vector<16x32xf32>
    %225 = vector.extract_strided_slice %203 {offsets = [0, 288], sizes = [16, 32], strides = [1, 1]} : vector<16x384xf32> to vector<16x32xf32>
    %226 = tpu.transpose %224, [1, 0] : vector<16x32xf32> -> vector<32x16xf32>
    %cst_96 = arith.constant dense<0.000000e+00> : vector<16x16xf32>
    %227 = tpu.matmul %223, %226, %cst_96 {dimension_numbers = #tpu.dot_dimension_numbers<[1], [0], [0], [1], [0, 0, 1, 1], [], []>} : vector<16x32xf32>, vector<32x16xf32>, vector<16x16xf32> -> vector<16x16xf32>
    %cst_97 = arith.constant 0.176776692 : f32
    %228 = vector.broadcast %cst_97 : f32 to vector<16x16xf32>
    %229 = arith.mulf %227, %228 : vector<16x16xf32>
    %230 = arith.addf %229, %23 : vector<16x16xf32>
    %cst_98 = arith.constant dense<0xFF800000> : vector<16xf32>
    %231 = vector.multi_reduction <maximumf>, %230, %cst_98 [1] : vector<16x16xf32> to vector<16xf32>
    %232 = vector.shape_cast %231 : vector<16xf32> to vector<16x1xf32>
    %233 = vector.broadcast %232 : vector<16x1xf32> to vector<16x16xf32>
    %234 = arith.subf %230, %233 : vector<16x16xf32>
    %235 = math.exp %234 : vector<16x16xf32>
    %cst_99 = arith.constant dense<0.000000e+00> : vector<16xf32>
    %236 = vector.multi_reduction <add>, %235, %cst_99 [1] : vector<16x16xf32> to vector<16xf32>
    %237 = vector.shape_cast %236 : vector<16xf32> to vector<16x1xf32>
    %238 = tpu.reciprocal %237 {approx = true} : vector<16x1xf32> -> vector<16x1xf32>
    %239 = vector.broadcast %238 : vector<16x1xf32> to vector<16x16xf32>
    %240 = arith.mulf %235, %239 : vector<16x16xf32>
    %cst_100 = arith.constant dense<0.000000e+00> : vector<16x32xf32>
    %241 = tpu.matmul %240, %225, %cst_100 {dimension_numbers = #tpu.dot_dimension_numbers<[1], [0], [0], [1], [0, 0, 1, 1], [], []>} : vector<16x16xf32>, vector<16x32xf32>, vector<16x32xf32> -> vector<16x32xf32>
    %242 = vector.extract_strided_slice %203 {offsets = [0, 64], sizes = [16, 32], strides = [1, 1]} : vector<16x384xf32> to vector<16x32xf32>
    %243 = vector.extract_strided_slice %203 {offsets = [0, 192], sizes = [16, 32], strides = [1, 1]} : vector<16x384xf32> to vector<16x32xf32>
    %244 = vector.extract_strided_slice %203 {offsets = [0, 320], sizes = [16, 32], strides = [1, 1]} : vector<16x384xf32> to vector<16x32xf32>
    %245 = tpu.transpose %243, [1, 0] : vector<16x32xf32> -> vector<32x16xf32>
    %cst_101 = arith.constant dense<0.000000e+00> : vector<16x16xf32>
    %246 = tpu.matmul %242, %245, %cst_101 {dimension_numbers = #tpu.dot_dimension_numbers<[1], [0], [0], [1], [0, 0, 1, 1], [], []>} : vector<16x32xf32>, vector<32x16xf32>, vector<16x16xf32> -> vector<16x16xf32>
    %cst_102 = arith.constant 0.176776692 : f32
    %247 = vector.broadcast %cst_102 : f32 to vector<16x16xf32>
    %248 = arith.mulf %246, %247 : vector<16x16xf32>
    %249 = arith.addf %248, %23 : vector<16x16xf32>
    %cst_103 = arith.constant dense<0xFF800000> : vector<16xf32>
    %250 = vector.multi_reduction <maximumf>, %249, %cst_103 [1] : vector<16x16xf32> to vector<16xf32>
    %251 = vector.shape_cast %250 : vector<16xf32> to vector<16x1xf32>
    %252 = vector.broadcast %251 : vector<16x1xf32> to vector<16x16xf32>
    %253 = arith.subf %249, %252 : vector<16x16xf32>
    %254 = math.exp %253 : vector<16x16xf32>
    %cst_104 = arith.constant dense<0.000000e+00> : vector<16xf32>
    %255 = vector.multi_reduction <add>, %254, %cst_104 [1] : vector<16x16xf32> to vector<16xf32>
    %256 = vector.shape_cast %255 : vector<16xf32> to vector<16x1xf32>
    %257 = tpu.reciprocal %256 {approx = true} : vector<16x1xf32> -> vector<16x1xf32>
    %258 = vector.broadcast %257 : vector<16x1xf32> to vector<16x16xf32>
    %259 = arith.mulf %254, %258 : vector<16x16xf32>
    %cst_105 = arith.constant dense<0.000000e+00> : vector<16x32xf32>
    %260 = tpu.matmul %259, %244, %cst_105 {dimension_numbers = #tpu.dot_dimension_numbers<[1], [0], [0], [1], [0, 0, 1, 1], [], []>} : vector<16x16xf32>, vector<16x32xf32>, vector<16x32xf32> -> vector<16x32xf32>
    %261 = vector.extract_strided_slice %203 {offsets = [0, 96], sizes = [16, 32], strides = [1, 1]} : vector<16x384xf32> to vector<16x32xf32>
    %262 = vector.extract_strided_slice %203 {offsets = [0, 224], sizes = [16, 32], strides = [1, 1]} : vector<16x384xf32> to vector<16x32xf32>
    %263 = vector.extract_strided_slice %203 {offsets = [0, 352], sizes = [16, 32], strides = [1, 1]} : vector<16x384xf32> to vector<16x32xf32>
    %264 = tpu.transpose %262, [1, 0] : vector<16x32xf32> -> vector<32x16xf32>
    %cst_106 = arith.constant dense<0.000000e+00> : vector<16x16xf32>
    %265 = tpu.matmul %261, %264, %cst_106 {dimension_numbers = #tpu.dot_dimension_numbers<[1], [0], [0], [1], [0, 0, 1, 1], [], []>} : vector<16x32xf32>, vector<32x16xf32>, vector<16x16xf32> -> vector<16x16xf32>
    %cst_107 = arith.constant 0.176776692 : f32
    %266 = vector.broadcast %cst_107 : f32 to vector<16x16xf32>
    %267 = arith.mulf %265, %266 : vector<16x16xf32>
    %268 = arith.addf %267, %23 : vector<16x16xf32>
    %cst_108 = arith.constant dense<0xFF800000> : vector<16xf32>
    %269 = vector.multi_reduction <maximumf>, %268, %cst_108 [1] : vector<16x16xf32> to vector<16xf32>
    %270 = vector.shape_cast %269 : vector<16xf32> to vector<16x1xf32>
    %271 = vector.broadcast %270 : vector<16x1xf32> to vector<16x16xf32>
    %272 = arith.subf %268, %271 : vector<16x16xf32>
    %273 = math.exp %272 : vector<16x16xf32>
    %cst_109 = arith.constant dense<0.000000e+00> : vector<16xf32>
    %274 = vector.multi_reduction <add>, %273, %cst_109 [1] : vector<16x16xf32> to vector<16xf32>
    %275 = vector.shape_cast %274 : vector<16xf32> to vector<16x1xf32>
    %276 = tpu.reciprocal %275 {approx = true} : vector<16x1xf32> -> vector<16x1xf32>
    %277 = vector.broadcast %276 : vector<16x1xf32> to vector<16x16xf32>
    %278 = arith.mulf %273, %277 : vector<16x16xf32>
    %cst_110 = arith.constant dense<0.000000e+00> : vector<16x32xf32>
    %279 = tpu.matmul %278, %263, %cst_110 {dimension_numbers = #tpu.dot_dimension_numbers<[1], [0], [0], [1], [0, 0, 1, 1], [], []>} : vector<16x16xf32>, vector<16x32xf32>, vector<16x32xf32> -> vector<16x32xf32>
    %280 = tpu.concatenate %222, %241, %260, %279 in 1 : vector<16x32xf32>, vector<16x32xf32>, vector<16x32xf32>, vector<16x32xf32> -> vector<16x128xf32>
    %281 = arith.truncf %280 : vector<16x128xf32> to vector<16x128xbf16>
    %c1_111 = arith.constant 1 : index
    %c0_112 = arith.constant 0 : index
    %c0_113 = arith.constant 0 : index
    %282 = vector.load %arg7[%c1_111, %c0_112, %c0_113] : memref<2x128x128xbf16, #tpu.memory_space<vmem>>, vector<1x128x128xbf16>
    %283 = vector.shape_cast %282 : vector<1x128x128xbf16> to vector<128x128xbf16>
    %cst_114 = arith.constant dense<0.000000e+00> : vector<16x128xf32>
    %284 = tpu.matmul %281, %283, %cst_114 {dimension_numbers = #tpu.dot_dimension_numbers<[1], [0], [0], [1], [0, 0, 1, 1], [], []>} : vector<16x128xbf16>, vector<128x128xbf16>, vector<16x128xf32> -> vector<16x128xf32>
    %c1_115 = arith.constant 1 : index
    %c0_116 = arith.constant 0 : index
    %c0_117 = arith.constant 0 : index
    %285 = vector.load %arg8[%c1_115, %c0_116, %c0_117] : memref<2x1x128xf32, #tpu.memory_space<vmem>>, vector<1x1x128xf32>
    %286 = vector.shape_cast %285 : vector<1x1x128xf32> to vector<1x128xf32>
    %287 = vector.broadcast %286 : vector<1x128xf32> to vector<16x128xf32>
    %288 = arith.addf %284, %287 : vector<16x128xf32>
    %289 = arith.addf %288, %195 : vector<16x128xf32>
    %c1_118 = arith.constant 1 : index
    %c0_119 = arith.constant 0 : index
    %c0_120 = arith.constant 0 : index
    %290 = vector.load %arg9[%c1_118, %c0_119, %c0_120] : memref<2x1x128xf32, #tpu.memory_space<vmem>>, vector<1x1x128xf32>
    %291 = vector.shape_cast %290 : vector<1x1x128xf32> to vector<1x128xf32>
    %c1_121 = arith.constant 1 : index
    %c0_122 = arith.constant 0 : index
    %c0_123 = arith.constant 0 : index
    %292 = vector.load %arg10[%c1_121, %c0_122, %c0_123] : memref<2x1x128xf32, #tpu.memory_space<vmem>>, vector<1x1x128xf32>
    %293 = vector.shape_cast %292 : vector<1x1x128xf32> to vector<1x128xf32>
    %cst_124 = arith.constant dense<0.000000e+00> : vector<16xf32>
    %294 = vector.multi_reduction <add>, %289, %cst_124 [1] : vector<16x128xf32> to vector<16xf32>
    %295 = vector.shape_cast %294 : vector<16xf32> to vector<16x1xf32>
    %cst_125 = arith.constant 1.280000e+02 : f32
    %296 = vector.broadcast %cst_125 : f32 to vector<16x1xf32>
    %297 = arith.divf %295, %296 : vector<16x1xf32>
    %298 = vector.broadcast %297 : vector<16x1xf32> to vector<16x128xf32>
    %299 = arith.subf %289, %298 : vector<16x128xf32>
    %300 = arith.mulf %299, %299 : vector<16x128xf32>
    %cst_126 = arith.constant dense<0.000000e+00> : vector<16xf32>
    %301 = vector.multi_reduction <add>, %300, %cst_126 [1] : vector<16x128xf32> to vector<16xf32>
    %302 = vector.shape_cast %301 : vector<16xf32> to vector<16x1xf32>
    %cst_127 = arith.constant 1.280000e+02 : f32
    %303 = vector.broadcast %cst_127 : f32 to vector<16x1xf32>
    %304 = arith.divf %302, %303 : vector<16x1xf32>
    %cst_128 = arith.constant 9.99999996E-13 : f32
    %305 = vector.broadcast %cst_128 : f32 to vector<16x1xf32>
    %306 = arith.addf %304, %305 : vector<16x1xf32>
    %307 = math.rsqrt %306 : vector<16x1xf32>
    %308 = vector.broadcast %307 : vector<16x1xf32> to vector<16x128xf32>
    %309 = arith.mulf %299, %308 : vector<16x128xf32>
    %310 = vector.broadcast %291 : vector<1x128xf32> to vector<16x128xf32>
    %311 = arith.mulf %309, %310 : vector<16x128xf32>
    %312 = vector.broadcast %293 : vector<1x128xf32> to vector<16x128xf32>
    %313 = arith.addf %311, %312 : vector<16x128xf32>
    %314 = arith.truncf %313 : vector<16x128xf32> to vector<16x128xbf16>
    %c1_129 = arith.constant 1 : index
    %c0_130 = arith.constant 0 : index
    %c0_131 = arith.constant 0 : index
    %315 = vector.load %arg11[%c1_129, %c0_130, %c0_131] : memref<2x128x512xbf16, #tpu.memory_space<vmem>>, vector<1x128x512xbf16>
    %316 = vector.shape_cast %315 : vector<1x128x512xbf16> to vector<128x512xbf16>
    %cst_132 = arith.constant dense<0.000000e+00> : vector<16x512xf32>
    %317 = tpu.matmul %314, %316, %cst_132 {dimension_numbers = #tpu.dot_dimension_numbers<[1], [0], [0], [1], [0, 0, 1, 1], [], []>} : vector<16x128xbf16>, vector<128x512xbf16>, vector<16x512xf32> -> vector<16x512xf32>
    %c1_133 = arith.constant 1 : index
    %c0_134 = arith.constant 0 : index
    %c0_135 = arith.constant 0 : index
    %318 = vector.load %arg12[%c1_133, %c0_134, %c0_135] : memref<2x1x512xf32, #tpu.memory_space<vmem>>, vector<1x1x512xf32>
    %319 = vector.shape_cast %318 : vector<1x1x512xf32> to vector<1x512xf32>
    %320 = vector.broadcast %319 : vector<1x512xf32> to vector<16x512xf32>
    %321 = arith.addf %317, %320 : vector<16x512xf32>
    %322 = arith.mulf %321, %321 : vector<16x512xf32>
    %323 = arith.mulf %321, %322 : vector<16x512xf32>
    %cst_136 = arith.constant 4.471500e-02 : f32
    %324 = vector.broadcast %cst_136 : f32 to vector<16x512xf32>
    %325 = arith.mulf %324, %323 : vector<16x512xf32>
    %326 = arith.addf %321, %325 : vector<16x512xf32>
    %cst_137 = arith.constant 0.797884583 : f32
    %327 = vector.broadcast %cst_137 : f32 to vector<16x512xf32>
    %328 = arith.mulf %327, %326 : vector<16x512xf32>
    %329 = math.tanh %328 : vector<16x512xf32>
    %cst_138 = arith.constant 1.000000e+00 : f32
    %330 = vector.broadcast %cst_138 : f32 to vector<16x512xf32>
    %331 = arith.addf %330, %329 : vector<16x512xf32>
    %cst_139 = arith.constant 5.000000e-01 : f32
    %332 = vector.broadcast %cst_139 : f32 to vector<16x512xf32>
    %333 = arith.mulf %332, %331 : vector<16x512xf32>
    %334 = arith.mulf %321, %333 : vector<16x512xf32>
    %335 = arith.truncf %334 : vector<16x512xf32> to vector<16x512xbf16>
    %c1_140 = arith.constant 1 : index
    %c0_141 = arith.constant 0 : index
    %c0_142 = arith.constant 0 : index
    %336 = vector.load %arg13[%c1_140, %c0_141, %c0_142] : memref<2x512x128xbf16, #tpu.memory_space<vmem>>, vector<1x512x128xbf16>
    %337 = vector.shape_cast %336 : vector<1x512x128xbf16> to vector<512x128xbf16>
    %cst_143 = arith.constant dense<0.000000e+00> : vector<16x128xf32>
    %338 = tpu.matmul %335, %337, %cst_143 {dimension_numbers = #tpu.dot_dimension_numbers<[1], [0], [0], [1], [0, 0, 1, 1], [], []>} : vector<16x512xbf16>, vector<512x128xbf16>, vector<16x128xf32> -> vector<16x128xf32>
    %c1_144 = arith.constant 1 : index
    %c0_145 = arith.constant 0 : index
    %c0_146 = arith.constant 0 : index
    %339 = vector.load %arg14[%c1_144, %c0_145, %c0_146] : memref<2x1x128xf32, #tpu.memory_space<vmem>>, vector<1x1x128xf32>
    %340 = vector.shape_cast %339 : vector<1x1x128xf32> to vector<1x128xf32>
    %341 = vector.broadcast %340 : vector<1x128xf32> to vector<16x128xf32>
    %342 = arith.addf %338, %341 : vector<16x128xf32>
    %343 = arith.addf %342, %313 : vector<16x128xf32>
    %c1_147 = arith.constant 1 : index
    %c0_148 = arith.constant 0 : index
    %c0_149 = arith.constant 0 : index
    %344 = vector.load %arg15[%c1_147, %c0_148, %c0_149] : memref<2x1x128xf32, #tpu.memory_space<vmem>>, vector<1x1x128xf32>
    %345 = vector.shape_cast %344 : vector<1x1x128xf32> to vector<1x128xf32>
    %c1_150 = arith.constant 1 : index
    %c0_151 = arith.constant 0 : index
    %c0_152 = arith.constant 0 : index
    %346 = vector.load %arg16[%c1_150, %c0_151, %c0_152] : memref<2x1x128xf32, #tpu.memory_space<vmem>>, vector<1x1x128xf32>
    %347 = vector.shape_cast %346 : vector<1x1x128xf32> to vector<1x128xf32>
    %cst_153 = arith.constant dense<0.000000e+00> : vector<16xf32>
    %348 = vector.multi_reduction <add>, %343, %cst_153 [1] : vector<16x128xf32> to vector<16xf32>
    %349 = vector.shape_cast %348 : vector<16xf32> to vector<16x1xf32>
    %cst_154 = arith.constant 1.280000e+02 : f32
    %350 = vector.broadcast %cst_154 : f32 to vector<16x1xf32>
    %351 = arith.divf %349, %350 : vector<16x1xf32>
    %352 = vector.broadcast %351 : vector<16x1xf32> to vector<16x128xf32>
    %353 = arith.subf %343, %352 : vector<16x128xf32>
    %354 = arith.mulf %353, %353 : vector<16x128xf32>
    %cst_155 = arith.constant dense<0.000000e+00> : vector<16xf32>
    %355 = vector.multi_reduction <add>, %354, %cst_155 [1] : vector<16x128xf32> to vector<16xf32>
    %356 = vector.shape_cast %355 : vector<16xf32> to vector<16x1xf32>
    %cst_156 = arith.constant 1.280000e+02 : f32
    %357 = vector.broadcast %cst_156 : f32 to vector<16x1xf32>
    %358 = arith.divf %356, %357 : vector<16x1xf32>
    %cst_157 = arith.constant 9.99999996E-13 : f32
    %359 = vector.broadcast %cst_157 : f32 to vector<16x1xf32>
    %360 = arith.addf %358, %359 : vector<16x1xf32>
    %361 = math.rsqrt %360 : vector<16x1xf32>
    %362 = vector.broadcast %361 : vector<16x1xf32> to vector<16x128xf32>
    %363 = arith.mulf %353, %362 : vector<16x128xf32>
    %364 = vector.broadcast %345 : vector<1x128xf32> to vector<16x128xf32>
    %365 = arith.mulf %363, %364 : vector<16x128xf32>
    %366 = vector.broadcast %347 : vector<1x128xf32> to vector<16x128xf32>
    %367 = arith.addf %365, %366 : vector<16x128xf32>
    %c0_158 = arith.constant 0 : index
    %c0_159 = arith.constant 0 : index
    %368 = vector.load %arg18[%c0_158, %c0_159] : memref<1x128xf32, #tpu.memory_space<vmem>>, vector<1x128xf32>
    %369 = tpu.iota {dimensions = array<i32: 0>} : vector<8x128xi32>
    %370 = vector.extract_strided_slice %367 {offsets = [0, 0], sizes = [8, 128], strides = [1, 1]} : vector<16x128xf32> to vector<8x128xf32>
    %371 = arith.truncf %370 : vector<8x128xf32> to vector<8x128xbf16>
    %c0_160 = arith.constant 0 : index
    %c0_161 = arith.constant 0 : index
    %c0_162 = arith.constant 0 : index
    %372 = vector.load %arg17[%c0_160, %c0_161, %c0_162] : memref<3x128x128xbf16, #tpu.memory_space<vmem>>, vector<1x128x128xbf16>
    %373 = vector.shape_cast %372 : vector<1x128x128xbf16> to vector<128x128xbf16>
    %cst_163 = arith.constant dense<0.000000e+00> : vector<8x128xf32>
    %374 = tpu.matmul %371, %373, %cst_163 {dimension_numbers = #tpu.dot_dimension_numbers<[1], [0], [0], [1], [0, 0, 1, 1], [], []>} : vector<8x128xbf16>, vector<128x128xbf16>, vector<8x128xf32> -> vector<8x128xf32>
    %c1_164 = arith.constant 1 : index
    %c0_165 = arith.constant 0 : index
    %c0_166 = arith.constant 0 : index
    %375 = vector.load %arg17[%c1_164, %c0_165, %c0_166] : memref<3x128x128xbf16, #tpu.memory_space<vmem>>, vector<1x128x128xbf16>
    %376 = vector.shape_cast %375 : vector<1x128x128xbf16> to vector<128x128xbf16>
    %cst_167 = arith.constant dense<0.000000e+00> : vector<8x128xf32>
    %377 = tpu.matmul %371, %376, %cst_167 {dimension_numbers = #tpu.dot_dimension_numbers<[1], [0], [0], [1], [0, 0, 1, 1], [], []>} : vector<8x128xbf16>, vector<128x128xbf16>, vector<8x128xf32> -> vector<8x128xf32>
    %c2 = arith.constant 2 : index
    %c0_168 = arith.constant 0 : index
    %c0_169 = arith.constant 0 : index
    %378 = vector.load %arg17[%c2, %c0_168, %c0_169] : memref<3x128x128xbf16, #tpu.memory_space<vmem>>, vector<1x128x128xbf16>
    %379 = vector.shape_cast %378 : vector<1x128x128xbf16> to vector<128x128xbf16>
    %cst_170 = arith.constant dense<0.000000e+00> : vector<8x128xf32>
    %380 = tpu.matmul %371, %379, %cst_170 {dimension_numbers = #tpu.dot_dimension_numbers<[1], [0], [0], [1], [0, 0, 1, 1], [], []>} : vector<8x128xbf16>, vector<128x128xbf16>, vector<8x128xf32> -> vector<8x128xf32>
    %c1_i32 = arith.constant 1 : i32
    %381 = vector.broadcast %c1_i32 : i32 to vector<8x128xi32>
    %382 = arith.cmpi sge, %369, %381 : vector<8x128xi32>
    %c1_i32_171 = arith.constant 1 : i32
    %383 = tpu.dynamic_rotate %374 by %c1_i32_171 dim 0 : vector<8x128xf32>, i32 -> vector<8x128xf32>
    %cst_172 = arith.constant 0.000000e+00 : f32
    %384 = vector.broadcast %cst_172 : f32 to vector<8x128xf32>
    %385 = arith.select %382, %383, %384 : vector<8x128xi1>, vector<8x128xf32>
    %c6_i32 = arith.constant 6 : i32
    %386 = vector.broadcast %c6_i32 : i32 to vector<8x128xi32>
    %387 = arith.cmpi sle, %369, %386 : vector<8x128xi32>
    %c7_i32 = arith.constant 7 : i32
    %388 = tpu.dynamic_rotate %380 by %c7_i32 dim 0 : vector<8x128xf32>, i32 -> vector<8x128xf32>
    %cst_173 = arith.constant 0.000000e+00 : f32
    %389 = vector.broadcast %cst_173 : f32 to vector<8x128xf32>
    %390 = arith.select %387, %388, %389 : vector<8x128xi1>, vector<8x128xf32>
    %391 = arith.addf %385, %377 : vector<8x128xf32>
    %392 = arith.addf %391, %390 : vector<8x128xf32>
    %393 = vector.broadcast %368 : vector<1x128xf32> to vector<8x128xf32>
    %394 = arith.addf %392, %393 : vector<8x128xf32>
    %cst_174 = arith.constant 0.000000e+00 : f32
    %395 = vector.broadcast %cst_174 : f32 to vector<8x128xf32>
    %396 = arith.maximumf %394, %395 : vector<8x128xf32>
    %cst_175 = arith.constant dense<0xFF800000> : vector<128xf32>
    %397 = vector.multi_reduction <maximumf>, %396, %cst_175 [0] : vector<8x128xf32> to vector<128xf32>
    %398 = vector.shape_cast %397 : vector<128xf32> to vector<1x128xf32>
    %399 = vector.extract_strided_slice %367 {offsets = [8, 0], sizes = [8, 128], strides = [1, 1]} : vector<16x128xf32> to vector<8x128xf32>
    %400 = arith.truncf %399 : vector<8x128xf32> to vector<8x128xbf16>
    %c0_176 = arith.constant 0 : index
    %c0_177 = arith.constant 0 : index
    %c0_178 = arith.constant 0 : index
    %401 = vector.load %arg17[%c0_176, %c0_177, %c0_178] : memref<3x128x128xbf16, #tpu.memory_space<vmem>>, vector<1x128x128xbf16>
    %402 = vector.shape_cast %401 : vector<1x128x128xbf16> to vector<128x128xbf16>
    %cst_179 = arith.constant dense<0.000000e+00> : vector<8x128xf32>
    %403 = tpu.matmul %400, %402, %cst_179 {dimension_numbers = #tpu.dot_dimension_numbers<[1], [0], [0], [1], [0, 0, 1, 1], [], []>} : vector<8x128xbf16>, vector<128x128xbf16>, vector<8x128xf32> -> vector<8x128xf32>
    %c1_180 = arith.constant 1 : index
    %c0_181 = arith.constant 0 : index
    %c0_182 = arith.constant 0 : index
    %404 = vector.load %arg17[%c1_180, %c0_181, %c0_182] : memref<3x128x128xbf16, #tpu.memory_space<vmem>>, vector<1x128x128xbf16>
    %405 = vector.shape_cast %404 : vector<1x128x128xbf16> to vector<128x128xbf16>
    %cst_183 = arith.constant dense<0.000000e+00> : vector<8x128xf32>
    %406 = tpu.matmul %400, %405, %cst_183 {dimension_numbers = #tpu.dot_dimension_numbers<[1], [0], [0], [1], [0, 0, 1, 1], [], []>} : vector<8x128xbf16>, vector<128x128xbf16>, vector<8x128xf32> -> vector<8x128xf32>
    %c2_184 = arith.constant 2 : index
    %c0_185 = arith.constant 0 : index
    %c0_186 = arith.constant 0 : index
    %407 = vector.load %arg17[%c2_184, %c0_185, %c0_186] : memref<3x128x128xbf16, #tpu.memory_space<vmem>>, vector<1x128x128xbf16>
    %408 = vector.shape_cast %407 : vector<1x128x128xbf16> to vector<128x128xbf16>
    %cst_187 = arith.constant dense<0.000000e+00> : vector<8x128xf32>
    %409 = tpu.matmul %400, %408, %cst_187 {dimension_numbers = #tpu.dot_dimension_numbers<[1], [0], [0], [1], [0, 0, 1, 1], [], []>} : vector<8x128xbf16>, vector<128x128xbf16>, vector<8x128xf32> -> vector<8x128xf32>
    %c1_i32_188 = arith.constant 1 : i32
    %410 = vector.broadcast %c1_i32_188 : i32 to vector<8x128xi32>
    %411 = arith.cmpi sge, %369, %410 : vector<8x128xi32>
    %c1_i32_189 = arith.constant 1 : i32
    %412 = tpu.dynamic_rotate %403 by %c1_i32_189 dim 0 : vector<8x128xf32>, i32 -> vector<8x128xf32>
    %cst_190 = arith.constant 0.000000e+00 : f32
    %413 = vector.broadcast %cst_190 : f32 to vector<8x128xf32>
    %414 = arith.select %411, %412, %413 : vector<8x128xi1>, vector<8x128xf32>
    %c6_i32_191 = arith.constant 6 : i32
    %415 = vector.broadcast %c6_i32_191 : i32 to vector<8x128xi32>
    %416 = arith.cmpi sle, %369, %415 : vector<8x128xi32>
    %c7_i32_192 = arith.constant 7 : i32
    %417 = tpu.dynamic_rotate %409 by %c7_i32_192 dim 0 : vector<8x128xf32>, i32 -> vector<8x128xf32>
    %cst_193 = arith.constant 0.000000e+00 : f32
    %418 = vector.broadcast %cst_193 : f32 to vector<8x128xf32>
    %419 = arith.select %416, %417, %418 : vector<8x128xi1>, vector<8x128xf32>
    %420 = arith.addf %414, %406 : vector<8x128xf32>
    %421 = arith.addf %420, %419 : vector<8x128xf32>
    %422 = vector.broadcast %368 : vector<1x128xf32> to vector<8x128xf32>
    %423 = arith.addf %421, %422 : vector<8x128xf32>
    %cst_194 = arith.constant 0.000000e+00 : f32
    %424 = vector.broadcast %cst_194 : f32 to vector<8x128xf32>
    %425 = arith.maximumf %423, %424 : vector<8x128xf32>
    %cst_195 = arith.constant dense<0xFF800000> : vector<128xf32>
    %426 = vector.multi_reduction <maximumf>, %425, %cst_195 [0] : vector<8x128xf32> to vector<128xf32>
    %427 = vector.shape_cast %426 : vector<128xf32> to vector<1x128xf32>
    %428 = tpu.concatenate %398, %427 in 0 : vector<1x128xf32>, vector<1x128xf32> -> vector<2x128xf32>
    %429 = arith.truncf %428 : vector<2x128xf32> to vector<2x128xbf16>
    %c0_196 = arith.constant 0 : index
    %c0_197 = arith.constant 0 : index
    %430 = vector.load %arg19[%c0_196, %c0_197] : memref<128x128xbf16, #tpu.memory_space<vmem>>, vector<128x128xbf16>
    %cst_198 = arith.constant dense<0.000000e+00> : vector<2x128xf32>
    %431 = tpu.matmul %429, %430, %cst_198 {dimension_numbers = #tpu.dot_dimension_numbers<[1], [0], [0], [1], [0, 0, 1, 1], [], []>} : vector<2x128xbf16>, vector<128x128xbf16>, vector<2x128xf32> -> vector<2x128xf32>
    %c0_199 = arith.constant 0 : index
    %c0_200 = arith.constant 0 : index
    %432 = vector.load %arg20[%c0_199, %c0_200] : memref<1x128xf32, #tpu.memory_space<vmem>>, vector<1x128xf32>
    %433 = vector.broadcast %432 : vector<1x128xf32> to vector<2x128xf32>
    %434 = arith.addf %431, %433 : vector<2x128xf32>
    %c0_201 = arith.constant 0 : index
    %c0_202 = arith.constant 0 : index
    %435 = vector.load %arg2[%c0_201, %c0_202] : memref<2x1xf32, #tpu.memory_space<vmem>>, vector<2x1xf32>
    %c0_203 = arith.constant 0 : index
    %c0_204 = arith.constant 0 : index
    %436 = vector.load %arg21[%c0_203, %c0_204] : memref<1x128xf32, #tpu.memory_space<vmem>>, vector<1x128xf32>
    %437 = vector.broadcast %435 : vector<2x1xf32> to vector<2x128xf32>
    %438 = vector.broadcast %436 : vector<1x128xf32> to vector<2x128xf32>
    %439 = arith.mulf %437, %438 : vector<2x128xf32>
    %c0_205 = arith.constant 0 : index
    %c0_206 = arith.constant 0 : index
    %440 = vector.load %arg22[%c0_205, %c0_206] : memref<1x128xf32, #tpu.memory_space<vmem>>, vector<1x128xf32>
    %441 = vector.broadcast %440 : vector<1x128xf32> to vector<2x128xf32>
    %442 = arith.addf %439, %441 : vector<2x128xf32>
    %443 = arith.addf %434, %442 : vector<2x128xf32>
    %444 = arith.truncf %443 : vector<2x128xf32> to vector<2x128xbf16>
    %c0_207 = arith.constant 0 : index
    %c0_208 = arith.constant 0 : index
    %445 = vector.load %arg23[%c0_207, %c0_208] : memref<128x128xbf16, #tpu.memory_space<vmem>>, vector<128x128xbf16>
    %cst_209 = arith.constant dense<0.000000e+00> : vector<2x128xf32>
    %446 = tpu.matmul %444, %445, %cst_209 {dimension_numbers = #tpu.dot_dimension_numbers<[1], [0], [0], [1], [0, 0, 1, 1], [], []>} : vector<2x128xbf16>, vector<128x128xbf16>, vector<2x128xf32> -> vector<2x128xf32>
    %c0_210 = arith.constant 0 : index
    %c0_211 = arith.constant 0 : index
    %447 = vector.load %arg24[%c0_210, %c0_211] : memref<1x128xf32, #tpu.memory_space<vmem>>, vector<1x128xf32>
    %448 = vector.broadcast %447 : vector<1x128xf32> to vector<2x128xf32>
    %449 = arith.addf %446, %448 : vector<2x128xf32>
    %c0_212 = arith.constant 0 : index
    %c0_213 = arith.constant 0 : index
    %450 = vector.load %arg25[%c0_212, %c0_213] : memref<2x128xf32, #tpu.memory_space<vmem>>, vector<2x128xf32>
    tpu.vector_store %arg25[%c0_212, %c0_213], %449 {strides = array<i32>} : memref<2x128xf32, #tpu.memory_space<vmem>>, vector<2x128xf32>,
    return
  }
}

</mosaic_0001>

<bundles_post_ra>
// kernel: mul.8
= control target key start
LH: loop header
LB: loop body
LE: loop exit
PB: predicated region body
PF: predicated region fallthrough
CT: control target
= control target key end

     0   :  { %vm8_vm0 = vcmask 64512   ;;  %vm14_vm1 = vcmask 130112   ;;  %s42_s0 = inlined_call_operand.vmem [shape: f32[2,8], index: 0, kind: input, shape index: {}]   ;;  %s43_s1 = inlined_call_operand.vmem [shape: f32[16], index: 1, kind: output, shape index: {}]  }
   0x1   :  { %v5_v0 = vld [vmem:[%s42_s0] sm:$0x3]  ;;  %s25_s0 = smov 8  }
   0x2   :  { %6 = vst [vmem:[#allocation1] sm:$0x3] %v5_v0 }
   0x9   :  { %v11_v1 = vld [vmem:[#allocation1 + $0x1] sm:$0x1]   ;;  %v7_v2 = vld [vmem:[#allocation1] sm:$0x1]  }
   0xa   :  { %12 = vrot.lane.b32.xlu0 %v11_v1, %s25_s0  ;;  %9 = vst.msk [vmem:[#allocation0] sm:$0x1] %vm8_vm0, %v7_v2  }
  0x7c   :  { %v13_v3 = vpop.permute.xlu0 %12  }
  0x7d   :  { %15 = vst.msk [vmem:[#allocation0] sm:$0x1] %vm14_vm1, %v13_v3  }
  0x84   :  { %v20_v4 = vld [vmem:[#allocation0] sm:$0x1] }
  0x85   :  { %23 = vst [vmem:[%s43_s1] sm:$0x1] %v20_v4 }

// kernel: distilbert_news_forward.1
= control target key start
LH: loop header
LB: loop body
LE: loop exit
PB: predicated region body
PF: predicated region fallthrough
CT: control target
= control target key end

     0   :  { %s7916_s0 = inlined_call_operand.vmem [shape: f32[16,128], index: 0, kind: input, shape index: {}]   ;;  %s7917_s1 = inlined_call_operand.vmem [shape: f32[16,16], index: 1, kind: input, shape index: {}]   ;;  %s7918_s2 = inlined_call_operand.vmem [shape: f32[2,1], index: 2, kind: input, shape index: {}]   ;;  %s7919_s3 = inlined_call_operand.hbm [shape: f32[1,128], index: 3, kind: input, shape index: {}]   ;;  %s7920_s4 = inlined_call_operand.hbm [shape: f32[1,128], index: 4, kind: input, shape index: {}]   ;;  %s7921_s5 = inlined_call_operand.hbm [shape: bf16[2,128,384], index: 5, kind: input, shape index: {}]   ;;  %s7922_s6 = inlined_call_operand.hbm [shape: f32[2,1,384], index: 6, kind: input, shape index: {}]   ;;  %s7923_s7 = inlined_call_operand.hbm [shape: bf16[2,128,128], index: 7, kind: input, shape index: {}]   ;;  %s7924_s8 = inlined_call_operand.hbm [shape: f32[2,1,128], index: 8, kind: input, shape index: {}]   ;;  %s7925_s9 = inlined_call_operand.vmem [shape: f32[2,1,128], index: 9, kind: input, shape index: {}]   ;;  %s7926_s10 = inlined_call_operand.vmem [shape: f32[2,1,128], index: 10, kind: input, shape index: {}]   ;;  %s7927_s11 = inlined_call_operand.hbm [shape: bf16[2,128,512], index: 11, kind: input, shape index: {}]   ;;  %s7928_s12 = inlined_call_operand.hbm [shape: f32[2,1,512], index: 12, kind: input, shape index: {}]   ;;  %s7929_s13 = inlined_call_operand.hbm [shape: bf16[2,512,128], index: 13, kind: input, shape index: {}]   ;;  %s7930_s14 = inlined_call_operand.hbm [shape: f32[2,1,128], index: 14, kind: input, shape index: {}]   ;;  %s7931_s15 = inlined_call_operand.vmem [shape: f32[2,1,128], index: 15, kind: input, shape index: {}]   ;;  %s7932_s16 = inlined_call_operand.vmem [shape: f32[2,1,128], index: 16, kind: input, shape index: {}]   ;;  %s7933_s17 = inlined_call_operand.vmem [shape: bf16[3,128,128], index: 17, kind: input, shape index: {}]   ;;  %s7934_s18 = inlined_call_operand.hbm [shape: f32[1,128], index: 18, kind: input, shape index: {}]   ;;  %s7935_s19 = inlined_call_operand.vmem [shape: bf16[128,128], index: 19, kind: input, shape index: {}]   ;;  %s7936_s20 = inlined_call_operand.vmem [shape: f32[1,128], index: 20, kind: input, shape index: {}]   ;;  %s7937_s21 = inlined_call_operand.hbm [shape: f32[1,128], index: 21, kind: input, shape index: {}]   ;;  %s7938_s22 = inlined_call_operand.hbm [shape: f32[1,128], index: 22, kind: input, shape index: {}]   ;;  %s7939_s23 = inlined_call_operand.hbm [shape: bf16[128,128], index: 23, kind: input, shape index: {}]   ;;  %s7940_s24 = inlined_call_operand.hbm [shape: f32[1,128], index: 24, kind: input, shape index: {}]   ;;  %s7941_s25 = inlined_call_operand.hbm [shape: f32[2,128], index: 25, kind: output, shape index: {}]  }
   0x1   :  { %7945 = sst [smem:[#allocation36_spill]] %s7916_s0 }
   0x2   :  { %7946 = sst [smem:[#allocation37_spill]] %s7917_s1 }
   0x3   :  { %7947 = sst [smem:[#allocation38_spill]] %s7918_s2 }
   0x4   :  { %7948 = sst [smem:[#allocation39_spill]] %s7919_s3 }
   0x5   :  { %7949 = sst [smem:[#allocation40_spill]] %s7920_s4 }
   0x6   :  { %7950 = sst [smem:[#allocation41_spill]] %s7921_s5 }
   0x7   :  { %7951 = sst [smem:[#allocation42_spill]] %s7922_s6 }
   0x8   :  { %7952 = sst [smem:[#allocation43_spill]] %s7923_s7 }
   0x9   :  { %7953 = sst [smem:[#allocation44_spill]] %s7924_s8 }
   0xa   :  { %7954 = sst [smem:[#allocation45_spill]] %s7925_s9 }
   0xb   :  { %30 = vsyncpa [#allocation3], 0 }
   0xc   :  { %31 = vsyncpa [#allocation6], 0 }
   0xd   :  { %32 = vsyncpa [#allocation9], 0 }
   0xe   :  { %33 = vsyncpa [#allocation12], 0 }
   0xf   :  { %34 = vsyncpa [#allocation15], 0 }
  0x10   :  { %35 = vsyncpa [#allocation18], 0 }
  0x11   :  { %36 = vsyncpa [#allocation21], 0 }
  0x12   :  { %37 = vsyncpa [#allocation24], 0 }
  0x13   :  { %38 = vsyncpa [#allocation4], 0  ;;  %s6863_s29 = smov [#allocation5]   ;;  %s6864_s6 = smov [#allocation8]  }
  0x14   :  { %s61_s2 = sshll.u32 %s6863_s29, 4  ;;  %s82_s30 = sshll.u32 %s6864_s6, 4  ;;  %s62_s2 = int_to_ptr.vmem [resolvable:$true] %s61_s2  ;;  %s83_s30 = int_to_ptr.vmem [resolvable:$true] %s82_s30 }
  0x15   :  { %s6533_s7 = scalar_lea.vmem %s62_s2, 16  ;;  %s6537_s3 = scalar_lea.vmem %s62_s2, 32 }
  0x16   :  { %p6534_p0 = scmp.ne.s32.totalorder %s62_s2, %s6533_s7  ;;  %p6538_p1 = scmp.lt.s32.totalorder %s62_s2, %s62_s2 }
  0x17   :  { %p6539_p2 = scmp.lt.s32.totalorder %s6537_s3, %s6533_s7 }
  0x19   :  { %p6540_p3 = por %p6539_p2, %p6538_p1 }
  0x1b   :  { %p6541_p4 = pnand %p6540_p3, %p6534_p0 }
  0x1d   :  { %6544 = shalt.err (!%p6541_p4)
}
  0x1e   :  { %s7955_s8 = sld [smem:[#allocation40_spill]]  ;;  %s6553_s27 = scalar_lea.vmem %s83_s30, 96 }
  0x1f   :  { %p6554_p5 = scmp.ne.s32.totalorder %s83_s30, %s6553_s27  ;;  %p6558_p6 = scmp.lt.s32.totalorder %s83_s30, %s83_s30 }
  0x20   :  { %p6559_p7 = scmp.lt.s32.totalorder %s6553_s27, %s6553_s27 }
  0x22   :  { %p6560_p8 = por %p6559_p7, %p6558_p6 }
  0x24   :  { %64 = dma.hbm_to_vmem [thread:$0]  %s7955_s8, 16, %s62_s2, [#allocation6]  }
  0x25   :  { %p6561_p9 = pnand %p6560_p8, %p6554_p5 }
  0x27   :  { %6564 = shalt.err (!%p6561_p9)
}
  0x28   :  { %s6865_s4 = smov 48   ;;  %s6866_s28 = smov 3  }
  0x29   :  { %s7956_s0 = sld [smem:[#allocation42_spill]]  ;;  %s6867_s29 = smov [#allocation11]  }
  0x2a   :  { %s106_s6 = sshll.u32 %s6867_s29, 4  ;;  %s107_s6 = int_to_ptr.vmem [resolvable:$true] %s106_s6 }
  0x2b   :  { %s6573_s7 = scalar_lea.vmem %s107_s6, 32  ;;  %p6578_p11 = scmp.lt.s32.totalorder %s107_s6, %s107_s6 }
  0x2c   :  { %p6574_p10 = scmp.ne.s32.totalorder %s107_s6, %s6573_s7  ;;  %p6579_p12 = scmp.lt.s32.totalorder %s6573_s7, %s6573_s7 }
  0x2e   :  { %p6580_p13 = por %p6579_p12, %p6578_p11 }
  0x2f   :  { %88 = dma.hbm_to_vmem [thread:$0]  %s7956_s0, 96, %s83_s30, [#allocation9], %s6865_s4, %s6865_s4, %s6866_s28  }
  0x30   :  { %p6581_p0 = pnand %p6580_p13, %p6574_p10 }
  0x32   :  { %6584 = shalt.err (!%p6581_p0)
}
  0x33   :  { %s6868_s2 = smov 16   ;;  %s6869_s3 = smov 1  }
  0x34   :  { %s7957_s8 = sld [smem:[#allocation44_spill]]  ;;  %s6870_s27 = smov [#allocation14]  }
  0x35   :  { %s134_s30 = sshll.u32 %s6870_s27, 4  ;;  %s6871_s4 = smov [#allocation17]   ;;  %s135_s30 = int_to_ptr.vmem [resolvable:$true] %s134_s30 }
  0x36   :  { %s158_s28 = sshll.u32 %s6871_s4, 4  ;;  %s6593_s9 = scalar_lea.vmem %s135_s30, 128  ;;  %s159_s28 = int_to_ptr.vmem [resolvable:$true] %s158_s28 }
  0x37   :  { %p6594_p1 = scmp.ne.s32.totalorder %s135_s30, %s6593_s9  ;;  %p6598_p2 = scmp.lt.s32.totalorder %s135_s30, %s135_s30 }
  0x38   :  { %p6599_p3 = scmp.lt.s32.totalorder %s6593_s9, %s6593_s9 }
  0x3a   :  { %112 = dma.hbm_to_vmem [thread:$0]  %s7957_s8, 32, %s107_s6, [#allocation12], %s6868_s2, %s6868_s2, %s6869_s3  }
  0x3b   :  { %p6600_p4 = por %p6599_p3, %p6598_p2 }
  0x3d   :  { %p6601_p5 = pnand %p6600_p4, %p6594_p1 }
  0x3f   :  { %6604 = shalt.err (!%p6601_p5)
}
  0x40   :  { %s6872_s5 = smov 64   ;;  %s6873_s0 = smov 4  }
  0x41   :  { %140 = dma.hbm_to_vmem [thread:$0]  %s7928_s12, 128, %s135_s30, [#allocation15], %s6872_s5, %s6872_s5, %s6873_s0  }
  0x42   :  { %s6613_s6 = scalar_lea.vmem %s159_s28, 32  ;;  %p6618_p7 = scmp.lt.s32.totalorder %s159_s28, %s159_s28 }
  0x43   :  { %p6614_p6 = scmp.ne.s32.totalorder %s159_s28, %s6613_s6  ;;  %p6619_p8 = scmp.lt.s32.totalorder %s6613_s6, %s6613_s6 }
  0x45   :  { %p6620_p9 = por %p6619_p8, %p6618_p7 }
  0x47   :  { %p6621_p10 = pnand %p6620_p9, %p6614_p6 }
  0x49   :  { %6624 = shalt.err (!%p6621_p10)
}
  0x4a   :  { %164 = dma.hbm_to_vmem [thread:$0]  %s7930_s14, 32, %s159_s28, [#allocation18], %s6868_s2, %s6868_s2, %s6869_s3  }
  0x4b   :  { %s6874_s8 = smov [#allocation20]   ;;  %s6875_s4 = smov [#allocation23]  }
  0x4c   :  { %s191_s27 = sshll.u32 %s6874_s8, 4  ;;  %s210_s9 = sshll.u32 %s6875_s4, 4  ;;  %s192_s27 = int_to_ptr.vmem [resolvable:$true] %s191_s27  ;;  %s211_s9 = int_to_ptr.vmem [resolvable:$true] %s210_s9 }
  0x4d   :  { %s6633_s12 = scalar_lea.vmem %s192_s27, 16  ;;  %s6637_s30 = scalar_lea.vmem %s192_s27, 32 }
  0x4e   :  { %p6634_p11 = scmp.ne.s32.totalorder %s192_s27, %s6633_s12  ;;  %p6638_p12 = scmp.lt.s32.totalorder %s192_s27, %s192_s27 }
  0x4f   :  { %p6639_p13 = scmp.lt.s32.totalorder %s6637_s30, %s6633_s12 }
  0x51   :  { %p6640_p0 = por %p6639_p13, %p6638_p12 }
  0x53   :  { %p6641_p1 = pnand %p6640_p0, %p6634_p11 }
  0x55   :  { %6644 = shalt.err (!%p6641_p1)
}
  0x56   :  { %194 = dma.hbm_to_vmem [thread:$0]  %s7937_s21, 16, %s192_s27, [#allocation21]  }
  0x57   :  { %s6653_s6 = scalar_lea.vmem %s211_s9, 1024  ;;  %p6658_p3 = scmp.lt.s32.totalorder %s211_s9, %s211_s9 }
  0x58   :  { %p6654_p2 = scmp.ne.s32.totalorder %s211_s9, %s6653_s6  ;;  %p6659_p4 = scmp.lt.s32.totalorder %s6653_s6, %s6653_s6 }
  0x5a   :  { %p6660_p5 = por %p6659_p4, %p6658_p3 }
  0x5c   :  { %p6661_p6 = pnand %p6660_p5, %p6654_p2 }
  0x5e   :  { %6664 = shalt.err (!%p6661_p6)
}
  0x5f   :  { %216 = dma.hbm_to_vmem [thread:$0]  %s7939_s23, 1024, %s211_s9, [#allocation24], %s6872_s5, %s6872_s5, %s6873_s0  }
  0x60   :  { %s6876_s28 = smov [#allocation2]   ;;  %s6877_s1 = smov [#allocation7]  }
  0x61   :  { %s51_s26 = sshll.u32 %s6876_s28, 4  ;;  %s70_s21 = sshll.u32 %s6877_s1, 4  ;;  %s52_s26 = int_to_ptr.vmem [resolvable:$true] %s51_s26  ;;  %s71_s21 = int_to_ptr.vmem [resolvable:$true] %s70_s21 }
  0x62   :  { %s6673_s8 = scalar_lea.vmem %s52_s26, 16  ;;  %s6677_s27 = scalar_lea.vmem %s52_s26, 32 }
  0x63   :  { %p6674_p7 = scmp.ne.s32.totalorder %s52_s26, %s6673_s8  ;;  %p6678_p8 = scmp.lt.s32.totalorder %s52_s26, %s52_s26 }
  0x64   :  { %p6679_p9 = scmp.lt.s32.totalorder %s6677_s27, %s6673_s8 }
  0x66   :  { %p6680_p10 = por %p6679_p9, %p6678_p8 }
  0x68   :  { %p6681_p11 = pnand %p6680_p10, %p6674_p7 }
  0x6a   :  { %6684 = shalt.err (!%p6681_p11)
}
  0x6b   :  { %s7958_s30 = sld [smem:[#allocation39_spill]]  ;;  %s6693_s29 = scalar_lea.vmem %s71_s21, 6144 }
  0x6c   :  { %p6694_p12 = scmp.ne.s32.totalorder %s71_s21, %s6693_s29  ;;  %p6698_p13 = scmp.lt.s32.totalorder %s71_s21, %s71_s21 }
  0x6d   :  { %p6699_p0 = scmp.lt.s32.totalorder %s6693_s29, %s6693_s29 }
  0x6f   :  { %p6700_p1 = por %p6699_p0, %p6698_p13 }
  0x71   :  { %54 = dma.hbm_to_vmem [thread:$0]  %s7958_s30, 16, %s52_s26, [#allocation3]  }
  0x72   :  { %p6701_p2 = pnand %p6700_p1, %p6694_p12 }
  0x74   :  { %6704 = shalt.err (!%p6701_p2)
}
  0x75   :  { %s6878_s23 = smov 192   ;;  %s6879_s9 = smov 12  }
  0x76   :  { %s7959_s14 = sld [smem:[#allocation41_spill]]  ;;  %s6880_s3 = smov [#allocation10]  }
  0x77   :  { %s94_s28 = sshll.u32 %s6880_s3, 4  ;;  %s6881_s1 = smov [#allocation13]   ;;  %s95_s28 = int_to_ptr.vmem [resolvable:$true] %s94_s28 }
  0x78   :  { %s122_s8 = sshll.u32 %s6881_s1, 4  ;;  %s6713_s26 = scalar_lea.vmem %s95_s28, 2048  ;;  %s123_s8 = int_to_ptr.vmem [resolvable:$true] %s122_s8 }
  0x79   :  { %p6714_p3 = scmp.ne.s32.totalorder %s95_s28, %s6713_s26  ;;  %p6718_p4 = scmp.lt.s32.totalorder %s95_s28, %s95_s28 }
  0x7a   :  { %p6719_p5 = scmp.lt.s32.totalorder %s6713_s26, %s6713_s26 }
  0x7c   :  { %76 = dma.hbm_to_vmem [thread:$0]  %s7959_s14, 6144, %s71_s21, [#allocation6], %s6878_s23, %s6878_s23, %s6879_s9  }
  0x7d   :  { %p6720_p6 = por %p6719_p5, %p6718_p4 }
  0x7f   :  { %p6721_p7 = pnand %p6720_p6, %p6714_p3 }
  0x81   :  { %6724 = shalt.err (!%p6721_p7)
}
  0x82   :  { %s7960_s12 = sld [smem:[#allocation43_spill]]  ;;  %s6733_s21 = scalar_lea.vmem %s123_s8, 8192 }
  0x83   :  { %p6734_p8 = scmp.ne.s32.totalorder %s123_s8, %s6733_s21  ;;  %p6738_p9 = scmp.lt.s32.totalorder %s123_s8, %s123_s8 }
  0x84   :  { %p6739_p10 = scmp.lt.s32.totalorder %s6733_s21, %s6733_s21 }
  0x86   :  { %p6740_p11 = por %p6739_p10, %p6738_p9 }
  0x88   :  { %100 = dma.hbm_to_vmem [thread:$0]  %s7960_s12, 2048, %s95_s28, [#allocation9], %s6872_s5, %s6872_s5, %s6873_s0  }
  0x89   :  { %p6741_p12 = pnand %p6740_p11, %p6734_p8 }
  0x8b   :  { %6744 = shalt.err (!%p6741_p12)
}
  0x8c   :  { %s6882_s30 = smov 256   ;;  %s6883_s9 = smov [#allocation16]  }
  0x8d   :  { %128 = dma.hbm_to_vmem [thread:$0]  %s7927_s11, 8192, %s123_s8, [#allocation12], %s6882_s30, %s6882_s30, %s6868_s2  }
  0x8e   :  { %s146_s7 = sshll.u32 %s6883_s9, 4  ;;  %s6884_s6 = smov [#allocation19]   ;;  %s147_s7 = int_to_ptr.vmem [resolvable:$true] %s146_s7 }
  0x8f   :  { %s177_s14 = sshll.u32 %s6884_s6, 4  ;;  %s6753_s3 = scalar_lea.vmem %s147_s7, 8192  ;;  %s178_s14 = int_to_ptr.vmem [resolvable:$true] %s177_s14 }
  0x90   :  { %p6754_p13 = scmp.ne.s32.totalorder %s147_s7, %s6753_s3  ;;  %p6758_p0 = scmp.lt.s32.totalorder %s147_s7, %s147_s7 }
  0x91   :  { %p6759_p1 = scmp.lt.s32.totalorder %s6753_s3, %s6753_s3 }
  0x93   :  { %p6760_p2 = por %p6759_p1, %p6758_p0 }
  0x95   :  { %p6761_p3 = pnand %p6760_p2, %p6754_p13 }
  0x97   :  { %6764 = shalt.err (!%p6761_p3)
}
  0x98   :  { %152 = dma.hbm_to_vmem [thread:$0]  %s7929_s13, 8192, %s147_s7, [#allocation15], %s6872_s5, %s6872_s5, %s6873_s0  }
  0x99   :  { %s6773_s11 = scalar_lea.vmem %s178_s14, 16  ;;  %s6777_s2 = scalar_lea.vmem %s178_s14, 32 }
  0x9a   :  { %p6774_p4 = scmp.ne.s32.totalorder %s178_s14, %s6773_s11  ;;  %p6778_p5 = scmp.lt.s32.totalorder %s178_s14, %s178_s14 }
  0x9b   :  { %p6779_p6 = scmp.lt.s32.totalorder %s6777_s2, %s6773_s11 }
  0x9d   :  { %p6780_p7 = por %p6779_p6, %p6778_p5 }
  0x9f   :  { %p6781_p8 = pnand %p6780_p7, %p6774_p4 }
  0xa1   :  { %6784 = shalt.err (!%p6781_p8)
}
  0xa2   :  { %180 = dma.hbm_to_vmem [thread:$0]  %s7934_s18, 16, %s178_s14, [#allocation18]  }
  0xa3   :  { %s6885_s27 = smov [#allocation22]   ;;  %s6886_s12 = smov [#allocation25]  }
  0xa4   :  { %s201_s4 = sshll.u32 %s6885_s27, 4  ;;  %s223_s21 = sshll.u32 %s6886_s12, 4  ;;  %s202_s4 = int_to_ptr.vmem [resolvable:$true] %s201_s4  ;;  %s224_s21 = int_to_ptr.vmem [resolvable:$true] %s223_s21 }
  0xa5   :  { %s6793_s30 = scalar_lea.vmem %s202_s4, 16  ;;  %s6797_s13 = scalar_lea.vmem %s202_s4, 32 }
  0xa6   :  { %p6794_p9 = scmp.ne.s32.totalorder %s202_s4, %s6793_s30  ;;  %p6798_p10 = scmp.lt.s32.totalorder %s202_s4, %s202_s4 }
  0xa7   :  { %p6799_p11 = scmp.lt.s32.totalorder %s6797_s13, %s6793_s30 }
  0xa9   :  { %p6800_p12 = por %p6799_p11, %p6798_p10 }
  0xab   :  { %p6801_p13 = pnand %p6800_p12, %p6794_p9 }
  0xad   :  { %6804 = shalt.err (!%p6801_p13)
}
  0xae   :  { %204 = dma.hbm_to_vmem [thread:$0]  %s7938_s22, 16, %s202_s4, [#allocation21]  }
  0xaf   :  { %s6813_s23 = scalar_lea.vmem %s224_s21, 16  ;;  %s6817_s18 = scalar_lea.vmem %s224_s21, 32 }
  0xb0   :  { %p6814_p0 = scmp.ne.s32.totalorder %s224_s21, %s6813_s23  ;;  %p6818_p1 = scmp.lt.s32.totalorder %s224_s21, %s224_s21 }
  0xb1   :  { %p6819_p2 = scmp.lt.s32.totalorder %s6817_s18, %s6813_s23 }
  0xb3   :  { %p6820_p3 = por %p6819_p2, %p6818_p1 }
  0xb5   :  { %p6821_p4 = pnand %p6820_p3, %p6814_p0 }
  0xb7   :  { %6824 = shalt.err (!%p6821_p4)
}
  0xb8   :  { %226 = dma.hbm_to_vmem [thread:$0]  %s7940_s24, 16, %s224_s21, [#allocation24]  }
  0xb9   :  { %6845 = dma.done.wait [#allocation3], 16  }
  0xba   :  { %6846 = vsyncadd [#allocation3], 4294967280 }
  0xbb   :  { %6847 = dma.done.wait [#allocation6], 6160  }
  0xbc   :  { %6848 = vsyncadd [#allocation6], 4294961136 }
  0xbd   :  { %6849 = dma.done.wait [#allocation9], 2144  }
  0xbe   :  { %6850 = vsyncadd [#allocation9], 4294965152 }
  0xbf   :  { %6851 = dma.done.wait [#allocation12], 8224  }
  0xc0   :  { %6852 = vsyncadd [#allocation12], 4294959072 }
  0xc1   :  { %6853 = dma.done.wait [#allocation15], 8320  }
  0xc2   :  { %6854 = vsyncadd [#allocation15], 4294958976 }
  0xc3   :  { %6855 = dma.done.wait [#allocation18], 48  }
  0xc4   :  { %6856 = vsyncadd [#allocation18], 4294967248 }
  0xc5   :  { %6857 = dma.done.wait [#allocation21], 32  }
  0xc6   :  { %6858 = vsyncadd [#allocation21], 4294967264 }
  0xc7   :  { %6859 = dma.done.wait [#allocation24], 1040  }
  0xc8   :  { %6860 = vsyncadd [#allocation24], 4294966256  ;;  %s7961_s14 = sld [smem:[#allocation36_spill]]  ;;  %v6127_v2 = vld [vmem:[#allocation7 + $0xac] ss:$12 sps:$4 sm:$0xff]   ;;  %v6887_v4 = vmov 0.0   ;;  %v353_v53 = vlaneseq }
  0xc9   :  { %v6129_v3 = vld [vmem:[#allocation7 + $0xa8] ss:$12 sps:$4 sm:$0xff]   ;;  %5714 = vmatprep.subr.bf16.mxu1 %v6887_v4  ;;  %v6130_v5 = vld [vmem:[#allocation7 + $0xb0] ss:$12 sps:$4 sm:$0xff]   ;;  %496 = vmatprep.subr.bf16.mxu0 %v6127_v2  ;;  %v6134_v16 = vld [vmem:[#allocation7 + $0x98] ss:$12 sps:$4 sm:$0xff]  }
  0xca   :  { %497 = vmatpush1.bf16.msra.mxu0 %v6129_v3  ;;  %5715 = vmatpush3.bf16.msra.mxu1 %v6130_v5  ;;  %v6131_v14 = vld [vmem:[#allocation7 + $0x94] ss:$12 sps:$4 sm:$0xff]   ;;  %v6133_v15 = vld [vmem:[#allocation7 + $0x90] ss:$12 sps:$4 sm:$0xff]   ;;  %v6137_v18 = vld [vmem:[#allocation7 + $0x78] ss:$12 sps:$4 sm:$0xff]  }
  0xcb   :  { %5716 = vmatprep.subr.bf16.mxu1 %v6887_v4  ;;  %498 = vmatprep.subr.bf16.mxu0 %v6131_v14  ;;  %v6135_v17 = vld [vmem:[#allocation7 + $0x7c] ss:$12 sps:$4 sm:$0xff]   ;;  %v6138_v19 = vld [vmem:[#allocation7 + $0x80] ss:$12 sps:$4 sm:$0xff]   ;;  %v6139_v20 = vld [vmem:[#allocation7 + $0x64] ss:$12 sps:$4 sm:$0xff]  }
  0xcc   :  { %v6141_v21 = vld [vmem:[#allocation7 + $0x60] ss:$12 sps:$4 sm:$0xff]   ;;  %v6142_v22 = vld [vmem:[#allocation7 + $0x68] ss:$12 sps:$4 sm:$0xff]   ;;  %v6146_v25 = vld [vmem:[#allocation7 + $0x50] ss:$12 sps:$4 sm:$0xff]  }
  0xcd   :  { %v6143_v23 = vld [vmem:[#allocation7 + $0x4c] ss:$12 sps:$4 sm:$0xff]   ;;  %v6145_v24 = vld [vmem:[#allocation7 + $0x48] ss:$12 sps:$4 sm:$0xff]   ;;  %v6888_v27 = vmov 0   ;;  %vm6889_vm0 = vmmov 0  }
  0xce   :  { %v273_v0 = vld [vmem:[%s7961_s14] sm:$0xff]  ;;  %v274_v1 = vld [vmem:[%s7961_s14 + $0x8] sm:$0xff]  ;;  %499 = vmatpush1.bf16.msra.mxu0 %v6133_v15  ;;  %5717 = vmatpush3.bf16.msra.mxu1 %v6134_v16  ;;  %v7119_v54 = vshrl.u32 %v353_v53, 7  ;;  %vm580_vm1 = vcmask 261120   ;;  %s7962_s11 = sld [smem:[#allocation37_spill]]  ;;  %vm672_vm2 = vcmask 130048  }
  0xcf   :  { %277 = vadd.xlane.f32.xlu0 %v273_v0  ;;  %5718 = vmatprep.subr.bf16.mxu1 %v6887_v4  ;;  %v6147_v26 = vld [vmem:[#allocation7 + $0x34] ss:$12 sps:$4 sm:$0xff]   ;;  %v6149_v28 = vld [vmem:[#allocation7 + $0x30] ss:$12 sps:$4 sm:$0xff]   ;;  %v6150_v29 = vld [vmem:[#allocation7 + $0x38] ss:$12 sps:$4 sm:$0xff]  }
  0xd0   :  { %500 = vmatprep.subr.bf16.mxu0 %v6135_v17  ;;  %528 = vmatprep.mubr.bf16.mxu0 %v6888_v27  ;;  %v6151_v30 = vld [vmem:[#allocation7 + $0x1c] ss:$12 sps:$4 sm:$0xff]   ;;  %v6153_v31 = vld [vmem:[#allocation7 + $0x18] ss:$12 sps:$4 sm:$0xff]   ;;  %v6154_v32 = vld [vmem:[#allocation7 + $0x20] ss:$12 sps:$4 sm:$0xff]  }
  0xd1   :  { %5730 = vmatprep.mubr.msk.bf16.mxu1 %vm6889_vm0, %v6887_v4  ;;  %6126 = vset.pattern.permute.xlu0 %v6888_v27  ;;  %v6155_v33 = vld [vmem:[#allocation7 + $0x4] ss:$12 sps:$4 sm:$0xff]   ;;  %v6157_v34 = vld [vmem:[#allocation7] ss:$12 sps:$4 sm:$0xff]   ;;  %v6158_v35 = vld [vmem:[#allocation7 + $0x8] ss:$12 sps:$4 sm:$0xff]  }
  0xd2   :  { %501 = vmatpush1.bf16.msra.mxu0 %v6137_v18  ;;  %5719 = vmatpush3.bf16.msra.mxu1 %v6138_v19  ;;  %v5119_v44 = vld [vmem:[#allocation2] ss:$0 sm:$0xff]  ;;  %v5120_v48 = vld [vmem:[#allocation5] ss:$0 sm:$0xff]  ;;  %v7122_v55 = vsub.s32 0, %v7119_v54  ;;  %v7128_v61 = vsub.s32 1, %v7119_v54 }
  0xd3   :  { %279 = vadd.xlane.f32.xlu0 %v274_v1  ;;  %5720 = vmatprep.subr.bf16.mxu1 %v6887_v4  ;;  %v351_v56 = vld [vmem:[#allocation8] sm:$0x7]  ;;  %s6890_s26 = smov 96   ;;  %s6891_s27 = smov 32   ;;  %vm1416_vm3 = vcmask 523264   ;;  %vm1419_vm4 = vcmask 785408  }
  0xd4   :  { %502 = vmatprep.subr.bf16.mxu0 %v6139_v20  ;;  %v356_v57 = vrot.slane %v351_v56, %v7122_v55  ;;  %v360_v2 = vrot.slane %v351_v56, %v7128_v61  ;;  %v7164_v14 = vld [vmem:[%s7962_s11 + $0x8] sm:$0xff]  ;;  %v7169_v17 = vld [vmem:[%s7962_s11] sm:$0xff]  ;;  %s7963_s21 = sld [smem:[#allocation45_spill]]  ;;  %vm4690_vm5 = vcmp.ge.s32.totalorder %v7119_v54, 1  ;;  %vm4693_vm6 = vcmp.le.s32.totalorder %v7119_v54, 6  ;;  %s6892_s9 = smov [#allocation26]  }
  0xd5   :  { %s7964_s23 = sld [smem:[#allocation38_spill]]  ;;  %vm4847_vm7 = vcmask 1040384   ;;  %s5103_s7 = sshll.u32 %s6892_s9, 4  ;;  %s5104_s7 = int_to_ptr.vmem [resolvable:$true] %s5103_s7 }
  0xd6   :  { %503 = vmatpush1.bf16.msra.mxu0 %v6141_v21  ;;  %5721 = vmatpush3.bf16.msra.mxu1 %v6142_v22  ;;  %s6825_s22 = scalar_lea.vmem %s5104_s7, 32  ;;  %p6830_p6 = scmp.lt.s32.totalorder %s5104_s7, %s5104_s7 }
  0xd7   :  { %504 = vmatprep.subr.bf16.mxu0 %v6143_v23  ;;  %5722 = vmatprep.subr.bf16.mxu1 %v6887_v4  ;;  %p6826_p5 = scmp.ne.s32.totalorder %s5104_s7, %s6825_s22  ;;  %p6831_p7 = scmp.lt.s32.totalorder %s6825_s22, %s6825_s22 }
  0xd9   :  { %p6832_p8 = por %p6831_p7, %p6830_p6 }
  0xda   :  { %505 = vmatpush1.bf16.msra.mxu0 %v6145_v24  ;;  %5723 = vmatpush3.bf16.msra.mxu1 %v6146_v25 }
  0xdb   :  { %506 = vmatprep.subr.bf16.mxu0 %v6147_v26  ;;  %5724 = vmatprep.subr.bf16.mxu1 %v6887_v4  ;;  %p6833_p9 = pnand %p6832_p8, %p6826_p5 }
  0xde   :  { %507 = vmatpush1.bf16.msra.mxu0 %v6149_v28  ;;  %5725 = vmatpush3.bf16.msra.mxu1 %v6150_v29 }
  0xdf   :  { %508 = vmatprep.subr.bf16.mxu0 %v6151_v30  ;;  %5726 = vmatprep.subr.bf16.mxu1 %v6887_v4 }
  0xe2   :  { %509 = vmatpush1.bf16.msra.mxu0 %v6153_v31  ;;  %5727 = vmatpush3.bf16.msra.mxu1 %v6154_v32 }
  0xe3   :  { %510 = vmatprep.subr.bf16.mxu0 %v6155_v33  ;;  %5728 = vmatprep.subr.bf16.mxu1 %v6887_v4 }
  0xe6   :  { %511 = vmatpush1.bf16.msra.mxu0 %v6157_v34  ;;  %5729 = vmatpush3.bf16.msra.mxu1 %v6158_v35 }
 0x158   :  { %v278_v6 = vpop.xlane.xlu0 %277 }
 0x159   :  { %v282_v7 = vmul.f32 0.0078125, %v278_v6  ;;  %v7134_v6 = vsub.s32 2, %v7119_v54 }
 0x15b   :  { %v7093_v8 = vsub.f32 %v273_v0, %v282_v7 }
 0x15c   :  { %v280_v9 = vpop.xlane.xlu0 %279 }
 0x15d   :  { %v283_v10 = vmul.f32 0.0078125, %v280_v9  ;;  %v286_v11 = vmul.f32 %v7093_v8, %v7093_v8  ;;  %v364_v9 = vrot.slane %v351_v56, %v7134_v6 }
 0x15f   :  { %v7097_v12 = vsub.f32 %v274_v1, %v283_v10  ;;  %288 = vadd.xlane.f32.xlu1 %v286_v11 }
 0x161   :  { %v287_v13 = vmul.f32 %v7097_v12, %v7097_v12 }
 0x163   :  { %290 = vadd.xlane.f32.xlu1 %v287_v13 }
 0x1e8   :  { %v289_v36 = vpop.xlane.xlu1 %288 }
 0x1e9   :  { %v292_v37 = vmul.f32 0.0078125, %v289_v36 }
 0x1eb   :  { %v294_v38 = vadd.f32 1e-12, %v292_v37 }
 0x1ec   :  { %v291_v39 = vpop.xlane.xlu1 %290 }
 0x1ed   :  { %6407 = vrsqrt.f32 %v294_v38  ;;  %v293_v40 = vmul.f32 0.0078125, %v291_v39 }
 0x1ef   :  { %v295_v41 = vadd.f32 1e-12, %v293_v40 }
 0x1f1   :  { %6409 = vrsqrt.f32 %v295_v41 }
 0x1fa   :  { %v6408_v42 = vpop.eup %6407 }
 0x1fb   :  { %v298_v43 = vmul.f32 %v6408_v42, %v7093_v8 }
 0x1fd   :  { %v306_v47 = vmul.f32 %v5119_v44, %v298_v43 }
 0x1fe   :  { %v6410_v45 = vpop.eup %6409 }
 0x1ff   :  { %v299_v46 = vmul.f32 %v6410_v45, %v7097_v12  ;;  %v7113_v50 = vadd.f32 %v5120_v48, %v306_v47 }
 0x201   :  { %v307_v49 = vmul.f32 %v5119_v44, %v299_v46 }
 0x203   :  { %v7115_v51 = vadd.f32 %v5120_v48, %v307_v49 }
 0x205   :  { %v318_v52 = vpack.c.bf16 %v7115_v51, %v7113_v50 }
 0x207   :  { %529 = vmatmul.mubr.bf16.vlgmr.msra.gmra.mxu0 %v318_v52  ;;  %5731 = vmatmul.mubr.bf16.vlgmr.msra.gmra.mxu1 %v318_v52 }
 0x2c7   :  { %v530_v58 = vpop.f32.mrf.mxu0  ;;  %v573_v59 = vpop.f32.mrf.mxu1 }
 0x2c8   :  { %v7125_v60 = vadd.f32 %v530_v58, %v356_v57  ;;  %v7154_v12 = vadd.f32 %v573_v59, %v364_v9 }
 0x2c9   :  { %v532_v62 = vpop.f32.mrf.mxu0  ;;  %v5732_v63 = vpop.f32.mrf.mxu1 }
 0x2ca   :  { %5738 = vmatprep.mubr.msk.f32.mxu0 %vm580_vm1, %v7125_v60  ;;  %v7138_v8 = vadd.f32 %v532_v62, %v360_v2 }
 0x2cb   :  { %v534_v0 = vpop.f32.mrf.mxu0  ;;  %v576_v1 = vpop.f32.mrf.mxu1 }
 0x2cc   :  { %v7147_v10 = vadd.f32 %v576_v1, %v364_v9  ;;  %v7151_v11 = vadd.f32 %v534_v0, %v356_v57 }
 0x2cd   :  { %v536_v3 = vpop.f32.mrf.mxu0  ;;  %v5733_v5 = vpop.f32.mrf.mxu1 }
 0x2ce   :  { %v7136_v7 = vadd.f32 %v536_v3, %v360_v2 }
 0x2d0   :  { %5734 = vmatprep.subr.msk.mxu0 %vm580_vm1, %v7136_v7 }
 0x2d1   :  { %5735 = vmatpush3.xpose.msk.msra.mxu0 %vm580_vm1, %v7136_v7 }
 0x2d2   :  { %5736 = vmatprep.subr.msk.mxu0 %vm580_vm1, %v7138_v8 }
 0x2d5   :  { %5737 = vmatpush3.xpose.msk.msra.mxu0 %vm580_vm1, %v7138_v8 }
 0x2d6   :  { %5741 = vmatprep.subr.mxu0 %v7147_v10 }
 0x2d8   :  { %5739 = vmatmul.mubr.msk.f32.vlgmr.msra.gmra.mxu0 %vm580_vm1, %v7151_v11 }
 0x2d9   :  { %5742 = vmatpush3.msra.mxu0 %v7147_v10 }
 0x2da   :  { %5743 = vmatprep.subr.mxu0 %v7154_v12 }
 0x2db   :  { %5744 = vmatpush3.msra.mxu0 %v7154_v12 }
 0x398   :  { %v5740_v13 = vpop.f32.mrf.mxu0 }
 0x399   :  { %v669_v15 = vmul.f32 0.17677669, %v5740_v13 }
 0x39a   :  { %v659_v16 = vpop.f32.mrf.mxu0 }
 0x39b   :  { %v668_v18 = vmul.f32 0.17677669, %v659_v16  ;;  %v671_v19 = vadd.f32 %v669_v15, %v7164_v14 }
 0x39d   :  { %v676_v20 = vsel %vm672_vm2, %v671_v19, -inf  ;;  %v670_v21 = vadd.f32 %v668_v18, %v7169_v17 }
 0x39e   :  { %677 = vmax.xlane.f32.xlu1 %v676_v20 }
 0x39f   :  { %v673_v22 = vsel %vm672_vm2, %v670_v21, -inf }
 0x3a0   :  { %674 = vmax.xlane.f32.xlu0 %v673_v22 }
 0x427   :  { %v678_v23 = vpop.xlane.xlu1 %677 }
 0x428   :  { %v680_v24 = vsub.f32 %v671_v19, %v678_v23 }
 0x429   :  { %v675_v25 = vpop.xlane.xlu0 %674 }
 0x42a   :  { %v683_v26 = vmul.f32 1.442695, %v680_v24  ;;  %v679_v28 = vsub.f32 %v670_v21, %v675_v25 }
 0x42c   :  { %6411 = vpow2.f32 %v683_v26  ;;  %v681_v29 = vmul.f32 1.442695, %v679_v28 }
 0x42e   :  { %6413 = vpow2.f32 %v681_v29 }
 0x439   :  { %v6412_v30 = vpop.eup %6411 }
 0x43a   :  { %v688_v31 = vsel %vm672_vm2, %v6412_v30, 0.0 }
 0x43b   :  { %v6414_v32 = vpop.eup %6413  ;;  %689 = vadd.xlane.f32.xlu1 %v688_v31 }
 0x43c   :  { %v685_v33 = vsel %vm672_vm2, %v6414_v32, 0.0 }
 0x43d   :  { %686 = vadd.xlane.f32.xlu0 %v685_v33 }
 0x44c   :  { %780 = vrot.lane.b32.xlu1 %v7138_v8, %s6890_s26 }
 0x450   :  { %776 = vrot.lane.b32.xlu1 %v7125_v60, %s6890_s26 }
 0x453   :  { %782 = vrot.lane.b32.xlu0 %v7136_v7, %s6890_s26 }
 0x454   :  { %988 = vrot.lane.b32.xlu1 %v7136_v7, %s6872_s5 }
 0x457   :  { %778 = vrot.lane.b32.xlu0 %v7151_v11, %s6890_s26 }
 0x458   :  { %986 = vrot.lane.b32.xlu1 %v7138_v8, %s6872_s5 }
 0x45b   :  { %982 = vrot.lane.b32.xlu0 %v7125_v60, %s6872_s5 }
 0x45c   :  { %984 = vrot.lane.b32.xlu1 %v7151_v11, %s6872_s5 }
 0x4c4   :  { %v690_v34 = vpop.xlane.xlu1 %689 }
 0x4c5   :  { %6415 = vrcp.f32 %v690_v34 }
 0x4c6   :  { %v687_v35 = vpop.xlane.xlu0 %686 }
 0x4c7   :  { %6417 = vrcp.f32 %v687_v35 }
 0x4c8   :  { %v781_v37 = vpop.permute.xlu1 %780 }
 0x4ca   :  { %v783_v36 = vpop.permute.xlu0 %782 }
 0x4cb   :  { %5748 = vmatprep.subr.msk.mxu0 %vm580_vm1, %v783_v36 }
 0x4cc   :  { %v777_v40 = vpop.permute.xlu1 %776 }
 0x4ce   :  { %v779_v43 = vpop.permute.xlu0 %778 }
 0x4d0   :  { %v989_v44 = vpop.permute.xlu1 %988 }
 0x4d2   :  { %v6416_v38 = vpop.eup %6415  ;;  %v983_v45 = vpop.permute.xlu0 %982 }
 0x4d3   :  { %v694_v42 = vmul.f32 %v6416_v38, %v6412_v30 }
 0x4d4   :  { %v6418_v39 = vpop.eup %6417  ;;  %v987_v46 = vpop.permute.xlu1 %986 }
 0x4d5   :  { %v693_v41 = vmul.f32 %v6418_v39, %v6414_v32 }
 0x4d7   :  { %5745 = vmatprep.mubr.msk.f32.mxu0 %vm672_vm2, %v693_v41 }
 0x4d8   :  { %5746 = vmatmul.mubr.msk.f32.vlgmr.msra.gmra.mxu0 %vm672_vm2, %v694_v42  ;;  %v985_v47 = vpop.permute.xlu1 %984 }
 0x4d9   :  { %5749 = vmatpush3.xpose.msk.msra.mxu0 %vm580_vm1, %v783_v36  ;;  %5752 = vmatprep.mubr.msk.f32.mxu0 %vm580_vm1, %v777_v40 }
 0x4da   :  { %5750 = vmatprep.subr.msk.mxu0 %vm580_vm1, %v781_v37 }
 0x4dd   :  { %5751 = vmatpush3.xpose.msk.msra.mxu0 %vm580_vm1, %v781_v37 }
 0x4de   :  { %5762 = vmatprep.subr.msk.mxu0 %vm580_vm1, %v989_v44 }
 0x4e0   :  { %5753 = vmatmul.mubr.msk.f32.vlgmr.msra.gmra.mxu0 %vm580_vm1, %v779_v43 }
 0x4e1   :  { %5763 = vmatpush3.xpose.msk.msra.mxu0 %vm580_vm1, %v989_v44  ;;  %5766 = vmatprep.mubr.msk.f32.mxu0 %vm580_vm1, %v983_v45 }
 0x4e2   :  { %5764 = vmatprep.subr.msk.mxu0 %vm580_vm1, %v987_v46 }
 0x4e5   :  { %5765 = vmatpush3.xpose.msk.msra.mxu0 %vm580_vm1, %v987_v46 }
 0x4e8   :  { %5767 = vmatmul.mubr.msk.f32.vlgmr.msra.gmra.mxu0 %vm580_vm1, %v985_v47 }
 0x598   :  { %v7207_v48 = vpop.f32.mrf.mxu0 }
 0x59a   :  { %v7209_v49 = vpop.f32.mrf.mxu0 }
 0x5a0   :  { %v5754_v52 = vpop.f32.mrf.mxu0 }
 0x5a1   :  { %v868_v2 = vmul.f32 0.17677669, %v5754_v52 }
 0x5a2   :  { %v858_v53 = vpop.f32.mrf.mxu0 }
 0x5a3   :  { %v870_v3 = vadd.f32 %v868_v2, %v7164_v14  ;;  %v867_v29 = vmul.f32 0.17677669, %v858_v53 }
 0x5a5   :  { %v874_v5 = vsel %vm672_vm2, %v870_v3, -inf  ;;  %v869_v30 = vadd.f32 %v867_v29, %v7169_v17 }
 0x5a7   :  { %v871_v31 = vsel %vm672_vm2, %v869_v30, -inf }
 0x5a8   :  { %v5768_v56 = vpop.f32.mrf.mxu0 }
 0x5a9   :  { %v1074_v57 = vmul.f32 0.17677669, %v5768_v56 }
 0x5aa   :  { %v1064_v58 = vpop.f32.mrf.mxu0 }
 0x5ab   :  { %v1073_v59 = vmul.f32 0.17677669, %v1064_v58  ;;  %v1076_v62 = vadd.f32 %v1074_v57, %v7164_v14 }
 0x5ad   :  { %v1080_v63 = vsel %vm672_vm2, %v1076_v62, -inf  ;;  %v1075_v0 = vadd.f32 %v1073_v59, %v7169_v17 }
 0x5ae   :  { %1081 = vmax.xlane.f32.xlu1 %v1080_v63 }
 0x5af   :  { %v1077_v1 = vsel %vm672_vm2, %v1075_v0, -inf }
 0x5b0   :  { %1078 = vmax.xlane.f32.xlu0 %v1077_v1 }
 0x5bf   :  { %1099 = vrot.lane.b32.xlu1 %v7154_v12, %s6872_s5 }
 0x5c3   :  { %1192 = vrot.lane.b32.xlu1 %v7136_v7, %s6891_s27 }
 0x5c7   :  { %1190 = vrot.lane.b32.xlu1 %v7138_v8, %s6891_s27 }
 0x5cb   :  { %1188 = vrot.lane.b32.xlu1 %v7151_v11, %s6891_s27 }
 0x5ef   :  { %875 = vmax.xlane.f32.xlu1 %v874_v5 }
 0x637   :  { %v1082_v9 = vpop.xlane.xlu1 %1081 }
 0x638   :  { %v1084_v13 = vsub.f32 %v1076_v62, %v1082_v9 }
 0x639   :  { %v1079_v15 = vpop.xlane.xlu0 %1078 }
 0x63a   :  { %v1087_v16 = vmul.f32 1.442695, %v1084_v13  ;;  %v1083_v18 = vsub.f32 %v1075_v0, %v1079_v15 }
 0x63b   :  { %v1100_v21 = vpop.permute.xlu1 %1099 }
 0x63c   :  { %6419 = vpow2.f32 %v1087_v16  ;;  %v1085_v19 = vmul.f32 1.442695, %v1083_v18 }
 0x63e   :  { %6421 = vpow2.f32 %v1085_v19 }
 0x63f   :  { %v1193_v22 = vpop.permute.xlu1 %1192 }
 0x643   :  { %v1191_v23 = vpop.permute.xlu1 %1190 }
 0x647   :  { %v1189_v24 = vpop.permute.xlu1 %1188 }
 0x649   :  { %v6420_v7 = vpop.eup %6419 }
 0x64a   :  { %v1092_v8 = vsel %vm672_vm2, %v6420_v7, 0.0 }
 0x64b   :  { %v6422_v20 = vpop.eup %6421  ;;  %1093 = vadd.xlane.f32.xlu0 %v1092_v8 }
 0x64c   :  { %v1089_v11 = vsel %vm672_vm2, %v6422_v20, 0.0 }
 0x64f   :  { %1090 = vadd.xlane.f32.xlu0 %v1089_v11 }
 0x665   :  { %1101 = vrot.lane.b32.xlu0 %v7147_v10, %s6872_s5 }
 0x669   :  { %1186 = vrot.lane.b32.xlu0 %v7125_v60, %s6891_s27 }
 0x678   :  { %v876_v25 = vpop.xlane.xlu1 %875 }
 0x679   :  { %v878_v26 = vsub.f32 %v870_v3, %v876_v25 }
 0x67b   :  { %v881_v28 = vmul.f32 1.442695, %v878_v26 }
 0x67d   :  { %6423 = vpow2.f32 %v881_v28 }
 0x688   :  { %872 = vmax.xlane.f32.xlu0 %v871_v31  ;;  %v6160_v31 = vld [vmem:[#allocation10 + $0x30] sm:$0xff]  }
 0x68a   :  { %v7233_v32 = vpop.eup %6423 }
 0x68b   :  { %v886_v33 = vsel %vm672_vm2, %v7233_v32, 0.0 }
 0x68c   :  { %887 = vadd.xlane.f32.xlu1 %v886_v33  ;;  %v6162_v33 = vld [vmem:[#allocation10 + $0x20] sm:$0xff]  }
 0x6d4   :  { %v1094_v34 = vpop.xlane.xlu0 %1093 }
 0x6d5   :  { %6425 = vrcp.f32 %v1094_v34  ;;  %v6163_v34 = vld [vmem:[#allocation10 + $0x18] sm:$0xff]  }
 0x6d8   :  { %v1091_v60 = vpop.xlane.xlu0 %1090 }
 0x6d9   :  { %6427 = vrcp.f32 %v1091_v60  ;;  %v6164_v60 = vld [vmem:[#allocation10 + $0x10] sm:$0xff]  }
 0x6dc   :  { %v1102_v35 = vpop.permute.xlu0 %1101 }
 0x6dd   :  { %5769 = vmatprep.subr.mxu0 %v1102_v35 }
 0x6de   :  { %5770 = vmatpush3.msra.mxu0 %v1102_v35  ;;  %v6165_v35 = vld [vmem:[#allocation10 + $0x8] sm:$0xff]  }
 0x6df   :  { %5771 = vmatprep.subr.mxu0 %v1100_v21 }
 0x6e0   :  { %5772 = vmatpush3.msra.mxu0 %v1100_v21  ;;  %v1187_v40 = vpop.permute.xlu0 %1186 }
 0x6e1   :  { %5776 = vmatprep.subr.msk.mxu0 %vm580_vm1, %v1193_v22 }
 0x6e2   :  { %v6426_v36 = vpop.eup %6425 }
 0x6e3   :  { %v1098_v39 = vmul.f32 %v6426_v36, %v6420_v7 }
 0x6e6   :  { %v6428_v37 = vpop.eup %6427 }
 0x6e7   :  { %v1097_v38 = vmul.f32 %v6428_v37, %v6422_v20 }
 0x6e9   :  { %5773 = vmatprep.mubr.msk.f32.mxu0 %vm672_vm2, %v1097_v38 }
 0x6ea   :  { %5774 = vmatmul.mubr.msk.f32.vlgmr.msra.gmra.mxu0 %vm672_vm2, %v1098_v39  ;;  %v6166_v39 = vld [vmem:[#allocation10] sm:$0xff]  }
 0x6eb   :  { %5777 = vmatpush3.xpose.msk.msra.mxu0 %vm580_vm1, %v1193_v22  ;;  %5780 = vmatprep.mubr.msk.f32.mxu0 %vm580_vm1, %v1187_v40 }
 0x6ec   :  { %5778 = vmatprep.subr.msk.mxu0 %vm580_vm1, %v1191_v23 }
 0x6ef   :  { %5779 = vmatpush3.xpose.msk.msra.mxu0 %vm580_vm1, %v1191_v23 }
 0x6f2   :  { %5781 = vmatmul.mubr.msk.f32.vlgmr.msra.gmra.mxu0 %vm580_vm1, %v1189_v24 }
 0x6f3   :  { %1824 = vmatprep.mubr.bf16.mxu0 %v6888_v27 }
 0x711   :  { %v873_v41 = vpop.xlane.xlu0 %872 }
 0x712   :  { %v877_v42 = vsub.f32 %v869_v30, %v873_v41  ;;  %v6159_v30 = vld [vmem:[#allocation10 + $0x38] sm:$0xff]  }
 0x714   :  { %v879_v45 = vmul.f32 1.442695, %v877_v42 }
 0x715   :  { %v888_v8 = vpop.xlane.xlu1 %887 }
 0x716   :  { %6429 = vpow2.f32 %v879_v45 }
 0x723   :  { %v6430_v63 = vpop.eup %6429 }
 0x724   :  { %v883_v0 = vsel %vm672_vm2, %v6430_v63, 0.0 }
 0x7aa   :  { %v5775_v43 = vpop.f32.mrf.mxu0 }
 0x7ac   :  { %v1177_v44 = vpop.f32.mrf.mxu0 }
 0x7ad   :  { %v6101_v46 = vpack.i.bf16 %v5775_v43, %v1177_v44 }
 0x7b2   :  { %v5782_v47 = vpop.f32.mrf.mxu0 }
 0x7b3   :  { %v1278_v53 = vmul.f32 0.17677669, %v5782_v47 }
 0x7b4   :  { %v1268_v52 = vpop.f32.mrf.mxu0 }
 0x7b5   :  { %v1277_v56 = vmul.f32 0.17677669, %v1268_v52  ;;  %v1280_v59 = vadd.f32 %v1278_v53, %v7164_v14 }
 0x7b7   :  { %v1279_v57 = vadd.f32 %v1277_v56, %v7169_v17  ;;  %v1284_v62 = vsel %vm672_vm2, %v1280_v59, -inf }
 0x7b9   :  { %v1281_v58 = vsel %vm672_vm2, %v1279_v57, -inf }
 0x7ba   :  { %1282 = vmax.xlane.f32.xlu0 %v1281_v58 }
 0x7be   :  { %1285 = vmax.xlane.f32.xlu0 %v1284_v62 }
 0x7c2   :  { %884 = vadd.xlane.f32.xlu0 %v883_v0 }
 0x843   :  { %v1283_v1 = vpop.xlane.xlu0 %1282 }
 0x844   :  { %v1287_v2 = vsub.f32 %v1279_v57, %v1283_v1 }
 0x846   :  { %v1289_v3 = vmul.f32 1.442695, %v1287_v2 }
 0x847   :  { %v1286_v5 = vpop.xlane.xlu0 %1285 }
 0x848   :  { %6431 = vpow2.f32 %v1289_v3  ;;  %v1288_v9 = vsub.f32 %v1280_v59, %v1286_v5 }
 0x84a   :  { %v1291_v13 = vmul.f32 1.442695, %v1288_v9 }
 0x84b   :  { %v885_v17 = vpop.xlane.xlu0 %884 }
 0x84c   :  { %6433 = vpow2.f32 %v1291_v13 }
 0x84d   :  { %6435 = vrcp.f32 %v885_v17 }
 0x84e   :  { %6437 = vrcp.f32 %v888_v8 }
 0x855   :  { %v6432_v15 = vpop.eup %6431 }
 0x856   :  { %v1293_v14 = vsel %vm672_vm2, %v6432_v15, 0.0 }
 0x857   :  { %1294 = vadd.xlane.f32.xlu0 %v1293_v14 }
 0x859   :  { %v6434_v16 = vpop.eup %6433 }
 0x85a   :  { %v6436_v18 = vpop.eup %6435  ;;  %v1296_v19 = vsel %vm672_vm2, %v6434_v16, 0.0 }
 0x85b   :  { %1297 = vadd.xlane.f32.xlu1 %v1296_v19  ;;  %v891_v7 = vmul.f32 %v6436_v18, %v6430_v63  ;;  %v6438_v22 = vpop.eup %6437  ;;  %v6169_v18 = vld [vmem:[#allocation13 + $0xe4] ss:$16 sps:$4 sm:$0xff]   ;;  %v6170_v19 = vld [vmem:[#allocation13 + $0xe8] ss:$16 sps:$4 sm:$0xff]  }
 0x85c   :  { %v892_v24 = vmul.f32 %v6438_v22, %v7233_v32  ;;  %v6161_v32 = vld [vmem:[#allocation10 + $0x28] sm:$0xff]   ;;  %1792 = vmatprep.subr.bf16.mxu0 %v6169_v18 }
 0x85d   :  { %5759 = vmatprep.mubr.msk.f32.mxu1 %vm672_vm2, %v891_v7  ;;  %v6172_v7 = vld [vmem:[#allocation13 + $0xec] ss:$16 sps:$4 sm:$0xff]   ;;  %v6217_v18 = vld [vmem:[#allocation16 + $0x38] sm:$0xff]  }
 0x86c   :  { %895 = vrot.lane.b32.xlu1 %v7154_v12, %s6890_s26 }
 0x86d   :  { %897 = vrot.lane.b32.xlu0 %v7147_v10, %s6890_s26 }
 0x870   :  { %1305 = vrot.lane.b32.xlu1 %v7147_v10, %s6891_s27 }
 0x874   :  { %1303 = vrot.lane.b32.xlu1 %v7154_v12, %s6891_s27 }
 0x878   :  { %6102 = vrot.lane.b32.xlu1 %v6101_v46, %s6872_s5 }
 0x8e0   :  { %v1295_v20 = vpop.xlane.xlu0 %1294 }
 0x8e1   :  { %6439 = vrcp.f32 %v1295_v20 }
 0x8e4   :  { %v1298_v11 = vpop.xlane.xlu1 %1297  ;;  %v898_v21 = vpop.permute.xlu0 %897 }
 0x8e5   :  { %6441 = vrcp.f32 %v1298_v11  ;;  %5755 = vmatprep.subr.mxu1 %v898_v21 }
 0x8e6   :  { %5756 = vmatpush3.msra.mxu1 %v898_v21 }
 0x8e8   :  { %v896_v23 = vpop.permute.xlu1 %895 }
 0x8e9   :  { %5757 = vmatprep.subr.mxu1 %v896_v23 }
 0x8ea   :  { %5758 = vmatpush3.msra.mxu1 %v896_v23 }
 0x8eb   :  { %5760 = vmatmul.mubr.msk.f32.vlgmr.msra.gmra.mxu1 %vm672_vm2, %v892_v24  ;;  %v6175_v24 = vld [vmem:[#allocation13 + $0xc4] ss:$16 sps:$4 sm:$0xff]  }
 0x8ec   :  { %v1306_v10 = vpop.permute.xlu1 %1305 }
 0x8ed   :  { %5783 = vmatprep.subr.mxu1 %v1306_v10 }
 0x8ee   :  { %v6440_v12 = vpop.eup %6439  ;;  %5784 = vmatpush3.msra.mxu1 %v1306_v10  ;;  %v6178_v10 = vld [vmem:[#allocation13 + $0xcc] ss:$16 sps:$4 sm:$0xff]  }
 0x8ef   :  { %v1301_v25 = vmul.f32 %v6440_v12, %v6432_v15  ;;  %v6173_v12 = vld [vmem:[#allocation13 + $0xc0] ss:$16 sps:$4 sm:$0xff]  }
 0x8f0   :  { %v1304_v26 = vpop.permute.xlu1 %1303 }
 0x8f1   :  { %5785 = vmatprep.subr.mxu1 %v1304_v26  ;;  %5787 = vmatprep.mubr.msk.f32.mxu1 %vm672_vm2, %v1301_v25  ;;  %v6176_v25 = vld [vmem:[#allocation13 + $0xc8] ss:$16 sps:$4 sm:$0xff]  }
 0x8f2   :  { %v6442_v28 = vpop.eup %6441  ;;  %5786 = vmatpush3.msra.mxu1 %v1304_v26  ;;  %v6181_v26 = vld [vmem:[#allocation13 + $0xa4] ss:$16 sps:$4 sm:$0xff]  }
 0x8f3   :  { %v1302_v29 = vmul.f32 %v6442_v28, %v6434_v16  ;;  %5790 = vmatprep.subr.bf16.mxu1 %v6887_v4  ;;  %v6167_v16 = vld [vmem:[#allocation13 + $0xe0] ss:$16 sps:$4 sm:$0xff]   ;;  %v6184_v28 = vld [vmem:[#allocation13 + $0xac] ss:$16 sps:$4 sm:$0xff]  }
 0x8f4   :  { %v6103_v46 = vpop.permute.xlu1 %6102  ;;  %1793 = vmatpush1.bf16.msra.mxu0 %v6167_v16  ;;  %v6216_v16 = vld [vmem:[#allocation16 + $0xf8] sm:$0xff]  }
 0x8f5   :  { %5788 = vmatmul.mubr.msk.f32.vlgmr.msra.gmra.mxu1 %vm672_vm2, %v1302_v29  ;;  %v6105_v53 = vunpack.i.h.bf16 %v6103_v46  ;;  %v6104_v56 = vunpack.i.l.bf16 %v6103_v46  ;;  %1794 = vmatprep.subr.bf16.mxu0 %v6175_v24  ;;  %v6179_v29 = vld [vmem:[#allocation13 + $0xa0] ss:$16 sps:$4 sm:$0xff]   ;;  %v6211_v46 = vld [vmem:[#allocation13 + $0x4] ss:$16 sps:$4 sm:$0xff]   ;;  %v6228_v24 = vld [vmem:[#allocation16 + $0xe0] sm:$0xff]  }
 0x8f6   :  { %5806 = vmatprep.mubr.msk.bf16.mxu1 %vm6889_vm0, %v6887_v4  ;;  %5791 = vmatpush3.bf16.msra.mxu1 %v6159_v30  ;;  %v6182_v30 = vld [vmem:[#allocation13 + $0xa8] ss:$16 sps:$4 sm:$0xff]  }
 0x8f7   :  { %5792 = vmatprep.subr.bf16.mxu1 %v6887_v4 }
 0x8f8   :  { %1795 = vmatpush1.bf16.msra.mxu0 %v6173_v12  ;;  %v6230_v12 = vld [vmem:[#allocation16 + $0xa0] sm:$0xff]  }
 0x8f9   :  { %1796 = vmatprep.subr.bf16.mxu0 %v6181_v26  ;;  %v6232_v26 = vld [vmem:[#allocation16 + $0xd8] sm:$0xff]  }
 0x8fa   :  { %5793 = vmatpush3.bf16.msra.mxu1 %v6160_v31  ;;  %v6185_v31 = vld [vmem:[#allocation13 + $0x80] ss:$16 sps:$4 sm:$0xff]  }
 0x8fb   :  { %5794 = vmatprep.subr.bf16.mxu1 %v6887_v4 }
 0x8fc   :  { %1797 = vmatpush1.bf16.msra.mxu0 %v6179_v29  ;;  %v6234_v29 = vld [vmem:[#allocation16 + $0x98] sm:$0xff]  }
 0x8fe   :  { %5795 = vmatpush3.bf16.msra.mxu1 %v6161_v32  ;;  %v6187_v32 = vld [vmem:[#allocation13 + $0x84] ss:$16 sps:$4 sm:$0xff]  }
 0x8ff   :  { %5796 = vmatprep.subr.bf16.mxu1 %v6887_v4  ;;  %1798 = vmatprep.subr.bf16.mxu0 %v6187_v32  ;;  %v6237_v32 = vld [vmem:[#allocation16 + $0x10] sm:$0xff]  }
 0x900   :  { %1799 = vmatpush1.bf16.msra.mxu0 %v6185_v31  ;;  %v6236_v31 = vld [vmem:[#allocation16 + $0xd0] sm:$0xff]  }
 0x902   :  { %5797 = vmatpush3.bf16.msra.mxu1 %v6162_v33  ;;  %v6188_v33 = vld [vmem:[#allocation13 + $0x88] ss:$16 sps:$4 sm:$0xff]  }
 0x903   :  { %5798 = vmatprep.subr.bf16.mxu1 %v6887_v4 }
 0x906   :  { %5799 = vmatpush3.bf16.msra.mxu1 %v6163_v34  ;;  %v6190_v34 = vld [vmem:[#allocation13 + $0x8c] ss:$16 sps:$4 sm:$0xff]  }
 0x907   :  { %5800 = vmatprep.subr.bf16.mxu1 %v6887_v4 }
 0x90a   :  { %5801 = vmatpush3.bf16.msra.mxu1 %v6164_v60  ;;  %v6193_v60 = vld [vmem:[#allocation13 + $0x64] ss:$16 sps:$4 sm:$0xff]  }
 0x90b   :  { %5802 = vmatprep.subr.bf16.mxu1 %v6887_v4  ;;  %1800 = vmatprep.subr.bf16.mxu0 %v6193_v60  ;;  %v6240_v60 = vld [vmem:[#allocation16 + $0xc8] sm:$0xff]  }
 0x90e   :  { %5803 = vmatpush3.bf16.msra.mxu1 %v6165_v35  ;;  %v6196_v35 = vld [vmem:[#allocation13 + $0x6c] ss:$16 sps:$4 sm:$0xff]  }
 0x90f   :  { %5804 = vmatprep.subr.bf16.mxu1 %v6887_v4 }
 0x912   :  { %5805 = vmatpush3.bf16.msra.mxu1 %v6166_v39  ;;  %v6202_v39 = vld [vmem:[#allocation13 + $0x4c] ss:$16 sps:$4 sm:$0xff]  }
 0x913   :  { %1835 = vmatprep.subr.bf16.mxu1 %v6172_v7  ;;  %v6219_v7 = vld [vmem:[#allocation16 + $0x70] sm:$0xff]  }
 0x9ab   :  { %v5761_v36 = vpop.f32.mrf.mxu1 }
 0x9ad   :  { %v973_v37 = vpop.f32.mrf.mxu1 }
 0x9ae   :  { %v6096_v38 = vpack.i.bf16 %v5761_v36, %v973_v37  ;;  %v6191_v36 = vld [vmem:[#allocation13 + $0x60] ss:$16 sps:$4 sm:$0xff]   ;;  %v6194_v37 = vld [vmem:[#allocation13 + $0x68] ss:$16 sps:$4 sm:$0xff]  }
 0x9af   :  { %1801 = vmatpush1.bf16.msra.mxu0 %v6191_v36  ;;  %v6242_v36 = vld [vmem:[#allocation16 + $0x88] sm:$0xff]  }
 0x9b0   :  { %6097 = vrot.lane.b32.xlu0 %v6096_v38, %s6891_s27  ;;  %v6199_v38 = vld [vmem:[#allocation13 + $0x44] ss:$16 sps:$4 sm:$0xff]  }
 0x9b1   :  { %1802 = vmatprep.subr.bf16.mxu0 %v6199_v38  ;;  %v6244_v38 = vld [vmem:[#allocation16 + $0xc0] sm:$0xff]  }
 0x9b5   :  { %v5789_v40 = vpop.f32.mrf.mxu1 }
 0x9b7   :  { %v1381_v41 = vpop.f32.mrf.mxu1 }
 0x9b8   :  { %v6106_v42 = vpack.i.bf16 %v5789_v40, %v1381_v41  ;;  %v6197_v40 = vld [vmem:[#allocation13 + $0x40] ss:$16 sps:$4 sm:$0xff]   ;;  %v6200_v41 = vld [vmem:[#allocation13 + $0x48] ss:$16 sps:$4 sm:$0xff]  }
 0x9b9   :  { %1803 = vmatpush1.bf16.msra.mxu0 %v6197_v40  ;;  %v6246_v40 = vld [vmem:[#allocation16 + $0x80] sm:$0xff]  }
 0x9ba   :  { %6107 = vrot.lane.b32.xlu0 %v6106_v42, %s6890_s26  ;;  %v6205_v42 = vld [vmem:[#allocation13 + $0x24] ss:$16 sps:$4 sm:$0xff]  }
 0x9bb   :  { %1804 = vmatprep.subr.bf16.mxu0 %v6205_v42  ;;  %v1626_v42 = vsub.s32 3, %v7119_v54 }
 0xa22   :  { %v6098_v43 = vpop.permute.xlu0 %6097 }
 0xa23   :  { %v6100_v44 = vunpack.i.h.bf16 %v6098_v43  ;;  %v6099_v45 = vunpack.i.l.bf16 %v6098_v43  ;;  %v6208_v43 = vld [vmem:[#allocation13 + $0x2c] ss:$16 sps:$4 sm:$0xff]  }
 0xa25   :  { %v1415_v47 = vsel %vm580_vm1, %v7207_v48, %v6100_v44  ;;  %v1414_v52 = vsel %vm580_vm1, %v7209_v49, %v6099_v45  ;;  %v5169_v48 = vld [vmem:[#allocation11] ss:$0 sm:$0xff]  ;;  %v6203_v44 = vld [vmem:[#allocation13 + $0x20] ss:$16 sps:$4 sm:$0xff]   ;;  %v6206_v45 = vld [vmem:[#allocation13 + $0x28] ss:$16 sps:$4 sm:$0xff]  }
 0xa26   :  { %v1417_v62 = vsel %vm1416_vm3, %v1414_v52, %v6104_v56  ;;  %v1418_v63 = vsel %vm1416_vm3, %v1415_v47, %v6105_v53  ;;  %v6214_v47 = vld [vmem:[#allocation13 + $0xc] ss:$16 sps:$4 sm:$0xff]   ;;  %1805 = vmatpush1.bf16.msra.mxu0 %v6203_v44  ;;  %v6209_v52 = vld [vmem:[#allocation13] ss:$16 sps:$4 sm:$0xff]   ;;  %v6212_v53 = vld [vmem:[#allocation13 + $0x8] ss:$16 sps:$4 sm:$0xff]  }
 0xa27   :  { %1806 = vmatprep.subr.bf16.mxu0 %v6211_v46 }
 0xa2a   :  { %1807 = vmatpush1.bf16.msra.mxu0 %v6209_v52 }
 0xa2c   :  { %v6108_v57 = vpop.permute.xlu0 %6107 }
 0xa2d   :  { %v6110_v58 = vunpack.i.h.bf16 %v6108_v57  ;;  %v6109_v59 = vunpack.i.l.bf16 %v6108_v57 }
 0xa2f   :  { %v1421_v0 = vsel %vm1419_vm4, %v1418_v63, %v6110_v58  ;;  %v1420_v1 = vsel %vm1419_vm4, %v1417_v62, %v6109_v59 }
 0xa30   :  { %v1422_v2 = vpack.c.bf16 %v1421_v0, %v1420_v1 }
 0xa32   :  { %5807 = vmatmul.mubr.bf16.vlgmr.msra.gmra.mxu1 %v1422_v2  ;;  %v5178_v2 = vld [vmem:[%s7963_s21] ss:$0 sm:$0xff] }
 0xa33   :  { %1867 = vmatprep.mubr.bf16.mxu1 %v6888_v27  ;;  %1836 = vmatpush1.bf16.msra.mxu1 %v6170_v19  ;;  %v6218_v19 = vld [vmem:[#allocation16 + $0xb8] sm:$0xff]  }
 0xa34   :  { %1837 = vmatprep.subr.bf16.mxu1 %v6178_v10  ;;  %v6229_v10 = vld [vmem:[#allocation16 + $0x20] sm:$0xff]  }
 0xa37   :  { %1838 = vmatpush1.bf16.msra.mxu1 %v6176_v25  ;;  %v6231_v25 = vld [vmem:[#allocation16 + $0x58] sm:$0xff]  }
 0xa38   :  { %1839 = vmatprep.subr.bf16.mxu1 %v6184_v28  ;;  %v6233_v28 = vld [vmem:[#allocation16 + $0x18] sm:$0xff]  }
 0xa3b   :  { %1840 = vmatpush1.bf16.msra.mxu1 %v6182_v30  ;;  %v6235_v30 = vld [vmem:[#allocation16 + $0x50] sm:$0xff]  }
 0xa3c   :  { %1841 = vmatprep.subr.bf16.mxu1 %v6190_v34  ;;  %v6239_v34 = vld [vmem:[#allocation16 + $0x48] sm:$0xff]  }
 0xa3f   :  { %1842 = vmatpush1.bf16.msra.mxu1 %v6188_v33  ;;  %v6238_v33 = vld [vmem:[#allocation16 + $0x90] sm:$0xff]  }
 0xa40   :  { %1843 = vmatprep.subr.bf16.mxu1 %v6196_v35  ;;  %v6241_v35 = vld [vmem:[#allocation16 + $0x8] sm:$0xff]  }
 0xa43   :  { %1844 = vmatpush1.bf16.msra.mxu1 %v6194_v37  ;;  %v6243_v37 = vld [vmem:[#allocation16 + $0x40] sm:$0xff]  }
 0xa44   :  { %1845 = vmatprep.subr.bf16.mxu1 %v6202_v39  ;;  %v6245_v39 = vld [vmem:[#allocation16] sm:$0xff]  }
 0xa47   :  { %1846 = vmatpush1.bf16.msra.mxu1 %v6200_v41  ;;  %v1610_v41 = vld [vmem:[#allocation14] sm:$0xf] }
 0xa48   :  { %1847 = vmatprep.subr.bf16.mxu1 %v6208_v43  ;;  %v1615_v43 = vrot.slane %v1610_v41, %v7122_v55  ;;  %v1623_v44 = vrot.slane %v1610_v41, %v7134_v6  ;;  %v1627_v46 = vrot.slane %v1610_v41, %v1626_v42 }
 0xa4b   :  { %1848 = vmatpush1.bf16.msra.mxu1 %v6206_v45  ;;  %v1619_v45 = vrot.slane %v1610_v41, %v7128_v61 }
 0xa4c   :  { %1849 = vmatprep.subr.bf16.mxu1 %v6214_v47 }
 0xa4f   :  { %1850 = vmatpush1.bf16.msra.mxu1 %v6212_v53 }
 0xa50   :  { %5526 = vmatprep.subr.bf16.mxu1 %v6216_v16 }
 0xaf2   :  { %v1528_v49 = vpop.f32.mrf.mxu1 }
 0xaf3   :  { %v1529_v3 = vadd.f32 %v5169_v48, %v1528_v49 }
 0xaf4   :  { %v5808_v5 = vpop.f32.mrf.mxu1 }
 0xaf5   :  { %v1535_v9 = vadd.f32 %v1529_v3, %v7113_v50  ;;  %v5179_v5 = vld [vmem:[%s7926_s10] ss:$0 sm:$0xff] }
 0xaf6   :  { %v1531_v13 = vpop.f32.mrf.mxu1 }
 0xaf7   :  { %v1532_v17 = vadd.f32 %v5169_v48, %v1531_v13  ;;  %1539 = vadd.xlane.f32.xlu1 %v1535_v9 }
 0xaf8   :  { %v5809_v15 = vpop.f32.mrf.mxu1 }
 0xaf9   :  { %v1536_v14 = vadd.f32 %v1532_v17, %v7115_v51 }
 0xafb   :  { %1541 = vadd.xlane.f32.xlu0 %v1536_v14 }
 0xb80   :  { %v1540_v8 = vpop.xlane.xlu1 %1539 }
 0xb81   :  { %v1543_v20 = vmul.f32 0.0078125, %v1540_v8  ;;  %v6220_v8 = vld [vmem:[#allocation16 + $0xf0] sm:$0xff]  }
 0xb83   :  { %v7290_v11 = vsub.f32 %v1535_v9, %v1543_v20  ;;  %v6221_v20 = vld [vmem:[#allocation16 + $0x30] sm:$0xff]  }
 0xb84   :  { %v1542_v50 = vpop.xlane.xlu0 %1541 }
 0xb85   :  { %v1544_v21 = vmul.f32 0.0078125, %v1542_v50  ;;  %v1547_v22 = vmul.f32 %v7290_v11, %v7290_v11  ;;  %v6223_v50 = vld [vmem:[#allocation16 + $0x68] sm:$0xff]  }
 0xb87   :  { %v7294_v23 = vsub.f32 %v1536_v14, %v1544_v21  ;;  %1549 = vadd.xlane.f32.xlu0 %v1547_v22  ;;  %v6215_v14 = vld [vmem:[#allocation16 + $0x78] sm:$0xff]   ;;  %v6224_v21 = vld [vmem:[#allocation16 + $0xe8] sm:$0xff]  }
 0xb88   :  { %5504 = vmatprep.subr.bf16.mxu0 %v6215_v14  ;;  %v6225_v22 = vld [vmem:[#allocation16 + $0x28] sm:$0xff]  }
 0xb89   :  { %v1548_v51 = vmul.f32 %v7294_v23, %v7294_v23 }
 0xb8b   :  { %1551 = vadd.xlane.f32.xlu0 %v1548_v51  ;;  %v6227_v51 = vld [vmem:[#allocation16 + $0x60] sm:$0xff]  }
 0xc10   :  { %v1550_v56 = vpop.xlane.xlu0 %1549 }
 0xc11   :  { %v1553_v57 = vmul.f32 0.0078125, %v1550_v56 }
 0xc13   :  { %v1555_v58 = vadd.f32 1e-12, %v1553_v57 }
 0xc14   :  { %v1552_v59 = vpop.xlane.xlu0 %1551 }
 0xc15   :  { %6443 = vrsqrt.f32 %v1555_v58  ;;  %v1554_v62 = vmul.f32 0.0078125, %v1552_v59 }
 0xc17   :  { %v1556_v63 = vadd.f32 1e-12, %v1554_v62 }
 0xc19   :  { %6445 = vrsqrt.f32 %v1556_v63 }
 0xc22   :  { %v6444_v0 = vpop.eup %6443 }
 0xc23   :  { %v1559_v1 = vmul.f32 %v6444_v0, %v7290_v11  ;;  %v6222_v11 = vld [vmem:[#allocation16 + $0xb0] sm:$0xff]  }
 0xc25   :  { %v1567_v3 = vmul.f32 %v5178_v2, %v1559_v1 }
 0xc26   :  { %v6446_v48 = vpop.eup %6445 }
 0xc27   :  { %v1560_v49 = vmul.f32 %v6446_v48, %v7294_v23  ;;  %v7306_v13 = vadd.f32 %v5179_v5, %v1567_v3  ;;  %v6226_v23 = vld [vmem:[#allocation16 + $0xa8] sm:$0xff]  }
 0xc29   :  { %v1568_v9 = vmul.f32 %v5178_v2, %v1560_v49 }
 0xc2b   :  { %v7308_v17 = vadd.f32 %v5179_v5, %v1568_v9 }
 0xc2d   :  { %v1577_v15 = vpack.c.bf16 %v7308_v17, %v7306_v13 }
 0xc2f   :  { %1825 = vmatmul.mubr.bf16.vlgmr.msra.gmra.mxu0 %v1577_v15  ;;  %1868 = vmatmul.mubr.bf16.vlgmr.msra.gmra.mxu1 %v1577_v15 }
 0xc30   :  { %5505 = vmatpush3.bf16.msra.mxu0 %v6217_v18  ;;  %5527 = vmatpush3.bf16.msra.mxu1 %v6218_v19 }
 0xc31   :  { %5506 = vmatprep.subr.bf16.mxu0 %v6219_v7  ;;  %5528 = vmatprep.subr.bf16.mxu1 %v6220_v8 }
 0xc34   :  { %5507 = vmatpush3.bf16.msra.mxu0 %v6221_v20  ;;  %5529 = vmatpush3.bf16.msra.mxu1 %v6222_v11 }
 0xc35   :  { %5508 = vmatprep.subr.bf16.mxu0 %v6223_v50  ;;  %5530 = vmatprep.subr.bf16.mxu1 %v6224_v21 }
 0xc38   :  { %5509 = vmatpush3.bf16.msra.mxu0 %v6225_v22  ;;  %5531 = vmatpush3.bf16.msra.mxu1 %v6226_v23 }
 0xc39   :  { %5510 = vmatprep.subr.bf16.mxu0 %v6227_v51  ;;  %5532 = vmatprep.subr.bf16.mxu1 %v6228_v24 }
 0xc3c   :  { %5511 = vmatpush3.bf16.msra.mxu0 %v6229_v10  ;;  %5533 = vmatpush3.bf16.msra.mxu1 %v6230_v12 }
 0xc3d   :  { %5512 = vmatprep.subr.bf16.mxu0 %v6231_v25  ;;  %5534 = vmatprep.subr.bf16.mxu1 %v6232_v26 }
 0xc40   :  { %5513 = vmatpush3.bf16.msra.mxu0 %v6233_v28  ;;  %5535 = vmatpush3.bf16.msra.mxu1 %v6234_v29 }
 0xc41   :  { %5514 = vmatprep.subr.bf16.mxu0 %v6235_v30  ;;  %5536 = vmatprep.subr.bf16.mxu1 %v6236_v31 }
 0xc44   :  { %5515 = vmatpush3.bf16.msra.mxu0 %v6237_v32  ;;  %5537 = vmatpush3.bf16.msra.mxu1 %v6238_v33 }
 0xc45   :  { %5516 = vmatprep.subr.bf16.mxu0 %v6239_v34  ;;  %5538 = vmatprep.subr.bf16.mxu1 %v6240_v60 }
 0xc48   :  { %5517 = vmatpush3.bf16.msra.mxu0 %v6241_v35  ;;  %5539 = vmatpush3.bf16.msra.mxu1 %v6242_v36 }
 0xc49   :  { %5518 = vmatprep.subr.bf16.mxu0 %v6243_v37  ;;  %5540 = vmatprep.subr.bf16.mxu1 %v6244_v38 }
 0xc4c   :  { %5519 = vmatpush3.bf16.msra.mxu0 %v6245_v39  ;;  %5541 = vmatpush3.bf16.msra.mxu1 %v6246_v40 }
 0xc4d   :  { %5810 = vmatprep.subr.bf16.mxu1 %v6887_v4 }
 0xcef   :  { %v1826_v47 = vpop.f32.mrf.mxu0  ;;  %v1869_v52 = vpop.f32.mrf.mxu1 }
 0xcf0   :  { %v7319_v53 = vadd.f32 %v1826_v47, %v1615_v43  ;;  %v7321_v56 = vadd.f32 %v1869_v52, %v1623_v44 }
 0xcf1   :  { %v1828_v57 = vpop.f32.mrf.mxu0  ;;  %v1871_v58 = vpop.f32.mrf.mxu1 }
 0xcf2   :  { %v1878_v59 = vmul.f32 %v7319_v53, %v7319_v53  ;;  %v1880_v62 = vmul.f32 %v7321_v56, %v7321_v56  ;;  %v7327_v63 = vadd.f32 %v1828_v57, %v1619_v45  ;;  %v7329_v0 = vadd.f32 %v1871_v58, %v1627_v46 }
 0xcf3   :  { %v1830_v1 = vpop.f32.mrf.mxu0  ;;  %v1873_v2 = vpop.f32.mrf.mxu1 }
 0xcf4   :  { %v1886_v48 = vmul.f32 %v1878_v59, %v7319_v53  ;;  %v1888_v49 = vmul.f32 %v1880_v62, %v7321_v56  ;;  %v1879_v3 = vmul.f32 %v7327_v63, %v7327_v63  ;;  %v1881_v5 = vmul.f32 %v7329_v0, %v7329_v0 }
 0xcf5   :  { %v7337_v9 = vadd.f32 %v1830_v1, %v1615_v43  ;;  %v7339_v15 = vadd.f32 %v1873_v2, %v1623_v44  ;;  %v1832_v14 = vpop.f32.mrf.mxu0  ;;  %v1875_v16 = vpop.f32.mrf.mxu1 }
 0xcf6   :  { %v1894_v18 = vmul.f32 0.044715, %v1886_v48  ;;  %v1896_v19 = vmul.f32 0.044715, %v1888_v49  ;;  %v1887_v7 = vmul.f32 %v1879_v3, %v7327_v63  ;;  %v1889_v8 = vmul.f32 %v1881_v5, %v7329_v0 }
 0xcf7   :  { %v1882_v20 = vmul.f32 %v7337_v9, %v7337_v9  ;;  %v1884_v11 = vmul.f32 %v7339_v15, %v7339_v15  ;;  %v7347_v50 = vadd.f32 %v1832_v14, %v1619_v45  ;;  %v7349_v21 = vadd.f32 %v1875_v16, %v1627_v46 }
 0xcf8   :  { %v1902_v22 = vadd.f32 %v1894_v18, %v7319_v53  ;;  %v1904_v23 = vadd.f32 %v1896_v19, %v7321_v56  ;;  %v1895_v51 = vmul.f32 0.044715, %v1887_v7  ;;  %v1897_v24 = vmul.f32 0.044715, %v1889_v8 }
 0xcf9   :  { %v1890_v10 = vmul.f32 %v1882_v20, %v7337_v9  ;;  %v1892_v12 = vmul.f32 %v1884_v11, %v7339_v15  ;;  %v1883_v25 = vmul.f32 %v7347_v50, %v7347_v50  ;;  %v1885_v26 = vmul.f32 %v7349_v21, %v7349_v21 }
 0xcfa   :  { %v1910_v28 = vmul.f32 0.7978846, %v1902_v22  ;;  %v1912_v29 = vmul.f32 0.7978846, %v1904_v23  ;;  %v1903_v30 = vadd.f32 %v1895_v51, %v7327_v63  ;;  %v1905_v31 = vadd.f32 %v1897_v24, %v7329_v0 }
 0xcfb   :  { %v1898_v32 = vmul.f32 0.044715, %v1890_v10  ;;  %v1900_v33 = vmul.f32 0.044715, %v1892_v12  ;;  %v1891_v34 = vmul.f32 %v1883_v25, %v7347_v50  ;;  %v1893_v60 = vmul.f32 %v1885_v26, %v7349_v21 }
 0xcfc   :  { %6447 = vtanh.f32 %v1910_v28  ;;  %v1911_v35 = vmul.f32 0.7978846, %v1903_v30  ;;  %v1913_v36 = vmul.f32 0.7978846, %v1905_v31 }
 0xcfd   :  { %6449 = vtanh.f32 %v1912_v29  ;;  %v1906_v37 = vadd.f32 %v1898_v32, %v7337_v9  ;;  %v1908_v38 = vadd.f32 %v1900_v33, %v7339_v15  ;;  %v1899_v39 = vmul.f32 0.044715, %v1891_v34 }
 0xcfe   :  { %6451 = vtanh.f32 %v1911_v35  ;;  %v1901_v40 = vmul.f32 0.044715, %v1893_v60 }
 0xcff   :  { %6453 = vtanh.f32 %v1913_v36  ;;  %v1914_v41 = vmul.f32 0.7978846, %v1906_v37  ;;  %v1916_v43 = vmul.f32 0.7978846, %v1908_v38  ;;  %v1907_v44 = vadd.f32 %v1899_v39, %v7347_v50 }
 0xd00   :  { %v1909_v45 = vadd.f32 %v1901_v40, %v7349_v21 }
 0xd01   :  { %6455 = vtanh.f32 %v1914_v41  ;;  %v1915_v46 = vmul.f32 0.7978846, %v1907_v44 }
 0xd02   :  { %6457 = vtanh.f32 %v1916_v43  ;;  %v1917_v47 = vmul.f32 0.7978846, %v1909_v45 }
 0xd03   :  { %6459 = vtanh.f32 %v1915_v46 }
 0xd04   :  { %6461 = vtanh.f32 %v1917_v47 }
 0xd09   :  { %v6448_v52 = vpop.eup %6447 }
 0xd0a   :  { %v6450_v57 = vpop.eup %6449  ;;  %v1926_v2 = vadd.f32 1.0, %v6448_v52  ;;  %v6247_v52 = vld [vmem:[#allocation7 + $0x168] ss:$12 sps:$4 sm:$0xff]  }
 0xd0b   :  { %v6452_v58 = vpop.eup %6451  ;;  %v1928_v3 = vadd.f32 1.0, %v6450_v57  ;;  %v6249_v57 = vld [vmem:[#allocation7 + $0x16c] ss:$12 sps:$4 sm:$0xff]  }
 0xd0c   :  { %v6454_v59 = vpop.eup %6453  ;;  %v1927_v62 = vadd.f32 1.0, %v6452_v58  ;;  %v1934_v20 = vmul.f32 0.5, %v1926_v2  ;;  %v6250_v58 = vld [vmem:[#allocation7 + $0x170] ss:$12 sps:$4 sm:$0xff]   ;;  %2521 = vmatprep.subr.bf16.mxu0 %v6249_v57 }
 0xd0d   :  { %v1929_v48 = vadd.f32 1.0, %v6454_v59  ;;  %v1936_v51 = vmul.f32 0.5, %v1928_v3  ;;  %v6253_v3 = vld [vmem:[#allocation7 + $0x154] ss:$12 sps:$4 sm:$0xff]  }
 0xd0e   :  { %v6456_v1 = vpop.eup %6455  ;;  %v1935_v8 = vmul.f32 0.5, %v1927_v62  ;;  %v1942_v29 = vmul.f32 %v1934_v20, %v7319_v53  ;;  %v6262_v20 = vld [vmem:[#allocation7 + $0x128] ss:$12 sps:$4 sm:$0xff]  }
 0xd0f   :  { %v6458_v49 = vpop.eup %6457  ;;  %v1930_v5 = vadd.f32 1.0, %v6456_v1  ;;  %v1937_v23 = vmul.f32 0.5, %v1929_v48  ;;  %v1944_v32 = vmul.f32 %v1936_v51, %v7321_v56  ;;  %v6269_v51 = vld [vmem:[#allocation7 + $0xf4] ss:$12 sps:$4 sm:$0xff]  }
 0xd10   :  { %v6460_v14 = vpop.eup %6459  ;;  %v1932_v16 = vadd.f32 1.0, %v6458_v49  ;;  %v1943_v26 = vmul.f32 %v1935_v8, %v7327_v63  ;;  %v6261_v8 = vld [vmem:[#allocation7 + $0x124] ss:$12 sps:$4 sm:$0xff]  }
 0xd11   :  { %v6462_v18 = vpop.eup %6461  ;;  %v1938_v19 = vmul.f32 0.5, %v1930_v5  ;;  %v1931_v7 = vadd.f32 1.0, %v6460_v14  ;;  %v1945_v30 = vmul.f32 %v1937_v23, %v7329_v0  ;;  %v5212_v0 = vld [vmem:[#allocation17] ss:$0 sm:$0xff]  ;;  %v6254_v14 = vld [vmem:[#allocation7 + $0x158] ss:$12 sps:$4 sm:$0xff]  }
 0xd12   :  { %v1940_v11 = vmul.f32 0.5, %v1932_v16  ;;  %v1933_v22 = vadd.f32 1.0, %v6462_v18  ;;  %v6251_v5 = vld [vmem:[#allocation7 + $0x150] ss:$12 sps:$4 sm:$0xff]   ;;  %v6255_v18 = vld [vmem:[#allocation7 + $0x138] ss:$12 sps:$4 sm:$0xff]  }
 0xd13   :  { %v1939_v24 = vmul.f32 0.5, %v1931_v7  ;;  %v1946_v10 = vmul.f32 %v1938_v19, %v7337_v9  ;;  %v6257_v16 = vld [vmem:[#allocation7 + $0x13c] ss:$12 sps:$4 sm:$0xff]   ;;  %v6258_v19 = vld [vmem:[#allocation7 + $0x140] ss:$12 sps:$4 sm:$0xff]  }
 0xd14   :  { %v1941_v12 = vmul.f32 0.5, %v1933_v22  ;;  %v1948_v25 = vmul.f32 %v1940_v11, %v7339_v15  ;;  %v6259_v7 = vld [vmem:[#allocation7 + $0x120] ss:$12 sps:$4 sm:$0xff]   ;;  %v6263_v22 = vld [vmem:[#allocation7 + $0x108] ss:$12 sps:$4 sm:$0xff]  }
 0xd15   :  { %v1947_v28 = vmul.f32 %v1939_v24, %v7347_v50  ;;  %v1950_v60 = vpack.c.bf16 %v1946_v10, %v1942_v29  ;;  %v6265_v11 = vld [vmem:[#allocation7 + $0x10c] ss:$12 sps:$4 sm:$0xff]   ;;  %v6266_v23 = vld [vmem:[#allocation7 + $0x110] ss:$12 sps:$4 sm:$0xff]  }
 0xd16   :  { %v1949_v31 = vmul.f32 %v1941_v12, %v7349_v21  ;;  %v1952_v9 = vpack.c.bf16 %v1948_v25, %v1944_v32  ;;  %v6267_v24 = vld [vmem:[#allocation7 + $0xf0] ss:$12 sps:$4 sm:$0xff]   ;;  %v6270_v10 = vld [vmem:[#allocation7 + $0xf8] ss:$12 sps:$4 sm:$0xff]   ;;  %v6275_v29 = vld [vmem:[#allocation7 + $0xc0] ss:$12 sps:$4 sm:$0xff]  }
 0xd17   :  { %v1951_v33 = vpack.c.bf16 %v1947_v28, %v1943_v26  ;;  %v6273_v12 = vld [vmem:[#allocation7 + $0xdc] ss:$12 sps:$4 sm:$0xff]   ;;  %v6271_v25 = vld [vmem:[#allocation7 + $0xd8] ss:$12 sps:$4 sm:$0xff]   ;;  %v6274_v26 = vld [vmem:[#allocation7 + $0xe0] ss:$12 sps:$4 sm:$0xff]  }
 0xd18   :  { %v1953_v34 = vpack.c.bf16 %v1949_v31, %v1945_v30  ;;  %v6277_v28 = vld [vmem:[#allocation7 + $0xc4] ss:$12 sps:$4 sm:$0xff]   ;;  %v6278_v30 = vld [vmem:[#allocation7 + $0xc8] ss:$12 sps:$4 sm:$0xff]  }
 0xd19   :  { %2249 = vmatprep.mubr.bf16.mxu0 %v1951_v33 }
 0xd1a   :  { %2290 = vmatprep.mubr.bf16.mxu1 %v1953_v34  ;;  %2250 = vmatmul.mubr.bf16.vlgmr.msra.gmra.mxu0 %v1950_v60 }
 0xd1b   :  { %2291 = vmatmul.mubr.bf16.vlgmr.msra.gmra.mxu1 %v1952_v9  ;;  %2553 = vmatprep.mubr.bf16.mxu0 %v6888_v27 }
 0xd1c   :  { %5826 = vmatprep.mubr.msk.bf16.mxu1 %vm6889_vm0, %v6887_v4  ;;  %5811 = vmatpush3.bf16.msra.mxu1 %v6250_v58 }
 0xd1d   :  { %2522 = vmatpush1.bf16.msra.mxu0 %v6247_v52  ;;  %5812 = vmatprep.subr.bf16.mxu1 %v6887_v4 }
 0xd1e   :  { %2523 = vmatprep.subr.bf16.mxu0 %v6253_v3 }
 0xd20   :  { %5813 = vmatpush3.bf16.msra.mxu1 %v6254_v14 }
 0xd21   :  { %2524 = vmatpush1.bf16.msra.mxu0 %v6251_v5  ;;  %5814 = vmatprep.subr.bf16.mxu1 %v6887_v4 }
 0xd22   :  { %2525 = vmatprep.subr.bf16.mxu0 %v6257_v16  ;;  %v7443_v16 = vld [vmem:[%s7962_s11 + $0x8] sm:$0xff] }
 0xd24   :  { %5815 = vmatpush3.bf16.msra.mxu1 %v6258_v19 }
 0xd25   :  { %2526 = vmatpush1.bf16.msra.mxu0 %v6255_v18  ;;  %5816 = vmatprep.subr.bf16.mxu1 %v6887_v4 }
 0xd26   :  { %2527 = vmatprep.subr.bf16.mxu0 %v6261_v8 }
 0xd28   :  { %5817 = vmatpush3.bf16.msra.mxu1 %v6262_v20 }
 0xd29   :  { %2528 = vmatpush1.bf16.msra.mxu0 %v6259_v7  ;;  %5818 = vmatprep.subr.bf16.mxu1 %v6887_v4  ;;  %v7450_v7 = vld [vmem:[%s7962_s11] sm:$0xff] }
 0xd2a   :  { %2529 = vmatprep.subr.bf16.mxu0 %v6265_v11 }
 0xd2c   :  { %5819 = vmatpush3.bf16.msra.mxu1 %v6266_v23 }
 0xd2d   :  { %2530 = vmatpush1.bf16.msra.mxu0 %v6263_v22  ;;  %5820 = vmatprep.subr.bf16.mxu1 %v6887_v4 }
 0xd2e   :  { %2531 = vmatprep.subr.bf16.mxu0 %v6269_v51 }
 0xd30   :  { %5821 = vmatpush3.bf16.msra.mxu1 %v6270_v10 }
 0xd31   :  { %2532 = vmatpush1.bf16.msra.mxu0 %v6267_v24  ;;  %5822 = vmatprep.subr.bf16.mxu1 %v6887_v4 }
 0xd32   :  { %2533 = vmatprep.subr.bf16.mxu0 %v6273_v12 }
 0xd34   :  { %5823 = vmatpush3.bf16.msra.mxu1 %v6274_v26 }
 0xd35   :  { %2534 = vmatpush1.bf16.msra.mxu0 %v6271_v25  ;;  %5824 = vmatprep.subr.bf16.mxu1 %v6887_v4 }
 0xd36   :  { %2535 = vmatprep.subr.bf16.mxu0 %v6277_v28 }
 0xd38   :  { %5825 = vmatpush3.bf16.msra.mxu1 %v6278_v30 }
 0xd39   :  { %2536 = vmatpush1.bf16.msra.mxu0 %v6275_v29 }
 0xdda   :  { %v5520_v53 = vpop.f32.mrf.mxu0 }
 0xddb   :  { %v5542_v63 = vpop.f32.mrf.mxu1 }
 0xddc   :  { %v5521_v15 = vpop.f32.mrf.mxu0 }
 0xddd   :  { %v5522_v50 = vadd.f32 %v5521_v15, %v5520_v53  ;;  %v5543_v21 = vpop.f32.mrf.mxu1 }
 0xdde   :  { %v5523_v56 = vpop.f32.mrf.mxu0  ;;  %v5544_v36 = vadd.f32 %v5543_v21, %v5542_v63 }
 0xddf   :  { %v2252_v35 = vadd.f32 %v5522_v50, %v5212_v0  ;;  %v5545_v37 = vpop.f32.mrf.mxu1 }
 0xde0   :  { %v5524_v38 = vpop.f32.mrf.mxu0 }
 0xde1   :  { %v2293_v39 = vadd.f32 %v5544_v36, %v2252_v35  ;;  %v5525_v40 = vadd.f32 %v5524_v38, %v5523_v56  ;;  %v5546_v41 = vpop.f32.mrf.mxu1  ;;  %v5246_v56 = vld [vmem:[%s7932_s16] ss:$0 sm:$0xff] }
 0xde2   :  { %v5547_v44 = vadd.f32 %v5546_v41, %v5545_v37 }
 0xde3   :  { %v2255_v43 = vadd.f32 %v5525_v40, %v5212_v0  ;;  %v2299_v45 = vadd.f32 %v2293_v39, %v7306_v13  ;;  %v5245_v0 = vld [vmem:[%s7931_s15] ss:$0 sm:$0xff]  ;;  %v2376_v39 = vld [vmem:[#allocation8 + $0x3] sm:$0x7] }
 0xde4   :  { %v2381_v40 = vrot.slane %v2376_v39, %v7122_v55  ;;  %v2385_v57 = vrot.slane %v2376_v39, %v7128_v61 }
 0xde5   :  { %v2296_v46 = vadd.f32 %v5547_v44, %v2255_v43  ;;  %2303 = vadd.xlane.f32.xlu1 %v2299_v45 }
 0xde7   :  { %v2300_v47 = vadd.f32 %v2296_v46, %v7308_v17 }
 0xde9   :  { %2305 = vadd.xlane.f32.xlu0 %v2300_v47 }
 0xe6e   :  { %v2304_v59 = vpop.xlane.xlu1 %2303 }
 0xe6f   :  { %v2307_v62 = vmul.f32 0.0078125, %v2304_v59 }
 0xe71   :  { %v7381_v1 = vsub.f32 %v2299_v45, %v2307_v62 }
 0xe72   :  { %v2306_v2 = vpop.xlane.xlu0 %2305 }
 0xe73   :  { %v2308_v48 = vmul.f32 0.0078125, %v2306_v2  ;;  %v2311_v13 = vmul.f32 %v7381_v1, %v7381_v1  ;;  %v2389_v2 = vrot.slane %v2376_v39, %v7134_v6 }
 0xe75   :  { %v7385_v49 = vsub.f32 %v2300_v47, %v2308_v48  ;;  %2313 = vadd.xlane.f32.xlu1 %v2311_v13 }
 0xe77   :  { %v2312_v17 = vmul.f32 %v7385_v49, %v7385_v49 }
 0xe79   :  { %2315 = vadd.xlane.f32.xlu0 %v2312_v17 }
 0xefe   :  { %v2314_v31 = vpop.xlane.xlu1 %2313 }
 0xeff   :  { %v2317_v32 = vmul.f32 0.0078125, %v2314_v31 }
 0xf01   :  { %v2319_v33 = vadd.f32 1e-12, %v2317_v32 }
 0xf02   :  { %v2316_v34 = vpop.xlane.xlu0 %2315 }
 0xf03   :  { %6463 = vrsqrt.f32 %v2319_v33  ;;  %v2318_v60 = vmul.f32 0.0078125, %v2316_v34 }
 0xf05   :  { %v2320_v9 = vadd.f32 1e-12, %v2318_v60 }
 0xf07   :  { %6465 = vrsqrt.f32 %v2320_v9 }
 0xf10   :  { %v6464_v53 = vpop.eup %6463 }
 0xf11   :  { %v2323_v63 = vmul.f32 %v6464_v53, %v7381_v1 }
 0xf13   :  { %v2331_v21 = vmul.f32 %v5245_v0, %v2323_v63 }
 0xf14   :  { %v6466_v15 = vpop.eup %6465 }
 0xf15   :  { %v2324_v50 = vmul.f32 %v6466_v15, %v7385_v49  ;;  %v7403_v36 = vadd.f32 %v5246_v56, %v2331_v21 }
 0xf17   :  { %v2332_v35 = vmul.f32 %v5245_v0, %v2324_v50 }
 0xf19   :  { %v7405_v37 = vadd.f32 %v5246_v56, %v2332_v35 }
 0xf1b   :  { %v2341_v38 = vpack.c.bf16 %v7405_v37, %v7403_v36 }
 0xf1d   :  { %2554 = vmatmul.mubr.bf16.vlgmr.msra.gmra.mxu0 %v2341_v38  ;;  %5827 = vmatmul.mubr.bf16.vlgmr.msra.gmra.mxu1 %v2341_v38 }
 0xfdd   :  { %v2555_v41 = vpop.f32.mrf.mxu0  ;;  %v2598_v43 = vpop.f32.mrf.mxu1 }
 0xfde   :  { %v7410_v44 = vadd.f32 %v2555_v41, %v2381_v40  ;;  %v7433_v49 = vadd.f32 %v2598_v43, %v2389_v2 }
 0xfdf   :  { %v2557_v45 = vpop.f32.mrf.mxu0  ;;  %v5828_v46 = vpop.f32.mrf.mxu1 }
 0xfe0   :  { %5834 = vmatprep.mubr.msk.f32.mxu0 %vm580_vm1, %v7410_v44  ;;  %v7417_v1 = vadd.f32 %v2557_v45, %v2385_v57 }
 0xfe1   :  { %v2559_v47 = vpop.f32.mrf.mxu0  ;;  %v2601_v52 = vpop.f32.mrf.mxu1 }
 0xfe2   :  { %v7426_v48 = vadd.f32 %v2601_v52, %v2389_v2  ;;  %v7430_v13 = vadd.f32 %v2559_v47, %v2381_v40 }
 0xfe3   :  { %v2561_v58 = vpop.f32.mrf.mxu0  ;;  %v5829_v59 = vpop.f32.mrf.mxu1 }
 0xfe4   :  { %v7415_v62 = vadd.f32 %v2561_v58, %v2385_v57 }
 0xfe6   :  { %5830 = vmatprep.subr.msk.mxu0 %vm580_vm1, %v7415_v62 }
 0xfe7   :  { %5831 = vmatpush3.xpose.msk.msra.mxu0 %vm580_vm1, %v7415_v62 }
 0xfe8   :  { %5832 = vmatprep.subr.msk.mxu0 %vm580_vm1, %v7417_v1 }
 0xfeb   :  { %5833 = vmatpush3.xpose.msk.msra.mxu0 %vm580_vm1, %v7417_v1 }
 0xfec   :  { %5837 = vmatprep.subr.mxu0 %v7426_v48 }
 0xfee   :  { %5835 = vmatmul.mubr.msk.f32.vlgmr.msra.gmra.mxu0 %vm580_vm1, %v7430_v13 }
 0xfef   :  { %5838 = vmatpush3.msra.mxu0 %v7426_v48 }
 0xff0   :  { %5839 = vmatprep.subr.mxu0 %v7433_v49 }
 0xff1   :  { %5840 = vmatpush3.msra.mxu0 %v7433_v49 }
0x10ae   :  { %v5836_v17 = vpop.f32.mrf.mxu0 }
0x10af   :  { %v2693_v3 = vmul.f32 0.17677669, %v5836_v17 }
0x10b0   :  { %v2683_v5 = vpop.f32.mrf.mxu0 }
0x10b1   :  { %v2692_v14 = vmul.f32 0.17677669, %v2683_v5  ;;  %v2695_v18 = vadd.f32 %v7443_v16, %v2693_v3 }
0x10b3   :  { %v2699_v19 = vsel %vm672_vm2, %v2695_v18, -inf  ;;  %v2694_v8 = vadd.f32 %v7450_v7, %v2692_v14 }
0x10b4   :  { %2700 = vmax.xlane.f32.xlu0 %v2699_v19 }
0x10b5   :  { %v2696_v20 = vsel %vm672_vm2, %v2694_v8, -inf }
0x10b6   :  { %2697 = vmax.xlane.f32.xlu1 %v2696_v20 }
0x10c7   :  { %2805 = vrot.lane.b32.xlu1 %v7415_v62, %s6890_s26 }
0x10cb   :  { %2799 = vrot.lane.b32.xlu1 %v7410_v44, %s6890_s26 }
0x113d   :  { %v2701_v11 = vpop.xlane.xlu0 %2700 }
0x113e   :  { %v2703_v22 = vsub.f32 %v2695_v18, %v2701_v11 }
0x113f   :  { %v2698_v23 = vpop.xlane.xlu1 %2697 }
0x1140   :  { %v2706_v51 = vmul.f32 1.442695, %v2703_v22  ;;  %v2702_v24 = vsub.f32 %v2694_v8, %v2698_v23 }
0x1142   :  { %6467 = vpow2.f32 %v2706_v51  ;;  %v2704_v10 = vmul.f32 1.442695, %v2702_v24 }
0x1143   :  { %v2806_v12 = vpop.permute.xlu1 %2805 }
0x1144   :  { %6469 = vpow2.f32 %v2704_v10  ;;  %5844 = vmatprep.subr.msk.mxu0 %vm580_vm1, %v2806_v12 }
0x1147   :  { %v2800_v30 = vpop.permute.xlu1 %2799 }
0x114f   :  { %v6468_v25 = vpop.eup %6467 }
0x1150   :  { %v2711_v26 = vsel %vm672_vm2, %v6468_v25, 0.0 }
0x1151   :  { %v6470_v28 = vpop.eup %6469  ;;  %2712 = vadd.xlane.f32.xlu0 %v2711_v26 }
0x1152   :  { %v2708_v29 = vsel %vm672_vm2, %v6470_v28, 0.0 }
0x1153   :  { %2709 = vadd.xlane.f32.xlu1 %v2708_v29 }
0x1164   :  { %2801 = vrot.lane.b32.xlu1 %v7430_v13, %s6890_s26 }
0x1167   :  { %2803 = vrot.lane.b32.xlu0 %v7417_v1, %s6890_s26 }
0x11da   :  { %v2713_v31 = vpop.xlane.xlu0 %2712 }
0x11db   :  { %6471 = vrcp.f32 %v2713_v31 }
0x11dc   :  { %v2710_v32 = vpop.xlane.xlu1 %2709 }
0x11dd   :  { %6473 = vrcp.f32 %v2710_v32 }
0x11de   :  { %v2804_v53 = vpop.permute.xlu0 %2803 }
0x11e0   :  { %v2802_v63 = vpop.permute.xlu1 %2801 }
0x11e8   :  { %v6472_v33 = vpop.eup %6471 }
0x11e9   :  { %v2717_v9 = vmul.f32 %v6472_v33, %v6468_v25 }
0x11ea   :  { %v6474_v34 = vpop.eup %6473 }
0x11eb   :  { %v2716_v60 = vmul.f32 %v6474_v34, %v6470_v28 }
0x11ed   :  { %5841 = vmatprep.mubr.msk.f32.mxu0 %vm672_vm2, %v2716_v60 }
0x11ee   :  { %5842 = vmatmul.mubr.msk.f32.vlgmr.msra.gmra.mxu0 %vm672_vm2, %v2717_v9 }
0x11ef   :  { %5845 = vmatpush3.xpose.msk.msra.mxu0 %vm580_vm1, %v2806_v12  ;;  %5848 = vmatprep.mubr.msk.f32.mxu0 %vm580_vm1, %v2800_v30 }
0x11f0   :  { %5846 = vmatprep.subr.msk.mxu0 %vm580_vm1, %v2804_v53 }
0x11f3   :  { %5847 = vmatpush3.xpose.msk.msra.mxu0 %vm580_vm1, %v2804_v53 }
0x11f6   :  { %5849 = vmatmul.mubr.msk.f32.vlgmr.msra.gmra.mxu0 %vm580_vm1, %v2802_v63 }
0x12ae   :  { %v7472_v0 = vpop.f32.mrf.mxu0 }
0x12b0   :  { %v7474_v15 = vpop.f32.mrf.mxu0 }
0x12b6   :  { %v5850_v50 = vpop.f32.mrf.mxu0 }
0x12b7   :  { %v2891_v21 = vmul.f32 0.17677669, %v5850_v50 }
0x12b8   :  { %v2881_v56 = vpop.f32.mrf.mxu0 }
0x12b9   :  { %v2890_v35 = vmul.f32 0.17677669, %v2881_v56  ;;  %v2893_v38 = vadd.f32 %v7443_v16, %v2891_v21 }
0x12bb   :  { %v2897_v39 = vsel %vm672_vm2, %v2893_v38, -inf  ;;  %v2892_v40 = vadd.f32 %v7450_v7, %v2890_v35 }
0x12bc   :  { %2898 = vmax.xlane.f32.xlu0 %v2897_v39 }
0x12bd   :  { %v2894_v41 = vsel %vm672_vm2, %v2892_v40, -inf }
0x12be   :  { %2895 = vmax.xlane.f32.xlu1 %v2894_v41 }
0x12cf   :  { %2920 = vrot.lane.b32.xlu1 %v7426_v48, %s6890_s26 }
0x12d3   :  { %3011 = vrot.lane.b32.xlu1 %v7415_v62, %s6872_s5 }
0x12d7   :  { %3009 = vrot.lane.b32.xlu1 %v7417_v1, %s6872_s5 }
0x12db   :  { %3215 = vrot.lane.b32.xlu1 %v7415_v62, %s6891_s27 }
0x12df   :  { %3007 = vrot.lane.b32.xlu1 %v7430_v13, %s6872_s5 }
0x12e3   :  { %3209 = vrot.lane.b32.xlu1 %v7410_v44, %s6891_s27 }
0x1345   :  { %v2899_v43 = vpop.xlane.xlu0 %2898 }
0x1346   :  { %v2901_v45 = vsub.f32 %v2893_v38, %v2899_v43 }
0x1347   :  { %v2896_v46 = vpop.xlane.xlu1 %2895 }
0x1348   :  { %v2904_v47 = vmul.f32 1.442695, %v2901_v45  ;;  %v2900_v52 = vsub.f32 %v2892_v40, %v2896_v46 }
0x134a   :  { %6475 = vpow2.f32 %v2904_v47  ;;  %v2902_v57 = vmul.f32 1.442695, %v2900_v52 }
0x134b   :  { %v2921_v58 = vpop.permute.xlu1 %2920 }
0x134c   :  { %6477 = vpow2.f32 %v2902_v57  ;;  %5851 = vmatprep.subr.mxu0 %v2921_v58 }
0x134d   :  { %5852 = vmatpush3.msra.mxu0 %v2921_v58 }
0x134f   :  { %v3012_v59 = vpop.permute.xlu1 %3011 }
0x1353   :  { %v3010_v2 = vpop.permute.xlu1 %3009 }
0x1357   :  { %v6476_v62 = vpop.eup %6475  ;;  %v3216_v17 = vpop.permute.xlu1 %3215 }
0x1358   :  { %5872 = vmatprep.subr.msk.mxu1 %vm580_vm1, %v3216_v17  ;;  %v2909_v3 = vsel %vm672_vm2, %v6476_v62, 0.0 }
0x1359   :  { %v6478_v5 = vpop.eup %6477  ;;  %2910 = vadd.xlane.f32.xlu0 %v2909_v3  ;;  %5873 = vmatpush3.xpose.msk.msra.mxu1 %vm580_vm1, %v3216_v17 }
0x135a   :  { %v2906_v18 = vsel %vm672_vm2, %v6478_v5, 0.0 }
0x135b   :  { %v3008_v14 = vpop.permute.xlu1 %3007 }
0x135d   :  { %2907 = vadd.xlane.f32.xlu0 %v2906_v18 }
0x135f   :  { %v3210_v19 = vpop.permute.xlu1 %3209 }
0x1360   :  { %5876 = vmatprep.mubr.msk.f32.mxu1 %vm580_vm1, %v3210_v19 }
0x1373   :  { %2918 = vrot.lane.b32.xlu0 %v7433_v49, %s6890_s26 }
0x1377   :  { %3005 = vrot.lane.b32.xlu0 %v7410_v44, %s6872_s5 }
0x137b   :  { %3213 = vrot.lane.b32.xlu0 %v7417_v1, %s6891_s27 }
0x137f   :  { %3211 = vrot.lane.b32.xlu0 %v7430_v13, %s6891_s27 }
0x13e2   :  { %v2911_v8 = vpop.xlane.xlu0 %2910 }
0x13e3   :  { %6479 = vrcp.f32 %v2911_v8 }
0x13e6   :  { %v2908_v20 = vpop.xlane.xlu0 %2907 }
0x13e7   :  { %6481 = vrcp.f32 %v2908_v20 }
0x13ea   :  { %v2919_v11 = vpop.permute.xlu0 %2918 }
0x13eb   :  { %5853 = vmatprep.subr.mxu0 %v2919_v11 }
0x13ec   :  { %5854 = vmatpush3.msra.mxu0 %v2919_v11 }
0x13ed   :  { %5858 = vmatprep.subr.msk.mxu0 %vm580_vm1, %v3012_v59 }
0x13ee   :  { %v3006_v22 = vpop.permute.xlu0 %3005 }
0x13f0   :  { %v6480_v51 = vpop.eup %6479 }
0x13f1   :  { %v2915_v24 = vmul.f32 %v6480_v51, %v6476_v62 }
0x13f2   :  { %v3214_v23 = vpop.permute.xlu0 %3213 }
0x13f3   :  { %5874 = vmatprep.subr.msk.mxu1 %vm580_vm1, %v3214_v23 }
0x13f4   :  { %v6482_v44 = vpop.eup %6481  ;;  %5875 = vmatpush3.xpose.msk.msra.mxu1 %vm580_vm1, %v3214_v23 }
0x13f5   :  { %v2914_v1 = vmul.f32 %v6482_v44, %v6478_v5  ;;  %5886 = vmatprep.subr.bf16.mxu1 %v6887_v4 }
0x13f6   :  { %v3212_v13 = vpop.permute.xlu0 %3211 }
0x13f7   :  { %5855 = vmatprep.mubr.msk.f32.mxu0 %vm672_vm2, %v2914_v1  ;;  %5877 = vmatmul.mubr.msk.f32.vlgmr.msra.gmra.mxu1 %vm580_vm1, %v3212_v13 }
0x13f8   :  { %5856 = vmatmul.mubr.msk.f32.vlgmr.msra.gmra.mxu0 %vm672_vm2, %v2915_v24  ;;  %5902 = vmatprep.mubr.msk.bf16.mxu1 %vm6889_vm0, %v6887_v4 }
0x13f9   :  { %5859 = vmatpush3.xpose.msk.msra.mxu0 %vm580_vm1, %v3012_v59  ;;  %5862 = vmatprep.mubr.msk.f32.mxu0 %vm580_vm1, %v3006_v22 }
0x13fa   :  { %5860 = vmatprep.subr.msk.mxu0 %vm580_vm1, %v3010_v2 }
0x13fd   :  { %5861 = vmatpush3.xpose.msk.msra.mxu0 %vm580_vm1, %v3010_v2 }
0x1400   :  { %5863 = vmatmul.mubr.msk.f32.vlgmr.msra.gmra.mxu0 %vm580_vm1, %v3008_v14 }
0x14b7   :  { %v5878_v12 = vpop.f32.mrf.mxu1 }
0x14b8   :  { %v5857_v10 = vpop.f32.mrf.mxu0  ;;  %v3301_v60 = vmul.f32 0.17677669, %v5878_v12 }
0x14b9   :  { %v3291_v28 = vpop.f32.mrf.mxu1 }
0x14ba   :  { %v2996_v25 = vpop.f32.mrf.mxu0  ;;  %v3300_v30 = vmul.f32 0.17677669, %v3291_v28  ;;  %v3303_v56 = vadd.f32 %v7443_v16, %v3301_v60  ;;  %v6281_v28 = vld [vmem:[#allocation10 + $0x68] sm:$0xff]  }
0x14bb   :  { %v6111_v26 = vpack.i.bf16 %v5857_v10, %v2996_v25  ;;  %v6279_v25 = vld [vmem:[#allocation10 + $0x78] sm:$0xff]  }
0x14bc   :  { %v3302_v63 = vadd.f32 %v7450_v7, %v3300_v30  ;;  %v3307_v35 = vsel %vm672_vm2, %v3303_v56, -inf  ;;  %5887 = vmatpush3.bf16.msra.mxu1 %v6279_v25  ;;  %v6283_v30 = vld [vmem:[#allocation10 + $0x58] sm:$0xff]  }
0x14bd   :  { %5888 = vmatprep.subr.bf16.mxu1 %v6887_v4  ;;  %v6302_v25 = vld [vmem:[#allocation13 + $0x1a8] ss:$16 sps:$4 sm:$0xff]  }
0x14be   :  { %v3304_v21 = vsel %vm672_vm2, %v3302_v63, -inf }
0x14c0   :  { %v5864_v29 = vpop.f32.mrf.mxu0 }
0x14c1   :  { %v3097_v31 = vmul.f32 0.17677669, %v5864_v29  ;;  %v6282_v29 = vld [vmem:[#allocation10 + $0x60] sm:$0xff]  }
0x14c2   :  { %v3087_v32 = vpop.f32.mrf.mxu0 }
0x14c3   :  { %v3096_v33 = vmul.f32 0.17677669, %v3087_v32  ;;  %v3099_v34 = vadd.f32 %v7443_v16, %v3097_v31  ;;  %v6284_v31 = vld [vmem:[#allocation10 + $0x50] sm:$0xff]   ;;  %v6285_v32 = vld [vmem:[#allocation10 + $0x48] sm:$0xff]  }
0x14c5   :  { %v3103_v9 = vsel %vm672_vm2, %v3099_v34, -inf  ;;  %v3098_v53 = vadd.f32 %v7450_v7, %v3096_v33  ;;  %v6286_v33 = vld [vmem:[#allocation10 + $0x40] sm:$0xff]  }
0x14c6   :  { %3104 = vmax.xlane.f32.xlu0 %v3103_v9 }
0x14c7   :  { %v3100_v50 = vsel %vm672_vm2, %v3098_v53, -inf }
0x14c8   :  { %3101 = vmax.xlane.f32.xlu1 %v3100_v50 }
0x14ca   :  { %3305 = vmax.xlane.f32.xlu0 %v3304_v21 }
0x14ce   :  { %3308 = vmax.xlane.f32.xlu0 %v3307_v35 }
0x154f   :  { %v3105_v38 = vpop.xlane.xlu0 %3104 }
0x1550   :  { %v3107_v41 = vsub.f32 %v3099_v34, %v3105_v38 }
0x1551   :  { %v3102_v62 = vpop.xlane.xlu1 %3101 }
0x1552   :  { %v3110_v46 = vmul.f32 1.442695, %v3107_v41  ;;  %v3106_v17 = vsub.f32 %v3098_v53, %v3102_v62 }
0x1553   :  { %v3306_v39 = vpop.xlane.xlu0 %3305 }
0x1554   :  { %v3310_v40 = vsub.f32 %v3302_v63, %v3306_v39  ;;  %v3108_v3 = vmul.f32 1.442695, %v3106_v17 }
0x1556   :  { %v3312_v43 = vmul.f32 1.442695, %v3310_v40 }
0x1557   :  { %v3309_v45 = vpop.xlane.xlu0 %3308 }
0x1558   :  { %6483 = vpow2.f32 %v3312_v43  ;;  %v3311_v7 = vsub.f32 %v3303_v56, %v3309_v45 }
0x155a   :  { %v3314_v47 = vmul.f32 1.442695, %v3311_v7 }
0x155c   :  { %6485 = vpow2.f32 %v3314_v47 }
0x155d   :  { %6487 = vpow2.f32 %v3110_v46 }
0x155e   :  { %6489 = vpow2.f32 %v3108_v3 }
0x1565   :  { %v6484_v52 = vpop.eup %6483 }
0x1566   :  { %v3316_v57 = vsel %vm672_vm2, %v6484_v52, 0.0 }
0x1567   :  { %3317 = vadd.xlane.f32.xlu1 %v3316_v57 }
0x1569   :  { %v6486_v16 = vpop.eup %6485 }
0x156a   :  { %v3319_v58 = vsel %vm672_vm2, %v6486_v16, 0.0  ;;  %v6488_v59 = vpop.eup %6487 }
0x156b   :  { %3320 = vadd.xlane.f32.xlu0 %v3319_v58  ;;  %v3115_v2 = vsel %vm672_vm2, %v6488_v59, 0.0  ;;  %v6490_v5 = vpop.eup %6489 }
0x156c   :  { %v3112_v14 = vsel %vm672_vm2, %v6490_v5, 0.0 }
0x156f   :  { %3116 = vadd.xlane.f32.xlu0 %v3115_v2 }
0x1578   :  { %3124 = vrot.lane.b32.xlu1 %v7426_v48, %s6872_s5 }
0x157c   :  { %3328 = vrot.lane.b32.xlu1 %v7426_v48, %s6891_s27 }
0x1585   :  { %3122 = vrot.lane.b32.xlu0 %v7433_v49, %s6872_s5 }
0x15a0   :  { %3113 = vadd.xlane.f32.xlu1 %v3112_v14 }
0x15b1   :  { %3326 = vrot.lane.b32.xlu1 %v7433_v49, %s6891_s27 }
0x15b5   :  { %6112 = vrot.lane.b32.xlu1 %v6111_v26, %s6891_s27  ;;  %v6280_v26 = vld [vmem:[#allocation10 + $0x70] sm:$0xff]  }
0x15b6   :  { %5889 = vmatpush3.bf16.msra.mxu1 %v6280_v26  ;;  %v6305_v26 = vld [vmem:[#allocation13 + $0x180] ss:$16 sps:$4 sm:$0xff]  }
0x15b7   :  { %5890 = vmatprep.subr.bf16.mxu1 %v6887_v4 }
0x15ba   :  { %5891 = vmatpush3.bf16.msra.mxu1 %v6281_v28  ;;  %v6307_v28 = vld [vmem:[#allocation13 + $0x184] ss:$16 sps:$4 sm:$0xff]  }
0x15bb   :  { %5892 = vmatprep.subr.bf16.mxu1 %v6887_v4 }
0x15be   :  { %5893 = vmatpush3.bf16.msra.mxu1 %v6282_v29  ;;  %v6308_v29 = vld [vmem:[#allocation13 + $0x188] ss:$16 sps:$4 sm:$0xff]  }
0x15bf   :  { %5894 = vmatprep.subr.bf16.mxu1 %v6887_v4 }
0x15c2   :  { %5895 = vmatpush3.bf16.msra.mxu1 %v6283_v30  ;;  %v6310_v30 = vld [vmem:[#allocation13 + $0x18c] ss:$16 sps:$4 sm:$0xff]  }
0x15c3   :  { %5896 = vmatprep.subr.bf16.mxu1 %v6887_v4 }
0x15c6   :  { %5897 = vmatpush3.bf16.msra.mxu1 %v6284_v31  ;;  %v6313_v31 = vld [vmem:[#allocation13 + $0x164] ss:$16 sps:$4 sm:$0xff]  }
0x15c7   :  { %5898 = vmatprep.subr.bf16.mxu1 %v6887_v4 }
0x15ca   :  { %5899 = vmatpush3.bf16.msra.mxu1 %v6285_v32  ;;  %v6316_v32 = vld [vmem:[#allocation13 + $0x16c] ss:$16 sps:$4 sm:$0xff]  }
0x15cb   :  { %5900 = vmatprep.subr.bf16.mxu1 %v6887_v4 }
0x15ce   :  { %5901 = vmatpush3.bf16.msra.mxu1 %v6286_v33  ;;  %v6311_v33 = vld [vmem:[#allocation13 + $0x160] ss:$16 sps:$4 sm:$0xff]  }
0x15f0   :  { %v3318_v18 = vpop.xlane.xlu1 %3317 }
0x15f1   :  { %6491 = vrcp.f32 %v3318_v18  ;;  %v6287_v18 = vld [vmem:[#allocation13 + $0x1e0] ss:$16 sps:$4 sm:$0xff]  }
0x15f4   :  { %v3321_v19 = vpop.xlane.xlu0 %3320  ;;  %v3125_v8 = vpop.permute.xlu1 %3124 }
0x15f5   :  { %5865 = vmatprep.subr.mxu0 %v3125_v8 }
0x15f6   :  { %5866 = vmatpush3.msra.mxu0 %v3125_v8  ;;  %v6290_v8 = vld [vmem:[#allocation13 + $0x1e8] ss:$16 sps:$4 sm:$0xff]  }
0x15f8   :  { %v3117_v48 = vpop.xlane.xlu0 %3116  ;;  %v3329_v11 = vpop.permute.xlu1 %3328 }
0x15f9   :  { %6493 = vrcp.f32 %v3117_v48  ;;  %v6292_v48 = vld [vmem:[#allocation13 + $0x1ec] ss:$16 sps:$4 sm:$0xff]  }
0x15fa   :  { %3862 = vmatprep.subr.bf16.mxu1 %v6292_v48  ;;  %v6339_v48 = vld [vmem:[#allocation16 + $0x170] sm:$0xff]  }
0x15fc   :  { %v3123_v20 = vpop.permute.xlu0 %3122 }
0x15fd   :  { %5867 = vmatprep.subr.mxu0 %v3123_v20 }
0x15fe   :  { %5868 = vmatpush3.msra.mxu0 %v3123_v20  ;;  %v6492_v23 = vpop.eup %6491 }
0x15ff   :  { %5879 = vmatprep.subr.mxu0 %v3329_v11  ;;  %v3324_v24 = vmul.f32 %v6492_v23, %v6484_v52 }
0x1606   :  { %v6494_v49 = vpop.eup %6493 }
0x1607   :  { %v3121_v1 = vmul.f32 %v6494_v49, %v6488_v59  ;;  %v5295_v59 = vld [vmem:[#allocation11 + $0x1] ss:$0 sm:$0xff] }
0x1629   :  { %v3114_v22 = vpop.xlane.xlu1 %3113 }
0x162a   :  { %6495 = vrcp.f32 %v3114_v22 }
0x162b   :  { %6497 = vrcp.f32 %v3321_v19  ;;  %v6289_v19 = vld [vmem:[#allocation13 + $0x1e4] ss:$16 sps:$4 sm:$0xff]  }
0x162d   :  { %v3327_v10 = vpop.permute.xlu1 %3326 }
0x1631   :  { %v6113_v21 = vpop.permute.xlu1 %6112 }
0x1632   :  { %v6115_v35 = vunpack.i.h.bf16 %v6113_v21  ;;  %v6114_v38 = vunpack.i.l.bf16 %v6113_v21  ;;  %v6328_v21 = vld [vmem:[#allocation13 + $0x12c] ss:$16 sps:$4 sm:$0xff]  }
0x1634   :  { %v3438_v43 = vsel %vm580_vm1, %v7472_v0, %v6115_v35  ;;  %v3437_v45 = vsel %vm580_vm1, %v7474_v15, %v6114_v38  ;;  %v6326_v35 = vld [vmem:[#allocation13 + $0x128] ss:$16 sps:$4 sm:$0xff]   ;;  %v6331_v38 = vld [vmem:[#allocation13 + $0x104] ss:$16 sps:$4 sm:$0xff]  }
0x1637   :  { %v6496_v51 = vpop.eup %6495 }
0x1638   :  { %v3120_v44 = vmul.f32 %v6496_v51, %v6490_v5  ;;  %v6498_v13 = vpop.eup %6497  ;;  %v6295_v51 = vld [vmem:[#allocation13 + $0x1c4] ss:$16 sps:$4 sm:$0xff]  }
0x1639   :  { %v3325_v12 = vmul.f32 %v6498_v13, %v6486_v16  ;;  %v6296_v13 = vld [vmem:[#allocation13 + $0x1c8] ss:$16 sps:$4 sm:$0xff]  }
0x163a   :  { %5869 = vmatprep.mubr.msk.f32.mxu0 %vm672_vm2, %v3120_v44  ;;  %v6298_v44 = vld [vmem:[#allocation13 + $0x1cc] ss:$16 sps:$4 sm:$0xff]  }
0x163b   :  { %5870 = vmatmul.mubr.msk.f32.vlgmr.msra.gmra.mxu0 %vm672_vm2, %v3121_v1  ;;  %v6293_v1 = vld [vmem:[#allocation13 + $0x1c0] ss:$16 sps:$4 sm:$0xff]  }
0x163c   :  { %5880 = vmatpush3.msra.mxu0 %v3329_v11  ;;  %5883 = vmatprep.mubr.msk.f32.mxu0 %vm672_vm2, %v3324_v24  ;;  %v6301_v24 = vld [vmem:[#allocation13 + $0x1a4] ss:$16 sps:$4 sm:$0xff]  }
0x163d   :  { %5881 = vmatprep.subr.mxu0 %v3327_v10 }
0x163e   :  { %5882 = vmatpush3.msra.mxu0 %v3327_v10  ;;  %v6304_v10 = vld [vmem:[#allocation13 + $0x1ac] ss:$16 sps:$4 sm:$0xff]  }
0x163f   :  { %5884 = vmatmul.mubr.msk.f32.vlgmr.msra.gmra.mxu0 %vm672_vm2, %v3325_v12  ;;  %3819 = vmatprep.subr.bf16.mxu0 %v6289_v19  ;;  %v6299_v12 = vld [vmem:[#allocation13 + $0x1a0] ss:$16 sps:$4 sm:$0xff]  }
0x1640   :  { %3851 = vmatprep.mubr.bf16.mxu0 %v6888_v27  ;;  %3820 = vmatpush1.bf16.msra.mxu0 %v6287_v18  ;;  %v6336_v18 = vld [vmem:[#allocation16 + $0x1f8] sm:$0xff]  }
0x1641   :  { %3821 = vmatprep.subr.bf16.mxu0 %v6295_v51  ;;  %v6337_v19 = vld [vmem:[#allocation16 + $0x138] sm:$0xff]   ;;  %v6348_v51 = vld [vmem:[#allocation16 + $0x1e0] sm:$0xff]  }
0x1644   :  { %3822 = vmatpush1.bf16.msra.mxu0 %v6293_v1  ;;  %v6350_v1 = vld [vmem:[#allocation16 + $0x1a0] sm:$0xff]  }
0x1645   :  { %3823 = vmatprep.subr.bf16.mxu0 %v6301_v24  ;;  %v6352_v24 = vld [vmem:[#allocation16 + $0x1d8] sm:$0xff]  }
0x1648   :  { %3824 = vmatpush1.bf16.msra.mxu0 %v6299_v12  ;;  %v6354_v12 = vld [vmem:[#allocation16 + $0x198] sm:$0xff]  }
0x1649   :  { %3825 = vmatprep.subr.bf16.mxu0 %v6307_v28  ;;  %v6357_v28 = vld [vmem:[#allocation16 + $0x110] sm:$0xff]  }
0x164c   :  { %3826 = vmatpush1.bf16.msra.mxu0 %v6305_v26  ;;  %v6356_v26 = vld [vmem:[#allocation16 + $0x1d0] sm:$0xff]  }
0x164d   :  { %3827 = vmatprep.subr.bf16.mxu0 %v6313_v31  ;;  %v6360_v31 = vld [vmem:[#allocation16 + $0x1c8] sm:$0xff]  }
0x1650   :  { %3828 = vmatpush1.bf16.msra.mxu0 %v6311_v33  ;;  %v6362_v33 = vld [vmem:[#allocation16 + $0x188] sm:$0xff]  }
0x16fb   :  { %v5871_v34 = vpop.f32.mrf.mxu0 }
0x16fd   :  { %v3200_v60 = vpop.f32.mrf.mxu0 }
0x16fe   :  { %v6116_v9 = vpack.i.bf16 %v5871_v34, %v3200_v60  ;;  %v6314_v34 = vld [vmem:[#allocation13 + $0x168] ss:$16 sps:$4 sm:$0xff]   ;;  %v6319_v60 = vld [vmem:[#allocation13 + $0x144] ss:$16 sps:$4 sm:$0xff]  }
0x16ff   :  { %v5885_v53 = vpop.f32.mrf.mxu0  ;;  %3829 = vmatprep.subr.bf16.mxu0 %v6319_v60  ;;  %v6364_v60 = vld [vmem:[#allocation16 + $0x1c0] sm:$0xff]  }
0x1700   :  { %6117 = vrot.lane.b32.xlu0 %v6116_v9, %s6872_s5  ;;  %v6322_v9 = vld [vmem:[#allocation13 + $0x14c] ss:$16 sps:$4 sm:$0xff]  }
0x1701   :  { %v3404_v63 = vpop.f32.mrf.mxu0 }
0x1702   :  { %v6121_v50 = vpack.i.bf16 %v5885_v53, %v3404_v63  ;;  %v6317_v53 = vld [vmem:[#allocation13 + $0x140] ss:$16 sps:$4 sm:$0xff]   ;;  %v6320_v63 = vld [vmem:[#allocation13 + $0x148] ss:$16 sps:$4 sm:$0xff]  }
0x1703   :  { %3830 = vmatpush1.bf16.msra.mxu0 %v6317_v53  ;;  %v6366_v53 = vld [vmem:[#allocation16 + $0x180] sm:$0xff]  }
0x1704   :  { %6122 = vrot.lane.b32.xlu1 %v6121_v50, %s6890_s26  ;;  %v6325_v50 = vld [vmem:[#allocation13 + $0x124] ss:$16 sps:$4 sm:$0xff]  }
0x1705   :  { %3831 = vmatprep.subr.bf16.mxu0 %v6325_v50 }
0x1772   :  { %v6118_v56 = vpop.permute.xlu0 %6117 }
0x1773   :  { %v6120_v39 = vunpack.i.h.bf16 %v6118_v56  ;;  %v6119_v40 = vunpack.i.l.bf16 %v6118_v56  ;;  %v6323_v56 = vld [vmem:[#allocation13 + $0x120] ss:$16 sps:$4 sm:$0xff]  }
0x1774   :  { %3832 = vmatpush1.bf16.msra.mxu0 %v6323_v56 }
0x1775   :  { %v3439_v47 = vsel %vm1416_vm3, %v3437_v45, %v6119_v40  ;;  %v3440_v52 = vsel %vm1416_vm3, %v3438_v43, %v6120_v39  ;;  %v6334_v39 = vld [vmem:[#allocation13 + $0x10c] ss:$16 sps:$4 sm:$0xff]   ;;  %v6329_v40 = vld [vmem:[#allocation13 + $0x100] ss:$16 sps:$4 sm:$0xff]   ;;  %3833 = vmatprep.subr.bf16.mxu0 %v6331_v38 }
0x1776   :  { %v6123_v41 = vpop.permute.xlu1 %6122 }
0x1777   :  { %v6125_v7 = vunpack.i.h.bf16 %v6123_v41  ;;  %v6124_v46 = vunpack.i.l.bf16 %v6123_v41  ;;  %v6332_v41 = vld [vmem:[#allocation13 + $0x108] ss:$16 sps:$4 sm:$0xff]  }
0x1778   :  { %3834 = vmatpush1.bf16.msra.mxu0 %v6329_v40 }
0x1779   :  { %v3441_v57 = vsel %vm1419_vm4, %v3439_v47, %v6124_v46  ;;  %v3442_v16 = vsel %vm1419_vm4, %v3440_v52, %v6125_v7 }
0x177a   :  { %v3443_v58 = vpack.c.bf16 %v3442_v16, %v3441_v57 }
0x177c   :  { %5903 = vmatmul.mubr.bf16.vlgmr.msra.gmra.mxu1 %v3443_v58  ;;  %v5306_v58 = vld [vmem:[%s7963_s21 + $0x1] ss:$0 sm:$0xff] }
0x177d   :  { %3894 = vmatprep.mubr.bf16.mxu1 %v6888_v27  ;;  %3863 = vmatpush1.bf16.msra.mxu1 %v6290_v8  ;;  %v6338_v8 = vld [vmem:[#allocation16 + $0x1b8] sm:$0xff]  }
0x177e   :  { %3864 = vmatprep.subr.bf16.mxu1 %v6298_v44  ;;  %v6349_v44 = vld [vmem:[#allocation16 + $0x120] sm:$0xff]  }
0x1781   :  { %3865 = vmatpush1.bf16.msra.mxu1 %v6296_v13  ;;  %v6351_v13 = vld [vmem:[#allocation16 + $0x158] sm:$0xff]  }
0x1782   :  { %3866 = vmatprep.subr.bf16.mxu1 %v6304_v10  ;;  %v6353_v10 = vld [vmem:[#allocation16 + $0x118] sm:$0xff]  }
0x1785   :  { %3867 = vmatpush1.bf16.msra.mxu1 %v6302_v25  ;;  %v6355_v25 = vld [vmem:[#allocation16 + $0x150] sm:$0xff]  }
0x1786   :  { %3868 = vmatprep.subr.bf16.mxu1 %v6310_v30  ;;  %v6359_v30 = vld [vmem:[#allocation16 + $0x148] sm:$0xff]  }
0x1789   :  { %3869 = vmatpush1.bf16.msra.mxu1 %v6308_v29  ;;  %v6358_v29 = vld [vmem:[#allocation16 + $0x190] sm:$0xff]  }
0x178a   :  { %3870 = vmatprep.subr.bf16.mxu1 %v6316_v32  ;;  %v6361_v32 = vld [vmem:[#allocation16 + $0x108] sm:$0xff]  }
0x178d   :  { %3871 = vmatpush1.bf16.msra.mxu1 %v6314_v34  ;;  %v6363_v34 = vld [vmem:[#allocation16 + $0x140] sm:$0xff]  }
0x178e   :  { %3872 = vmatprep.subr.bf16.mxu1 %v6322_v9  ;;  %v6365_v9 = vld [vmem:[#allocation16 + $0x100] sm:$0xff]  }
0x1791   :  { %3873 = vmatpush1.bf16.msra.mxu1 %v6320_v63  ;;  %v3637_v63 = vld [vmem:[#allocation14 + $0x4] sm:$0xf] }
0x1792   :  { %3874 = vmatprep.subr.bf16.mxu1 %v6328_v21  ;;  %v3642_v50 = vrot.slane %v3637_v63, %v7122_v55  ;;  %v3650_v21 = vrot.slane %v3637_v63, %v7134_v6  ;;  %v3646_v56 = vrot.slane %v3637_v63, %v7128_v61 }
0x1795   :  { %3875 = vmatpush1.bf16.msra.mxu1 %v6326_v35  ;;  %v3654_v35 = vrot.slane %v3637_v63, %v1626_v42 }
0x1796   :  { %3876 = vmatprep.subr.bf16.mxu1 %v6334_v39 }
0x1799   :  { %3877 = vmatpush1.bf16.msra.mxu1 %v6332_v41 }
0x179a   :  { %5620 = vmatprep.subr.bf16.mxu1 %v6336_v18 }
0x183c   :  { %v3551_v2 = vpop.f32.mrf.mxu1 }
0x183d   :  { %v3552_v0 = vadd.f32 %v5295_v59, %v3551_v2 }
0x183e   :  { %v5904_v62 = vpop.f32.mrf.mxu1 }
0x183f   :  { %v3558_v15 = vadd.f32 %v3552_v0, %v7403_v36  ;;  %v5307_v62 = vld [vmem:[%s7926_s10 + $0x1] ss:$0 sm:$0xff] }
0x1840   :  { %v3554_v17 = vpop.f32.mrf.mxu1 }
0x1841   :  { %v3555_v3 = vadd.f32 %v5295_v59, %v3554_v17  ;;  %3564 = vadd.xlane.f32.xlu0 %v3558_v15 }
0x1842   :  { %v5905_v5 = vpop.f32.mrf.mxu1 }
0x1843   :  { %v3559_v14 = vadd.f32 %v3555_v3, %v7405_v37 }
0x1845   :  { %3566 = vadd.xlane.f32.xlu1 %v3559_v14 }
0x18ca   :  { %v3565_v27 = vpop.xlane.xlu0 %3564 }
0x18cb   :  { %v3568_v20 = vmul.f32 0.0078125, %v3565_v27  ;;  %v6340_v27 = vld [vmem:[#allocation16 + $0x1f0] sm:$0xff]  }
0x18cd   :  { %v7565_v11 = vsub.f32 %v3558_v15, %v3568_v20  ;;  %v6341_v20 = vld [vmem:[#allocation16 + $0x130] sm:$0xff]  }
0x18ce   :  { %v3567_v36 = vpop.xlane.xlu1 %3566 }
0x18cf   :  { %v3569_v22 = vmul.f32 0.0078125, %v3567_v36  ;;  %v3572_v23 = vmul.f32 %v7565_v11, %v7565_v11  ;;  %v6343_v36 = vld [vmem:[#allocation16 + $0x168] sm:$0xff]  }
0x18d1   :  { %v7569_v49 = vsub.f32 %v3559_v14, %v3569_v22  ;;  %3574 = vadd.xlane.f32.xlu0 %v3572_v23  ;;  %v6335_v14 = vld [vmem:[#allocation16 + $0x178] sm:$0xff]   ;;  %v6344_v22 = vld [vmem:[#allocation16 + $0x1e8] sm:$0xff]  }
0x18d2   :  { %5598 = vmatprep.subr.bf16.mxu0 %v6335_v14  ;;  %v6345_v23 = vld [vmem:[#allocation16 + $0x128] sm:$0xff]  }
0x18d3   :  { %v3573_v37 = vmul.f32 %v7569_v49, %v7569_v49 }
0x18d5   :  { %3576 = vadd.xlane.f32.xlu0 %v3573_v37  ;;  %v6347_v37 = vld [vmem:[#allocation16 + $0x160] sm:$0xff]  }
0x195a   :  { %v3575_v43 = vpop.xlane.xlu0 %3574 }
0x195b   :  { %v3578_v45 = vmul.f32 0.0078125, %v3575_v43 }
0x195d   :  { %v3580_v7 = vadd.f32 1e-12, %v3578_v45 }
0x195e   :  { %v3577_v46 = vpop.xlane.xlu0 %3576 }
0x195f   :  { %6499 = vrsqrt.f32 %v3580_v7  ;;  %v3579_v47 = vmul.f32 0.0078125, %v3577_v46 }
0x1961   :  { %v3581_v52 = vadd.f32 1e-12, %v3579_v47 }
0x1963   :  { %6501 = vrsqrt.f32 %v3581_v52 }
0x196c   :  { %v6500_v57 = vpop.eup %6499 }
0x196d   :  { %v3584_v16 = vmul.f32 %v6500_v57, %v7565_v11  ;;  %v6342_v11 = vld [vmem:[#allocation16 + $0x1b0] sm:$0xff]  }
0x196f   :  { %v3592_v0 = vmul.f32 %v5306_v58, %v3584_v16 }
0x1970   :  { %v6502_v59 = vpop.eup %6501 }
0x1971   :  { %v3585_v2 = vmul.f32 %v6502_v59, %v7569_v49  ;;  %v7581_v17 = vadd.f32 %v5307_v62, %v3592_v0  ;;  %v6346_v49 = vld [vmem:[#allocation16 + $0x1a8] sm:$0xff]  }
0x1973   :  { %v3593_v15 = vmul.f32 %v5306_v58, %v3585_v2 }
0x1975   :  { %v7583_v3 = vadd.f32 %v5307_v62, %v3593_v15 }
0x1977   :  { %v3602_v5 = vpack.c.bf16 %v7583_v3, %v7581_v17 }
0x1979   :  { %3852 = vmatmul.mubr.bf16.vlgmr.msra.gmra.mxu0 %v3602_v5  ;;  %3895 = vmatmul.mubr.bf16.vlgmr.msra.gmra.mxu1 %v3602_v5 }
0x197a   :  { %5599 = vmatpush3.bf16.msra.mxu0 %v6337_v19  ;;  %5621 = vmatpush3.bf16.msra.mxu1 %v6338_v8 }
0x197b   :  { %5600 = vmatprep.subr.bf16.mxu0 %v6339_v48  ;;  %5622 = vmatprep.subr.bf16.mxu1 %v6340_v27 }
0x197e   :  { %5601 = vmatpush3.bf16.msra.mxu0 %v6341_v20  ;;  %5623 = vmatpush3.bf16.msra.mxu1 %v6342_v11 }
0x197f   :  { %5602 = vmatprep.subr.bf16.mxu0 %v6343_v36  ;;  %5624 = vmatprep.subr.bf16.mxu1 %v6344_v22 }
0x1982   :  { %5603 = vmatpush3.bf16.msra.mxu0 %v6345_v23  ;;  %5625 = vmatpush3.bf16.msra.mxu1 %v6346_v49 }
0x1983   :  { %5604 = vmatprep.subr.bf16.mxu0 %v6347_v37  ;;  %5626 = vmatprep.subr.bf16.mxu1 %v6348_v51 }
0x1986   :  { %5605 = vmatpush3.bf16.msra.mxu0 %v6349_v44  ;;  %5627 = vmatpush3.bf16.msra.mxu1 %v6350_v1 }
0x1987   :  { %5606 = vmatprep.subr.bf16.mxu0 %v6351_v13  ;;  %5628 = vmatprep.subr.bf16.mxu1 %v6352_v24 }
0x198a   :  { %5607 = vmatpush3.bf16.msra.mxu0 %v6353_v10  ;;  %5629 = vmatpush3.bf16.msra.mxu1 %v6354_v12 }
0x198b   :  { %5608 = vmatprep.subr.bf16.mxu0 %v6355_v25  ;;  %5630 = vmatprep.subr.bf16.mxu1 %v6356_v26 }
0x198e   :  { %5609 = vmatpush3.bf16.msra.mxu0 %v6357_v28  ;;  %5631 = vmatpush3.bf16.msra.mxu1 %v6358_v29 }
0x198f   :  { %5610 = vmatprep.subr.bf16.mxu0 %v6359_v30  ;;  %5632 = vmatprep.subr.bf16.mxu1 %v6360_v31 }
0x1992   :  { %5611 = vmatpush3.bf16.msra.mxu0 %v6361_v32  ;;  %5633 = vmatpush3.bf16.msra.mxu1 %v6362_v33 }
0x1993   :  { %5612 = vmatprep.subr.bf16.mxu0 %v6363_v34  ;;  %5634 = vmatprep.subr.bf16.mxu1 %v6364_v60 }
0x1996   :  { %5613 = vmatpush3.bf16.msra.mxu0 %v6365_v9  ;;  %5635 = vmatpush3.bf16.msra.mxu1 %v6366_v53 }
0x1997   :  { %5906 = vmatprep.subr.bf16.mxu0 %v6887_v4  ;;  %5926 = vmatprep.subr.bf16.mxu1 %v6887_v4 }
0x1a39   :  { %v3853_v38 = vpop.f32.mrf.mxu0  ;;  %v3896_v39 = vpop.f32.mrf.mxu1 }
0x1a3a   :  { %v7594_v40 = vadd.f32 %v3853_v38, %v3642_v50  ;;  %v7596_v41 = vadd.f32 %v3896_v39, %v3650_v21 }
0x1a3b   :  { %v3855_v43 = vpop.f32.mrf.mxu0  ;;  %v3898_v45 = vpop.f32.mrf.mxu1 }
0x1a3c   :  { %v3905_v7 = vmul.f32 %v7594_v40, %v7594_v40  ;;  %v3907_v55 = vmul.f32 %v7596_v41, %v7596_v41  ;;  %v7602_v6 = vadd.f32 %v3855_v43, %v3646_v56  ;;  %v7604_v61 = vadd.f32 %v3898_v45, %v3654_v35 }
0x1a3d   :  { %v3857_v46 = vpop.f32.mrf.mxu0  ;;  %v3900_v42 = vpop.f32.mrf.mxu1 }
0x1a3e   :  { %v3913_v47 = vmul.f32 %v3905_v7, %v7594_v40  ;;  %v3915_v52 = vmul.f32 %v3907_v55, %v7596_v41  ;;  %v3906_v57 = vmul.f32 %v7602_v6, %v7602_v6  ;;  %v3908_v16 = vmul.f32 %v7604_v61, %v7604_v61 }
0x1a3f   :  { %v7612_v58 = vadd.f32 %v3857_v46, %v3642_v50  ;;  %v7614_v59 = vadd.f32 %v3900_v42, %v3650_v21  ;;  %v3859_v2 = vpop.f32.mrf.mxu0  ;;  %v3902_v0 = vpop.f32.mrf.mxu1 }
0x1a40   :  { %v3921_v62 = vmul.f32 0.044715, %v3913_v47  ;;  %v3923_v15 = vmul.f32 0.044715, %v3915_v52  ;;  %v3914_v5 = vmul.f32 %v3906_v57, %v7602_v6  ;;  %v3916_v14 = vmul.f32 %v3908_v16, %v7604_v61 }
0x1a41   :  { %v3909_v18 = vmul.f32 %v7612_v58, %v7612_v58  ;;  %v3911_v19 = vmul.f32 %v7614_v59, %v7614_v59  ;;  %v7622_v8 = vadd.f32 %v3859_v2, %v3646_v56  ;;  %v7624_v48 = vadd.f32 %v3902_v0, %v3654_v35 }
0x1a42   :  { %v3929_v27 = vadd.f32 %v3921_v62, %v7594_v40  ;;  %v3931_v20 = vadd.f32 %v3923_v15, %v7596_v41  ;;  %v3922_v11 = vmul.f32 0.044715, %v3914_v5  ;;  %v3924_v36 = vmul.f32 0.044715, %v3916_v14 }
0x1a43   :  { %v3917_v22 = vmul.f32 %v3909_v18, %v7612_v58  ;;  %v3919_v23 = vmul.f32 %v3911_v19, %v7614_v59  ;;  %v3910_v49 = vmul.f32 %v7622_v8, %v7622_v8  ;;  %v3912_v37 = vmul.f32 %v7624_v48, %v7624_v48 }
0x1a44   :  { %v3937_v51 = vmul.f32 0.7978846, %v3929_v27  ;;  %v3939_v44 = vmul.f32 0.7978846, %v3931_v20  ;;  %v3930_v1 = vadd.f32 %v3922_v11, %v7602_v6  ;;  %v3932_v13 = vadd.f32 %v3924_v36, %v7604_v61 }
0x1a45   :  { %v3925_v24 = vmul.f32 0.044715, %v3917_v22  ;;  %v3927_v10 = vmul.f32 0.044715, %v3919_v23  ;;  %v3918_v12 = vmul.f32 %v3910_v49, %v7622_v8  ;;  %v3920_v25 = vmul.f32 %v3912_v37, %v7624_v48 }
0x1a46   :  { %6503 = vtanh.f32 %v3937_v51  ;;  %v3938_v26 = vmul.f32 0.7978846, %v3930_v1  ;;  %v3940_v28 = vmul.f32 0.7978846, %v3932_v13 }
0x1a47   :  { %6505 = vtanh.f32 %v3939_v44  ;;  %v3933_v29 = vadd.f32 %v3925_v24, %v7612_v58  ;;  %v3935_v30 = vadd.f32 %v3927_v10, %v7614_v59  ;;  %v3926_v31 = vmul.f32 0.044715, %v3918_v12 }
0x1a48   :  { %6507 = vtanh.f32 %v3938_v26  ;;  %v3928_v32 = vmul.f32 0.044715, %v3920_v25 }
0x1a49   :  { %6509 = vtanh.f32 %v3940_v28  ;;  %v3941_v33 = vmul.f32 0.7978846, %v3933_v29  ;;  %v3943_v34 = vmul.f32 0.7978846, %v3935_v30  ;;  %v3934_v60 = vadd.f32 %v3926_v31, %v7622_v8 }
0x1a4a   :  { %v3936_v9 = vadd.f32 %v3928_v32, %v7624_v48 }
0x1a4b   :  { %6511 = vtanh.f32 %v3941_v33  ;;  %v3942_v53 = vmul.f32 0.7978846, %v3934_v60  ;;  %v7664_v60 = vld [vmem:[%s7933_s17 + $0x78] sm:$0xff]  }
0x1a4c   :  { %6513 = vtanh.f32 %v3943_v34  ;;  %v3944_v63 = vmul.f32 0.7978846, %v3936_v9  ;;  %v7659_v34 = vld [vmem:[%s7933_s17 + $0x38] sm:$0xff]  }
0x1a4d   :  { %6515 = vtanh.f32 %v3942_v53 }
0x1a4e   :  { %6517 = vtanh.f32 %v3944_v63 }
0x1a53   :  { %v6504_v50 = vpop.eup %6503 }
0x1a54   :  { %v6506_v21 = vpop.eup %6505  ;;  %v3953_v43 = vadd.f32 1.0, %v6504_v50 }
0x1a55   :  { %v6508_v56 = vpop.eup %6507  ;;  %v3955_v55 = vadd.f32 1.0, %v6506_v21 }
0x1a56   :  { %v6510_v35 = vpop.eup %6509  ;;  %v3954_v38 = vadd.f32 1.0, %v6508_v56  ;;  %v3961_v0 = vmul.f32 0.5, %v3953_v43  ;;  %v7696_v43 = vld [vmem:[%s7933_s17 + $0x68] sm:$0xff]  }
0x1a57   :  { %v3956_v45 = vadd.f32 1.0, %v6510_v35  ;;  %v3963_v14 = vmul.f32 0.5, %v3955_v55  ;;  %v7719_v55 = vld [vmem:[%s7933_s17 + $0x18] sm:$0xff]  }
0x1a58   :  { %v6512_v39 = vpop.eup %6511  ;;  %v3962_v2 = vmul.f32 0.5, %v3954_v38  ;;  %v3969_v22 = vmul.f32 %v3961_v0, %v7594_v40 }
0x1a59   :  { %v6514_v7 = vpop.eup %6513  ;;  %v3957_v46 = vadd.f32 1.0, %v6512_v39  ;;  %v3964_v5 = vmul.f32 0.5, %v3956_v45  ;;  %v3971_v37 = vmul.f32 %v3963_v14, %v7596_v41  ;;  %v7691_v39 = vld [vmem:[%s7933_s17 + $0x28] sm:$0xff]   ;;  %v7705_v45 = vld [vmem:[%s7933_s17 + $0x20] sm:$0xff]  }
0x1a5a   :  { %v6516_v42 = vpop.eup %6515  ;;  %v3959_v47 = vadd.f32 1.0, %v6514_v7  ;;  %v3970_v11 = vmul.f32 %v3962_v2, %v7602_v6  ;;  %v7710_v7 = vld [vmem:[%s7933_s17 + $0x60] sm:$0xff]  }
0x1a5b   :  { %v6518_v52 = vpop.eup %6517  ;;  %v3965_v57 = vmul.f32 0.5, %v3957_v46  ;;  %v3958_v16 = vadd.f32 1.0, %v6516_v42  ;;  %v3972_v23 = vmul.f32 %v3964_v5, %v7604_v61  ;;  %v5340_v61 = vld [vmem:[#allocation17 + $0x1] ss:$0 sm:$0xff]  ;;  %v7724_v46 = vld [vmem:[%s7933_s17 + $0x58] sm:$0xff]   ;;  %v7764_v2 = vld [vmem:[%s7933_s17 + $0x40] sm:$0xff]  }
0x1a5c   :  { %v3967_v62 = vmul.f32 0.5, %v3959_v47  ;;  %v3960_v15 = vadd.f32 1.0, %v6518_v52  ;;  %v7731_v42 = vld [vmem:[%s7933_s17 + $0x10] sm:$0xff]   ;;  %v7745_v52 = vld [vmem:[%s7933_s17 + $0x8] sm:$0xff]  }
0x1a5d   :  { %v3966_v18 = vmul.f32 0.5, %v3958_v16  ;;  %v3973_v19 = vmul.f32 %v3965_v57, %v7612_v58  ;;  %v7736_v47 = vld [vmem:[%s7933_s17 + $0x50] sm:$0xff]   ;;  %v7750_v57 = vld [vmem:[%s7933_s17 + $0x48] sm:$0xff]   ;;  %v7759_v16 = vld [vmem:[%s7933_s17] sm:$0xff]  }
0x1a5e   :  { %v3968_v27 = vmul.f32 0.5, %v3960_v15  ;;  %v3975_v20 = vmul.f32 %v3967_v62, %v7614_v59 }
0x1a5f   :  { %v3974_v36 = vmul.f32 %v3966_v18, %v7622_v8  ;;  %v3977_v1 = vpack.c.bf16 %v3973_v19, %v3969_v22  ;;  %v5375_v18 = vld [vmem:[%s7931_s15 + $0x1] ss:$0 sm:$0xff]  ;;  %v6383_v22 = vld [vmem:[%s7933_s17 + $0xb8] sm:$0xff]  }
0x1a60   :  { %v3976_v49 = vmul.f32 %v3968_v27, %v7624_v48  ;;  %v3979_v58 = vpack.c.bf16 %v3975_v20, %v3971_v37  ;;  %v5376_v27 = vld [vmem:[%s7932_s16 + $0x1] ss:$0 sm:$0xff]  ;;  %v6384_v37 = vld [vmem:[%s7933_s17 + $0xb0] sm:$0xff]  }
0x1a61   :  { %v3978_v51 = vpack.c.bf16 %v3974_v36, %v3970_v11 }
0x1a62   :  { %v3980_v44 = vpack.c.bf16 %v3976_v49, %v3972_v23 }
0x1a63   :  { %4278 = vmatprep.mubr.bf16.mxu0 %v3978_v51  ;;  %v6385_v51 = vld [vmem:[%s7933_s17 + $0xa8] sm:$0xff]  }
0x1a64   :  { %4319 = vmatprep.mubr.bf16.mxu1 %v3980_v44  ;;  %4279 = vmatmul.mubr.bf16.vlgmr.msra.gmra.mxu0 %v3977_v1  ;;  %v6386_v44 = vld [vmem:[%s7933_s17 + $0xa0] sm:$0xff]   ;;  %v6387_v1 = vld [vmem:[%s7933_s17 + $0x98] sm:$0xff]  }
0x1a65   :  { %4320 = vmatmul.mubr.bf16.vlgmr.msra.gmra.mxu1 %v3979_v58  ;;  %5922 = vmatprep.mubr.msk.bf16.mxu0 %vm6889_vm0, %v6887_v4 }
0x1a66   :  { %5942 = vmatprep.mubr.msk.bf16.mxu1 %vm6889_vm0, %v6887_v4  ;;  %5907 = vmatpush3.bf16.msra.mxu0 %v7659_v34 }
0x1a67   :  { %5927 = vmatpush3.bf16.msra.mxu1 %v7664_v60  ;;  %5908 = vmatprep.subr.bf16.mxu0 %v6887_v4 }
0x1a68   :  { %5928 = vmatprep.subr.bf16.mxu1 %v6887_v4 }
0x1b24   :  { %v5614_v40 = vpop.f32.mrf.mxu0 }
0x1b25   :  { %v5636_v6 = vpop.f32.mrf.mxu1 }
0x1b26   :  { %v5615_v59 = vpop.f32.mrf.mxu0 }
0x1b27   :  { %v5616_v8 = vadd.f32 %v5615_v59, %v5614_v40  ;;  %v5637_v41 = vpop.f32.mrf.mxu1  ;;  %v6388_v40 = vld [vmem:[%s7933_s17 + $0x90] sm:$0xff]  }
0x1b28   :  { %v5617_v48 = vpop.f32.mrf.mxu0  ;;  %v5638_v24 = vadd.f32 %v5637_v41, %v5636_v6 }
0x1b29   :  { %v4281_v13 = vadd.f32 %v5616_v8, %v5340_v61  ;;  %v5639_v10 = vpop.f32.mrf.mxu1  ;;  %v6390_v8 = vld [vmem:[%s7933_s17 + $0x80] sm:$0xff]  }
0x1b2a   :  { %v5618_v12 = vpop.f32.mrf.mxu0 }
0x1b2b   :  { %v4322_v25 = vadd.f32 %v5638_v24, %v4281_v13  ;;  %v5619_v26 = vadd.f32 %v5618_v12, %v5617_v48  ;;  %v5640_v28 = vpop.f32.mrf.mxu1  ;;  %v6391_v13 = vld [vmem:[%s7935_s19 + $0x38] sm:$0xff]   ;;  %v6392_v24 = vld [vmem:[%s7935_s19 + $0x30] sm:$0xff]   ;;  %v6394_v12 = vld [vmem:[%s7935_s19 + $0x20] sm:$0xff]  }
0x1b2c   :  { %v5641_v30 = vadd.f32 %v5640_v28, %v5639_v10  ;;  %v6393_v10 = vld [vmem:[%s7935_s19 + $0x28] sm:$0xff]  }
0x1b2d   :  { %v4284_v29 = vadd.f32 %v5619_v26, %v5340_v61  ;;  %v4328_v31 = vadd.f32 %v4322_v25, %v7581_v17  ;;  %v7671_v17 = vld [vmem:[%s7933_s17 + $0x30] sm:$0xff]   ;;  %v6389_v61 = vld [vmem:[%s7933_s17 + $0x88] sm:$0xff]   ;;  %v6395_v25 = vld [vmem:[%s7935_s19 + $0x18] sm:$0xff]  }
0x1b2e   :  { %5909 = vmatpush3.bf16.msra.mxu0 %v7671_v17  ;;  %v6396_v26 = vld [vmem:[%s7935_s19 + $0x10] sm:$0xff]   ;;  %v6397_v28 = vld [vmem:[%s7935_s19 + $0x8] sm:$0xff]  }
0x1b2f   :  { %v4325_v32 = vadd.f32 %v5641_v30, %v4284_v29  ;;  %4334 = vadd.xlane.f32.xlu0 %v4328_v31  ;;  %5910 = vmatprep.subr.bf16.mxu0 %v6887_v4  ;;  %v6398_v29 = vld [vmem:[%s7935_s19] sm:$0xff]  }
0x1b30   :  { %v4961_v30 = vld [vmem:[%s7964_s23] sm:$0x3] }
0x1b31   :  { %v4329_v33 = vadd.f32 %v4325_v32, %v7583_v3  ;;  %v7676_v3 = vld [vmem:[%s7933_s17 + $0x70] sm:$0xff]  }
0x1b32   :  { %5929 = vmatpush3.bf16.msra.mxu1 %v7676_v3  ;;  %5911 = vmatpush3.bf16.msra.mxu0 %v7691_v39  ;;  %v6400_v32 = vld [vmem:[#allocation23 + $0x30] sm:$0xff]  }
0x1b33   :  { %4336 = vadd.xlane.f32.xlu1 %v4329_v33  ;;  %5930 = vmatprep.subr.bf16.mxu1 %v6887_v4 }
0x1b34   :  { %5912 = vmatprep.subr.bf16.mxu0 %v6887_v4 }
0x1b36   :  { %5931 = vmatpush3.bf16.msra.mxu1 %v7696_v43  ;;  %5913 = vmatpush3.bf16.msra.mxu0 %v7705_v45 }
0x1b37   :  { %5932 = vmatprep.subr.bf16.mxu1 %v6887_v4  ;;  %5914 = vmatprep.subr.bf16.mxu0 %v6887_v4 }
0x1b3a   :  { %5933 = vmatpush3.bf16.msra.mxu1 %v7710_v7  ;;  %5915 = vmatpush3.bf16.msra.mxu0 %v7719_v55 }
0x1b3b   :  { %5934 = vmatprep.subr.bf16.mxu1 %v6887_v4  ;;  %5916 = vmatprep.subr.bf16.mxu0 %v6887_v4 }
0x1b3e   :  { %5935 = vmatpush3.bf16.msra.mxu1 %v7724_v46  ;;  %5917 = vmatpush3.bf16.msra.mxu0 %v7731_v42 }
0x1b3f   :  { %5936 = vmatprep.subr.bf16.mxu1 %v6887_v4  ;;  %5918 = vmatprep.subr.bf16.mxu0 %v6887_v4 }
0x1b42   :  { %5937 = vmatpush3.bf16.msra.mxu1 %v7736_v47  ;;  %5919 = vmatpush3.bf16.msra.mxu0 %v7745_v52 }
0x1b43   :  { %5938 = vmatprep.subr.bf16.mxu1 %v6887_v4  ;;  %5920 = vmatprep.subr.bf16.mxu0 %v6887_v4 }
0x1b46   :  { %5939 = vmatpush3.bf16.msra.mxu1 %v7750_v57  ;;  %5921 = vmatpush3.bf16.msra.mxu0 %v7759_v16 }
0x1b47   :  { %5940 = vmatprep.subr.bf16.mxu1 %v6887_v4  ;;  %5946 = vmatprep.subr.bf16.mxu0 %v6887_v4 }
0x1b4a   :  { %5941 = vmatpush3.bf16.msra.mxu1 %v7764_v2 }
0x1b4b   :  { %5966 = vmatprep.subr.bf16.mxu1 %v6887_v4 }
0x1bb8   :  { %v4335_v9 = vpop.xlane.xlu0 %4334 }
0x1bb9   :  { %v4338_v53 = vmul.f32 0.0078125, %v4335_v9 }
0x1bbb   :  { %v4340_v63 = vsub.f32 %v4328_v31, %v4338_v53  ;;  %v6399_v31 = vld [vmem:[#allocation23 + $0x38] sm:$0xff]  }
0x1bbc   :  { %v4337_v50 = vpop.xlane.xlu1 %4336 }
0x1bbd   :  { %v4339_v21 = vmul.f32 0.0078125, %v4337_v50  ;;  %v4342_v56 = vmul.f32 %v4340_v63, %v4340_v63 }
0x1bbf   :  { %v7684_v35 = vsub.f32 %v4329_v33, %v4339_v21  ;;  %4344 = vadd.xlane.f32.xlu0 %v4342_v56  ;;  %v6401_v33 = vld [vmem:[#allocation23 + $0x28] sm:$0xff]  }
0x1bc1   :  { %v4343_v38 = vmul.f32 %v7684_v35, %v7684_v35 }
0x1bc3   :  { %4346 = vadd.xlane.f32.xlu1 %v4343_v38 }
0x1bd5   :  { %4965 = vperm.xlu0 %6126, %v4961_v30   ;;  %v6406_v30 = vld [vmem:[#allocation23] sm:$0xff]  }
0x1c48   :  { %v4345_v0 = vpop.xlane.xlu0 %4344 }
0x1c49   :  { %v4348_v62 = vmul.f32 0.0078125, %v4345_v0 }
0x1c4b   :  { %v4350_v15 = vadd.f32 1e-12, %v4348_v62  ;;  %v5433_v62 = vld [vmem:[#allocation19] ss:$0 sm:$0xff] }
0x1c4c   :  { %v4347_v14 = vpop.xlane.xlu1 %4346 }
0x1c4d   :  { %6519 = vrsqrt.f32 %v4350_v15  ;;  %v4349_v20 = vmul.f32 0.0078125, %v4347_v14 }
0x1c4f   :  { %v4351_v23 = vadd.f32 1e-12, %v4349_v20 }
0x1c51   :  { %6521 = vrsqrt.f32 %v4351_v23 }
0x1c5a   :  { %v6520_v5 = vpop.eup %6519 }
0x1c5b   :  { %v4354_v19 = vmul.f32 %v6520_v5, %v4340_v63 }
0x1c5d   :  { %v4362_v11 = vmul.f32 %v5375_v18, %v4354_v19 }
0x1c5e   :  { %v6522_v58 = vpop.eup %6521 }
0x1c5f   :  { %v4370_v36 = vadd.f32 %v5376_v27, %v4362_v11  ;;  %v4355_v6 = vmul.f32 %v6522_v58, %v7684_v35 }
0x1c61   :  { %v4375_v49 = vpack.c.bf16 %v4370_v36, %v4370_v36  ;;  %v4363_v59 = vmul.f32 %v5375_v18, %v4355_v6 }
0x1c63   :  { %5923 = vmatmul.mubr.bf16.vlgmr.msra.gmra.mxu0 %v4375_v49  ;;  %5943 = vmatmul.mubr.bf16.vlgmr.msra.gmra.mxu1 %v4375_v49  ;;  %v4371_v41 = vadd.f32 %v5376_v27, %v4363_v59 }
0x1c64   :  { %5947 = vmatpush3.bf16.msra.mxu0 %v6383_v22  ;;  %5967 = vmatpush3.bf16.msra.mxu1 %v7659_v34  ;;  %v6402_v34 = vld [vmem:[#allocation23 + $0x20] sm:$0xff]  }
0x1c65   :  { %5948 = vmatprep.subr.bf16.mxu0 %v6887_v4  ;;  %5968 = vmatprep.subr.bf16.mxu1 %v6887_v4  ;;  %v4712_v48 = vpack.c.bf16 %v4371_v41, %v4371_v41 }
0x1c66   :  { %5962 = vmatprep.mubr.msk.bf16.mxu0 %vm6889_vm0, %v6887_v4  ;;  %5982 = vmatprep.mubr.msk.bf16.mxu1 %vm6889_vm0, %v6887_v4 }
0x1c68   :  { %5949 = vmatpush3.bf16.msra.mxu0 %v6384_v37  ;;  %5969 = vmatpush3.bf16.msra.mxu1 %v7671_v17  ;;  %v6404_v17 = vld [vmem:[#allocation23 + $0x10] sm:$0xff]  }
0x1c69   :  { %5950 = vmatprep.subr.bf16.mxu0 %v6887_v4  ;;  %5970 = vmatprep.subr.bf16.mxu1 %v6887_v4 }
0x1c6c   :  { %5951 = vmatpush3.bf16.msra.mxu0 %v6385_v51  ;;  %5971 = vmatpush3.bf16.msra.mxu1 %v7691_v39 }
0x1c6d   :  { %5952 = vmatprep.subr.bf16.mxu0 %v6887_v4  ;;  %5972 = vmatprep.subr.bf16.mxu1 %v6887_v4 }
0x1c70   :  { %5953 = vmatpush3.bf16.msra.mxu0 %v6386_v44  ;;  %5973 = vmatpush3.bf16.msra.mxu1 %v7705_v45 }
0x1c71   :  { %5954 = vmatprep.subr.bf16.mxu0 %v6887_v4  ;;  %5974 = vmatprep.subr.bf16.mxu1 %v6887_v4 }
0x1c74   :  { %5955 = vmatpush3.bf16.msra.mxu0 %v6387_v1  ;;  %5975 = vmatpush3.bf16.msra.mxu1 %v7719_v55 }
0x1c75   :  { %5956 = vmatprep.subr.bf16.mxu0 %v6887_v4  ;;  %5976 = vmatprep.subr.bf16.mxu1 %v6887_v4 }
0x1c78   :  { %5957 = vmatpush3.bf16.msra.mxu0 %v6388_v40  ;;  %5977 = vmatpush3.bf16.msra.mxu1 %v7731_v42 }
0x1c79   :  { %5958 = vmatprep.subr.bf16.mxu0 %v6887_v4  ;;  %5978 = vmatprep.subr.bf16.mxu1 %v6887_v4 }
0x1c7c   :  { %5959 = vmatpush3.bf16.msra.mxu0 %v6389_v61  ;;  %5979 = vmatpush3.bf16.msra.mxu1 %v7745_v52 }
0x1c7d   :  { %5960 = vmatprep.subr.bf16.mxu0 %v6887_v4  ;;  %5980 = vmatprep.subr.bf16.mxu1 %v6887_v4 }
0x1c80   :  { %5961 = vmatpush3.bf16.msra.mxu0 %v6390_v8  ;;  %5981 = vmatpush3.bf16.msra.mxu1 %v7759_v16 }
0x1c81   :  { %5986 = vmatprep.subr.bf16.mxu0 %v6887_v4  ;;  %6006 = vmatprep.subr.bf16.mxu1 %v6887_v4 }
0x1c83   :  { %5963 = vmatmul.mubr.bf16.vlgmr.msra.gmra.mxu0 %v4375_v49  ;;  %5983 = vmatmul.mubr.bf16.vlgmr.msra.gmra.mxu1 %v4712_v48 }
0x1c84   :  { %5987 = vmatpush3.bf16.msra.mxu0 %v7664_v60  ;;  %6007 = vmatpush3.bf16.msra.mxu1 %v6383_v22  ;;  %v6403_v60 = vld [vmem:[#allocation23 + $0x18] sm:$0xff]  }
0x1c85   :  { %5988 = vmatprep.subr.bf16.mxu0 %v6887_v4  ;;  %6008 = vmatprep.subr.bf16.mxu1 %v6887_v4 }
0x1c86   :  { %6002 = vmatprep.mubr.msk.bf16.mxu0 %vm6889_vm0, %v6887_v4  ;;  %6022 = vmatprep.mubr.msk.bf16.mxu1 %vm6889_vm0, %v6887_v4 }
0x1c88   :  { %5989 = vmatpush3.bf16.msra.mxu0 %v7676_v3  ;;  %6009 = vmatpush3.bf16.msra.mxu1 %v6384_v37 }
0x1c89   :  { %5990 = vmatprep.subr.bf16.mxu0 %v6887_v4  ;;  %6010 = vmatprep.subr.bf16.mxu1 %v6887_v4 }
0x1c8c   :  { %5991 = vmatpush3.bf16.msra.mxu0 %v7696_v43  ;;  %6011 = vmatpush3.bf16.msra.mxu1 %v6385_v51 }
0x1c8d   :  { %5992 = vmatprep.subr.bf16.mxu0 %v6887_v4  ;;  %6012 = vmatprep.subr.bf16.mxu1 %v6887_v4 }
0x1c90   :  { %5993 = vmatpush3.bf16.msra.mxu0 %v7710_v7  ;;  %6013 = vmatpush3.bf16.msra.mxu1 %v6386_v44 }
0x1c91   :  { %5994 = vmatprep.subr.bf16.mxu0 %v6887_v4  ;;  %6014 = vmatprep.subr.bf16.mxu1 %v6887_v4 }
0x1c94   :  { %5995 = vmatpush3.bf16.msra.mxu0 %v7724_v46  ;;  %6015 = vmatpush3.bf16.msra.mxu1 %v6387_v1 }
0x1c95   :  { %5996 = vmatprep.subr.bf16.mxu0 %v6887_v4  ;;  %6016 = vmatprep.subr.bf16.mxu1 %v6887_v4 }
0x1c98   :  { %5997 = vmatpush3.bf16.msra.mxu0 %v7736_v47  ;;  %6017 = vmatpush3.bf16.msra.mxu1 %v6388_v40 }
0x1c99   :  { %5998 = vmatprep.subr.bf16.mxu0 %v6887_v4  ;;  %6018 = vmatprep.subr.bf16.mxu1 %v6887_v4 }
0x1c9c   :  { %5999 = vmatpush3.bf16.msra.mxu0 %v7750_v57  ;;  %6019 = vmatpush3.bf16.msra.mxu1 %v6389_v61 }
0x1c9d   :  { %6000 = vmatprep.subr.bf16.mxu0 %v6887_v4  ;;  %6020 = vmatprep.subr.bf16.mxu1 %v6887_v4 }
0x1ca0   :  { %6001 = vmatpush3.bf16.msra.mxu0 %v7764_v2  ;;  %6021 = vmatpush3.bf16.msra.mxu1 %v6390_v8 }
0x1ca1   :  { %6026 = vmatprep.subr.bf16.mxu0 %v6887_v4  ;;  %6046 = vmatprep.subr.bf16.mxu1 %v6887_v4 }
0x1ca3   :  { %6003 = vmatmul.mubr.bf16.vlgmr.msra.gmra.mxu0 %v4712_v48  ;;  %6023 = vmatmul.mubr.bf16.vlgmr.msra.gmra.mxu1 %v4712_v48 }
0x1ca4   :  { %6042 = vmatprep.mubr.msk.bf16.mxu0 %vm6889_vm0, %v6887_v4  ;;  %6062 = vmatprep.mubr.msk.bf16.mxu1 %vm6889_vm0, %v6887_v4 }
0x1ca5   :  { %6027 = vmatpush3.bf16.msra.mxu0 %v6391_v13  ;;  %6047 = vmatpush3.bf16.msra.mxu1 %v6399_v31  ;;  %v5443_v31 = vld [vmem:[#allocation20] ss:$0 sm:$0xff] }
0x1ca6   :  { %6028 = vmatprep.subr.bf16.mxu0 %v6887_v4  ;;  %6048 = vmatprep.subr.bf16.mxu1 %v6887_v4 }
0x1ca9   :  { %6029 = vmatpush3.bf16.msra.mxu0 %v6392_v24  ;;  %6049 = vmatpush3.bf16.msra.mxu1 %v6400_v32  ;;  %v4966_v32 = vpop.permute.xlu0 %4965 }
0x1caa   :  { %6030 = vmatprep.subr.bf16.mxu0 %v6887_v4  ;;  %6050 = vmatprep.subr.bf16.mxu1 %v6887_v4 }
0x1cad   :  { %6031 = vmatpush3.bf16.msra.mxu0 %v6393_v10  ;;  %6051 = vmatpush3.bf16.msra.mxu1 %v6401_v33  ;;  %v4974_v33 = vmul.f32 %v5443_v31, %v4966_v32 }
0x1cae   :  { %6032 = vmatprep.subr.bf16.mxu0 %v6887_v4  ;;  %6052 = vmatprep.subr.bf16.mxu1 %v6887_v4 }
0x1cb1   :  { %6033 = vmatpush3.bf16.msra.mxu0 %v6394_v12  ;;  %6053 = vmatpush3.bf16.msra.mxu1 %v6402_v34  ;;  %v5444_v34 = vld [vmem:[#allocation22] ss:$0 sm:$0xff] }
0x1cb2   :  { %6034 = vmatprep.subr.bf16.mxu0 %v6887_v4  ;;  %6054 = vmatprep.subr.bf16.mxu1 %v6887_v4 }
0x1cb5   :  { %6035 = vmatpush3.bf16.msra.mxu0 %v6395_v25  ;;  %6055 = vmatpush3.bf16.msra.mxu1 %v6403_v60  ;;  %v5434_v60 = vld [vmem:[%s7936_s20] ss:$0 sm:$0xff] }
0x1cb6   :  { %6036 = vmatprep.subr.bf16.mxu0 %v6887_v4  ;;  %6056 = vmatprep.subr.bf16.mxu1 %v6887_v4 }
0x1cb9   :  { %6037 = vmatpush3.bf16.msra.mxu0 %v6396_v26  ;;  %6057 = vmatpush3.bf16.msra.mxu1 %v6404_v17  ;;  %v4982_v17 = vadd.f32 %v5444_v34, %v4974_v33 }
0x1cba   :  { %6038 = vmatprep.subr.bf16.mxu0 %v6887_v4  ;;  %6058 = vmatprep.subr.bf16.mxu1 %v6887_v4 }
0x1cbd   :  { %6039 = vmatpush3.bf16.msra.mxu0 %v6397_v28 }
0x1cbe   :  { %6040 = vmatprep.subr.bf16.mxu0 %v6887_v4 }
0x1cc1   :  { %6041 = vmatpush3.bf16.msra.mxu0 %v6398_v29  ;;  %v6405_v29 = vld [vmem:[#allocation23 + $0x8] sm:$0xff]  }
0x1cc2   :  { %6059 = vmatpush3.bf16.msra.mxu1 %v6405_v29 }
0x1cc3   :  { %6060 = vmatprep.subr.bf16.mxu1 %v6887_v4  ;;  %v5445_v4 = vld [vmem:[#allocation25] ss:$0 sm:$0xff] }
0x1cc6   :  { %6061 = vmatpush3.bf16.msra.mxu1 %v6406_v30 }
0x1d23   :  { %v4474_v3 = vpop.f32.mrf.mxu0  ;;  %v4579_v9 = vpop.f32.mrf.mxu1 }
0x1d24   :  { %v4691_v47 = vrot.slane %v4474_v3, 7 }
0x1d25   :  { %v5924_v53 = vpop.f32.mrf.mxu0  ;;  %v5944_v63 = vpop.f32.mrf.mxu1 }
0x1d26   :  { %v4692_v57 = vsel %vm4690_vm5, %v4691_v47, 0.0 }
0x1d27   :  { %v4477_v50 = vpop.f32.mrf.mxu0  ;;  %v4582_v21 = vpop.f32.mrf.mxu1  ;;  %v4696_v2 = vadd.f32 %v4692_v57, %v4579_v9 }
0x1d29   :  { %v5925_v56 = vpop.f32.mrf.mxu0  ;;  %v5945_v35 = vpop.f32.mrf.mxu1 }
0x1d43   :  { %v4684_v38 = vpop.f32.mrf.mxu0  ;;  %v4747_v39 = vpop.f32.mrf.mxu1 }
0x1d44   :  { %v4694_v52 = vrot.slane %v4684_v38, 1  ;;  %v4833_v14 = vrot.slane %v4747_v39, 7 }
0x1d45   :  { %v5964_v43 = vpop.f32.mrf.mxu0  ;;  %v5984_v45 = vpop.f32.mrf.mxu1 }
0x1d46   :  { %v4695_v16 = vsel %vm4693_vm6, %v4694_v52, 0.0  ;;  %v4834_v27 = vsel %vm4690_vm5, %v4833_v14, 0.0 }
0x1d47   :  { %v4687_v7 = vpop.f32.mrf.mxu0  ;;  %v4750_v55 = vpop.f32.mrf.mxu1  ;;  %v4697_v0 = vadd.f32 %v4696_v2, %v4695_v16 }
0x1d49   :  { %v5965_v46 = vpop.f32.mrf.mxu0  ;;  %v5985_v42 = vpop.f32.mrf.mxu1  ;;  %v4704_v15 = vadd.f32 %v5433_v62, %v4697_v0 }
0x1d4b   :  { %v4705_v5 = vmax.f32 %v4704_v15, 0.0 }
0x1d4d   :  { %v4706_v18 = vrot.slane %v4705_v5, 4 }
0x1d4f   :  { %v4707_v37 = vmax.f32 %v4705_v5, %v4706_v18 }
0x1d51   :  { %v4708_v61 = vrot.slane %v4707_v37, 2 }
0x1d53   :  { %v4709_v41 = vmax.f32 %v4707_v37, %v4708_v61 }
0x1d55   :  { %v4710_v24 = vrot.slane %v4709_v41, 1 }
0x1d57   :  { %v4711_v25 = vmax.f32 %v4709_v41, %v4710_v24 }
0x1d63   :  { %v4787_v19 = vpop.f32.mrf.mxu0  ;;  %v4827_v20 = vpop.f32.mrf.mxu1 }
0x1d64   :  { %v4837_v11 = vadd.f32 %v4834_v27, %v4787_v19  ;;  %v4835_v36 = vrot.slane %v4827_v20, 1 }
0x1d65   :  { %v6004_v22 = vpop.f32.mrf.mxu0  ;;  %v6024_v23 = vpop.f32.mrf.mxu1 }
0x1d66   :  { %v4836_v49 = vsel %vm4693_vm6, %v4835_v36, 0.0 }
0x1d67   :  { %v4838_v51 = vadd.f32 %v4837_v11, %v4836_v49  ;;  %v4790_v44 = vpop.f32.mrf.mxu0  ;;  %v4830_v1 = vpop.f32.mrf.mxu1 }
0x1d69   :  { %v4839_v58 = vadd.f32 %v5433_v62, %v4838_v51  ;;  %v6005_v40 = vpop.f32.mrf.mxu0  ;;  %v6025_v6 = vpop.f32.mrf.mxu1 }
0x1d6b   :  { %v4840_v59 = vmax.f32 %v4839_v58, 0.0 }
0x1d6d   :  { %v4841_v8 = vrot.slane %v4840_v59, 4 }
0x1d6f   :  { %v4842_v48 = vmax.f32 %v4840_v59, %v4841_v8 }
0x1d71   :  { %v4843_v13 = vrot.slane %v4842_v48, 2 }
0x1d73   :  { %v4844_v10 = vmax.f32 %v4842_v48, %v4843_v13 }
0x1d75   :  { %v4845_v12 = vrot.slane %v4844_v10, 1 }
0x1d77   :  { %v4846_v54 = vmax.f32 %v4844_v10, %v4845_v12 }
0x1d79   :  { %v4848_v26 = vsel %vm4847_vm7, %v4711_v25, %v4846_v54 }
0x1d7a   :  { %v4849_v28 = vpack.c.bf16 %v4848_v26, %v4848_v26 }
0x1d7c   :  { %6043 = vmatmul.mubr.bf16.vlgmr.msra.gmra.mxu0 %v4849_v28 }
0x1e3c   :  { %v4955_v3 = vpop.f32.mrf.mxu0 }
0x1e3d   :  { %v4956_v9 = vadd.f32 %v5434_v60, %v4955_v3 }
0x1e3e   :  { %v6044_v53 = vpop.f32.mrf.mxu0 }
0x1e3f   :  { %v4983_v63 = vadd.f32 %v4982_v17, %v4956_v9 }
0x1e40   :  { %v4958_v50 = vpop.f32.mrf.mxu0 }
0x1e41   :  { %v4984_v21 = vpack.c.bf16 %v4983_v63, %v4983_v63 }
0x1e42   :  { %v6045_v56 = vpop.f32.mrf.mxu0 }
0x1e43   :  { %6063 = vmatmul.mubr.bf16.vlgmr.msra.gmra.mxu1 %v4984_v21 }
0x1f03   :  { %v5090_v35 = vpop.f32.mrf.mxu1 }
0x1f04   :  { %v5091_v38 = vadd.f32 %v5445_v4, %v5090_v35 }
0x1f05   :  { %v6064_v39 = vpop.f32.mrf.mxu1 }
0x1f06   :  { %5096 = vst [vmem:[#allocation26] sm:$0x3] %v5091_v38 }
0x1f07   :  { %v5093_v43 = vpop.f32.mrf.mxu1 }
0x1f08   :  { %6836 = shalt.err (!%p6833_p9)
}
0x1f09   :  { %5106 = dma.vmem_to_hbm [thread:$0]  %s5104_s7, 32, %s7941_s25, [#allocation4]   ;;  %v6065_v45 = vpop.f32.mrf.mxu1 }
0x1f0a   :  { %6861 = dma.done.wait [#allocation4], 32  }
0x1f0b   :  { %6862 = vsyncadd [#allocation4], 4294967264 }
0x1f0c   :  { %5110 = vsyncpa [#allocation3], 1 }
0x1f0d   :  { %5111 = vsyncpa [#allocation6], 1 }
0x1f0e   :  { %5112 = vsyncpa [#allocation9], 1 }
0x1f0f   :  { %5113 = vsyncpa [#allocation12], 1 }
0x1f10   :  { %5114 = vsyncpa [#allocation15], 1 }
0x1f11   :  { %5115 = vsyncpa [#allocation18], 1 }
0x1f12   :  { %5116 = vsyncpa [#allocation21], 1 }
0x1f13   :  { %5117 = vsyncpa [#allocation24], 1 }
0x1f14   :  { %5118 = vsyncpa [#allocation4], 1 }

</bundles_post_ra>
